<compile_context>
chip_gen: v7x
topology: tpu7x:2x2x1
jax: 0.10.0
libtpu: 0.0.40
codegen_flags: <defaults>
</compile_context>

<pallas_src>
import jax
import jax.numpy as jnp
from jax import lax
from jax.experimental import pallas as pl
from jax.experimental.pallas import tpu as pltpu

CDT = jnp.bfloat16  # matmul operand dtype (accumulation stays f32)


# ---------------------------------------------------------------------------
# In-kernel building blocks
# ---------------------------------------------------------------------------
def _conv_bn_relu_pool(in_ref, w_ref, b_ref, out_ref):
    """3x3 valid conv (+ folded BN/bias) + ReLU + 2x2 max-pool, fully in VMEM.

    in_ref : (H, W, C)    f32 activation
    w_ref  : (9*C, OC)    bf16 (f32 when C == 1), BN scale pre-folded
    b_ref  : (1, OC)      f32 effective bias
    out_ref: (PH, PW, OC) f32 scratch, PH = (H-2)//2, PW = (W-2)//2
    """
    H, W, C = in_ref.shape
    PH, PW, OC = out_ref.shape
    OH, OW = H - 2, W - 2
    bias = b_ref[...]  # (1, OC) f32

    # 0/1 selection matrices: pooled[p] = max(m[2p], m[2p+1]) along W expressed
    # as two small matmuls (exact for 0/1 weights; no strided slicing needed).
    rr = lax.broadcasted_iota(jnp.int32, (PW, OW), 0)
    cc = lax.broadcasted_iota(jnp.int32, (PW, OW), 1)
    sel_even = jnp.where(cc == 2 * rr, 1.0, 0.0).astype(CDT)
    sel_odd = jnp.where(cc == 2 * rr + 1, 1.0, 0.0).astype(CDT)

    def conv_row(oh):
        # relu(conv(x)[oh] + bias): 9 shifted-slice contractions, f32 accumulator.
        acc = jnp.zeros((OW, OC), jnp.float32)
        for dy in range(3):
            row = in_ref[oh + dy]                              # (W, C) f32
            for dx in range(3):
                tap = w_ref[pl.ds((dy * 3 + dx) * C, C), :]    # (C, OC)
                xs = row[dx:dx + OW, :]                        # (OW, C) f32
                if C == 1:
                    # IC=1 (conv1): rank-1 update on the VPU; a depth-1 MXU
                    # matmul would waste the whole systolic array.
                    acc = acc + xs * tap
                else:
                    acc = acc + jnp.dot(xs.astype(CDT), tap,
                                        preferred_element_type=jnp.float32)
        return jnp.maximum(acc + bias, 0.0)

    def body(ph, carry):
        # vertical 2x max, then horizontal 2x max via the selection matmuls
        m = jnp.maximum(conv_row(2 * ph), conv_row(2 * ph + 1)).astype(CDT)
        pooled = jnp.maximum(
            jnp.dot(sel_even, m, preferred_element_type=jnp.float32),
            jnp.dot(sel_odd, m, preferred_element_type=jnp.float32))
        out_ref[ph] = pooled.astype(out_ref.dtype)
        return carry

    lax.fori_loop(0, PH, body, 0)


def convnet_kernel(x_ref, w1_ref, b1_ref, w2_ref, b2_ref, w3_ref, b3_ref,
                   w4_ref, b4_ref, wf2_ref, bf2_ref, wf3_ref, bf3_ref,
                   o_ref, a1_ref, a2_ref, a3_ref, a4_ref):
    # Conv stack: conv(+BN)+ReLU+2x2 max-pool per layer; activations never
    # leave VMEM between layers.
    _conv_bn_relu_pool(x_ref, w1_ref, b1_ref, a1_ref)    # (50,50,1) -> (24,24,32)
    _conv_bn_relu_pool(a1_ref, w2_ref, b2_ref, a2_ref)   # -> (11,11,64)
    _conv_bn_relu_pool(a2_ref, w3_ref, b3_ref, a3_ref)   # -> (4,4,128)
    _conv_bn_relu_pool(a3_ref, w4_ref, b4_ref, a4_ref)   # -> (1,1,256)

    # FC head fused into the same kernel: flatten + fc2 + ReLU + fc3 + softmax.
    feat = a4_ref[0]                                     # (1, 256) f32
    h = jnp.dot(feat.astype(CDT), wf2_ref[...],
                preferred_element_type=jnp.float32) + bf2_ref[...]
    h = jnp.maximum(h, 0.0)
    # (dropout == identity in eval mode)
    logits = jnp.dot(h.astype(CDT), wf3_ref[...],
                     preferred_element_type=jnp.float32) + bf3_ref[...]
    mx = jnp.max(logits, axis=-1, keepdims=True)
    e = jnp.exp(logits - mx)
    o_ref[0] = (e / jnp.sum(e, axis=-1, keepdims=True)).astype(o_ref.dtype)


# ---------------------------------------------------------------------------
# Wrapper: fold BN into weights, cast to bf16, build specs, one pallas_call
# ---------------------------------------------------------------------------
def convnet_forward(x_nchw, params):
    x = jnp.transpose(x_nchw, (0, 2, 3, 1)).astype(jnp.float32)  # NCHW -> NHWC
    N, H, W, C = x.shape
    x_rows = x.reshape(N * H, W, C)

    # Flatten conv weights to (KH*KW*IC, OC), fold the BN scale into them and
    # cast matmul operands to bf16 (conv1 stays f32: it runs on the VPU).
    flat_inputs = [x_rows]
    scratch_shapes = []
    hh, ww = H, W
    oc = C
    for (w, scale, bias_eff) in params["convs"]:
        KH, KW, IC, oc = w.shape
        w2d = (w.reshape(KH * KW * IC, oc) * scale[None, :]).astype(
            jnp.float32 if IC == 1 else CDT)
        b2d = bias_eff.reshape(1, oc).astype(jnp.float32)
        flat_inputs += [w2d, b2d]
        hh, ww = (hh - KH + 1) // 2, (ww - KW + 1) // 2
        scratch_shapes.append(pltpu.VMEM((hh, ww, oc), jnp.float32))

    assert (hh, ww) == (1, 1) and params["fc2_w"].shape[0] == hh * ww * oc, \
        "FC head expects the conv stack to reduce to 1x1x256 (50x50 input)."

    flat_inputs += [params["fc2_w"].astype(CDT),
                    params["fc2_b"].reshape(1, -1).astype(jnp.float32),
                    params["fc3_w"].astype(CDT),
                    params["fc3_b"].reshape(1, -1).astype(jnp.float32)]
    n_classes = params["fc3_w"].shape[1]

    def whole_array_spec(a):
        zeros = (0,) * a.ndim
        return pl.BlockSpec(a.shape, lambda n: zeros)

    in_specs = ([pl.BlockSpec((H, W, C), lambda n: (n, 0, 0))]
                + [whole_array_spec(a) for a in flat_inputs[1:]])

    out = pl.pallas_call(
        convnet_kernel,
        out_shape=jax.ShapeDtypeStruct((N, 1, n_classes), jnp.float32),
        grid=(N,),
        in_specs=in_specs,
        out_specs=pl.BlockSpec((1, 1, n_classes), lambda n: (n, 0, 0)),
        scratch_shapes=scratch_shapes,
        compiler_params=pltpu.CompilerParams(
            dimension_semantics=("parallel",)),
    )(*flat_inputs)
    return out.reshape(N, n_classes)


# ---------------------------------------------------------------------------
# Parameters (deterministic init; BN eval-mode stats folded to scale/bias)
# ---------------------------------------------------------------------------
def init_params(key):
    conv_dims = [(1, 32), (32, 64), (64, 128), (128, 256)]  # conv1..conv4
    ks = jax.random.split(key, 2 * len(conv_dims) + 4)
    eps = 1e-5
    convs = []
    for li, (ic, oc) in enumerate(conv_dims):
        w = jax.random.normal(ks[2 * li], (3, 3, ic, oc), jnp.float32) * 0.05
        conv_b = jax.random.normal(ks[2 * li + 1], (oc,), jnp.float32) * 0.05
        if li == 0:
            scale = jnp.ones((oc,), jnp.float32)       # conv1 has no BatchNorm
            bias_eff = conv_b
        else:
            gamma = jnp.ones((oc,), jnp.float32)
            beta = jnp.zeros((oc,), jnp.float32)
            rmean = jnp.zeros((oc,), jnp.float32)
            rvar = jnp.ones((oc,), jnp.float32)
            s = gamma / jnp.sqrt(rvar + eps)
            scale = s
            bias_eff = s * conv_b + (beta - rmean * s)
        convs.append((w, scale, bias_eff))
    fc2_w = jax.random.normal(ks[-4], (256, 512), jnp.float32) * 0.05
    fc2_b = jax.random.normal(ks[-3], (512,), jnp.float32) * 0.05
    fc3_w = jax.random.normal(ks[-2], (512, 101), jnp.float32) * 0.05
    fc3_b = jax.random.normal(ks[-1], (101,), jnp.float32) * 0.05
    return dict(convs=convs, fc2_w=fc2_w, fc2_b=fc2_b, fc3_w=fc3_w, fc3_b=fc3_b)


# ---------------------------------------------------------------------------
# Pure-JAX (XLA, f32) reference used only for validation
# ---------------------------------------------------------------------------
def reference_forward(x_nchw, params):
    x = jnp.transpose(x_nchw, (0, 2, 3, 1)).astype(jnp.float32)
    for (w, scale, bias_eff) in params["convs"]:
        KH, KW, _, OC = w.shape
        N, H, W_, _ = x.shape
        OH, OW = H - KH + 1, W_ - KW + 1
        acc = jnp.zeros((N, OH, OW, OC), jnp.float32)
        for dy in range(KH):
            for dx in range(KW):
                acc = acc + jnp.einsum(
                    "nhwc,co->nhwo", x[:, dy:dy + OH, dx:dx + OW, :], w[dy, dx])
        y = jnp.maximum(acc * scale + bias_eff, 0.0)
        PH, PW = OH // 2, OW // 2
        y = y[:, :2 * PH, :2 * PW, :].reshape(N, PH, 2, PW, 2, OC)
        x = jnp.max(y, axis=(2, 4))
    feat = x.reshape(x.shape[0], -1)
    h = jnp.maximum(feat @ params["fc2_w"] + params["fc2_b"], 0.0)
    logits = h @ params["fc3_w"] + params["fc3_b"]
    return jax.nn.softmax(logits, axis=1)


if __name__ == "__main__":
    key = jax.random.PRNGKey(0)
    kp, kx = jax.random.split(key)
    params = init_params(kp)
    # The FC head requires the conv stack to reduce to 1x1x256 -> 50x50 input.
    x = jax.random.normal(kx, (2, 1, 50, 50), jnp.float32)  # NCHW, batch=2

    out = jax.jit(convnet_forward)(x, params)
    out = jax.block_until_ready(out)

    assert out.shape == (2, 101), out.shape
    assert bool(jnp.all(jnp.isfinite(out)))
    # softmax rows must sum to 1
    assert bool(jnp.allclose(jnp.sum(out, axis=1), 1.0, atol=1e-5))
    # match the pure-JAX f32 reference (bf16 matmul operands -> loose atol)
    ref = reference_forward(x, params)
    max_err = float(jnp.max(jnp.abs(out - ref)))
    assert max_err < 2e-3, f"mismatch vs reference: {max_err}"
    print("KERNEL_OK")
</pallas_src>

<mosaic_0001>
module attributes {stable_mosaic.version = 11 : i64} {
  func.func @convnet_kernel(%arg0: i32, %arg1: memref<50x50x1xf32, #tpu.memory_space<vmem>>, %arg2: memref<9x32xf32, #tpu.memory_space<vmem>>, %arg3: memref<1x32xf32, #tpu.memory_space<vmem>>, %arg4: memref<288x64xbf16, #tpu.memory_space<vmem>>, %arg5: memref<1x64xf32, #tpu.memory_space<vmem>>, %arg6: memref<576x128xbf16, #tpu.memory_space<vmem>>, %arg7: memref<1x128xf32, #tpu.memory_space<vmem>>, %arg8: memref<1152x256xbf16, #tpu.memory_space<vmem>>, %arg9: memref<1x256xf32, #tpu.memory_space<vmem>>, %arg10: memref<256x512xbf16, #tpu.memory_space<vmem>>, %arg11: memref<1x512xf32, #tpu.memory_space<vmem>>, %arg12: memref<512x101xbf16, #tpu.memory_space<vmem>>, %arg13: memref<1x101xf32, #tpu.memory_space<vmem>>, %arg14: memref<1x1x101xf32, #tpu.memory_space<vmem>>, %arg15: memref<24x24x32xf32, #tpu.memory_space<vmem>>, %arg16: memref<11x11x64xf32, #tpu.memory_space<vmem>>, %arg17: memref<4x4x128xf32, #tpu.memory_space<vmem>>, %arg18: memref<1x1x256xf32, #tpu.memory_space<vmem>>) attributes {dimension_semantics = [#tpu.dimension_semantics<parallel>], iteration_bounds = array<i64: 2>, scalar_prefetch = 0 : i64, scratch_operands = 4 : i64, tpu.core_type = #tpu.core_type<tc>, window_params = [{transform_indices = @transform_0, window_bounds = array<i64: 50, 50, 1>}, {pipeline_mode = #tpu.pipeline_mode<synchronous>, transform_indices = @transform_1, window_bounds = array<i64: 9, 32>}, {pipeline_mode = #tpu.pipeline_mode<synchronous>, transform_indices = @transform_2, window_bounds = array<i64: 1, 32>}, {pipeline_mode = #tpu.pipeline_mode<synchronous>, transform_indices = @transform_3, window_bounds = array<i64: 288, 64>}, {pipeline_mode = #tpu.pipeline_mode<synchronous>, transform_indices = @transform_4, window_bounds = array<i64: 1, 64>}, {pipeline_mode = #tpu.pipeline_mode<synchronous>, transform_indices = @transform_5, window_bounds = array<i64: 576, 128>}, {pipeline_mode = #tpu.pipeline_mode<synchronous>, transform_indices = @transform_6, window_bounds = array<i64: 1, 128>}, {pipeline_mode = #tpu.pipeline_mode<synchronous>, transform_indices = @transform_7, window_bounds = array<i64: 1152, 256>}, {pipeline_mode = #tpu.pipeline_mode<synchronous>, transform_indices = @transform_8, window_bounds = array<i64: 1, 256>}, {pipeline_mode = #tpu.pipeline_mode<synchronous>, transform_indices = @transform_9, window_bounds = array<i64: 256, 512>}, {pipeline_mode = #tpu.pipeline_mode<synchronous>, transform_indices = @transform_10, window_bounds = array<i64: 1, 512>}, {pipeline_mode = #tpu.pipeline_mode<synchronous>, transform_indices = @transform_11, window_bounds = array<i64: 512, 101>}, {pipeline_mode = #tpu.pipeline_mode<synchronous>, transform_indices = @transform_12, window_bounds = array<i64: 1, 101>}, {transform_indices = @transform_13, window_bounds = array<i64: 1, 1, 101>}]} {
    %c0 = arith.constant 0 : index
    %c0_0 = arith.constant 0 : index
    %0 = vector.load %arg3[%c0, %c0_0] : memref<1x32xf32, #tpu.memory_space<vmem>>, vector<1x32xf32>
    %1 = tpu.iota {dimensions = array<i32: 0>} : vector<24x48xi32>
    %2 = tpu.iota {dimensions = array<i32: 1>} : vector<24x48xi32>
    %c2_i32 = arith.constant 2 : i32
    %3 = vector.broadcast %c2_i32 : i32 to vector<24x48xi32>
    %4 = arith.muli %3, %1 : vector<24x48xi32>
    %5 = arith.cmpi eq, %2, %4 : vector<24x48xi32>
    %cst = arith.constant 1.000000e+00 : f32
    %cst_1 = arith.constant 0.000000e+00 : f32
    %6 = vector.broadcast %cst : f32 to vector<24x48xf32>
    %7 = vector.broadcast %cst_1 : f32 to vector<24x48xf32>
    %8 = arith.select %5, %6, %7 : vector<24x48xi1>, vector<24x48xf32>
    %9 = arith.truncf %8 : vector<24x48xf32> to vector<24x48xbf16>
    %c2_i32_2 = arith.constant 2 : i32
    %10 = vector.broadcast %c2_i32_2 : i32 to vector<24x48xi32>
    %11 = arith.muli %10, %1 : vector<24x48xi32>
    %c1_i32 = arith.constant 1 : i32
    %12 = vector.broadcast %c1_i32 : i32 to vector<24x48xi32>
    %13 = arith.addi %11, %12 : vector<24x48xi32>
    %14 = arith.cmpi eq, %2, %13 : vector<24x48xi32>
    %cst_3 = arith.constant 1.000000e+00 : f32
    %cst_4 = arith.constant 0.000000e+00 : f32
    %15 = vector.broadcast %cst_3 : f32 to vector<24x48xf32>
    %16 = vector.broadcast %cst_4 : f32 to vector<24x48xf32>
    %17 = arith.select %14, %15, %16 : vector<24x48xi1>, vector<24x48xf32>
    %18 = arith.truncf %17 : vector<24x48xf32> to vector<24x48xbf16>
    %c0_i32 = arith.constant 0 : i32
    %c24_i32 = arith.constant 24 : i32
    %19 = arith.addi %c0_i32, %c24_i32 : i32
    %c1_i32_5 = arith.constant 1 : i32
    scf.for %arg19 = %c0_i32 to %19 step %c1_i32_5  : i32 {
      %c2_i32_136 = arith.constant 2 : i32
      %241 = arith.muli %c2_i32_136, %arg19 : i32
      %cst_137 = arith.constant 0.000000e+00 : f32
      %242 = vector.broadcast %cst_137 : f32 to vector<48x32xf32>
      %c0_i32_138 = arith.constant 0 : i32
      %243 = arith.addi %241, %c0_i32_138 : i32
      %244 = arith.index_cast %243 : i32 to index
      %c0_139 = arith.constant 0 : index
      %c0_140 = arith.constant 0 : index
      %245 = vector.load %arg1[%244, %c0_139, %c0_140] : memref<50x50x1xf32, #tpu.memory_space<vmem>>, vector<1x50x1xf32>
      %246 = vector.shape_cast %245 : vector<1x50x1xf32> to vector<50x1xf32>
      %c0_141 = arith.constant 0 : index
      %c0_142 = arith.constant 0 : index
      %247 = vector.load %arg2[%c0_141, %c0_142] : memref<9x32xf32, #tpu.memory_space<vmem>>, vector<1x32xf32>
      %248 = vector.extract_strided_slice %246 {offsets = [0, 0], sizes = [48, 1], strides = [1, 1]} : vector<50x1xf32> to vector<48x1xf32>
      %249 = vector.broadcast %248 : vector<48x1xf32> to vector<48x32xf32>
      %250 = vector.broadcast %247 : vector<1x32xf32> to vector<48x32xf32>
      %251 = arith.mulf %249, %250 : vector<48x32xf32>
      %252 = arith.addf %242, %251 : vector<48x32xf32>
      %c1 = arith.constant 1 : index
      %c0_143 = arith.constant 0 : index
      %253 = vector.load %arg2[%c1, %c0_143] : memref<9x32xf32, #tpu.memory_space<vmem>>, vector<1x32xf32>
      %254 = vector.extract_strided_slice %246 {offsets = [1, 0], sizes = [48, 1], strides = [1, 1]} : vector<50x1xf32> to vector<48x1xf32>
      %255 = vector.broadcast %254 : vector<48x1xf32> to vector<48x32xf32>
      %256 = vector.broadcast %253 : vector<1x32xf32> to vector<48x32xf32>
      %257 = arith.mulf %255, %256 : vector<48x32xf32>
      %258 = arith.addf %252, %257 : vector<48x32xf32>
      %c2 = arith.constant 2 : index
      %c0_144 = arith.constant 0 : index
      %259 = vector.load %arg2[%c2, %c0_144] : memref<9x32xf32, #tpu.memory_space<vmem>>, vector<1x32xf32>
      %260 = vector.extract_strided_slice %246 {offsets = [2, 0], sizes = [48, 1], strides = [1, 1]} : vector<50x1xf32> to vector<48x1xf32>
      %261 = vector.broadcast %260 : vector<48x1xf32> to vector<48x32xf32>
      %262 = vector.broadcast %259 : vector<1x32xf32> to vector<48x32xf32>
      %263 = arith.mulf %261, %262 : vector<48x32xf32>
      %264 = arith.addf %258, %263 : vector<48x32xf32>
      %c1_i32_145 = arith.constant 1 : i32
      %265 = arith.addi %241, %c1_i32_145 : i32
      %266 = arith.index_cast %265 : i32 to index
      %c0_146 = arith.constant 0 : index
      %c0_147 = arith.constant 0 : index
      %267 = vector.load %arg1[%266, %c0_146, %c0_147] : memref<50x50x1xf32, #tpu.memory_space<vmem>>, vector<1x50x1xf32>
      %268 = vector.shape_cast %267 : vector<1x50x1xf32> to vector<50x1xf32>
      %c3 = arith.constant 3 : index
      %c0_148 = arith.constant 0 : index
      %269 = vector.load %arg2[%c3, %c0_148] : memref<9x32xf32, #tpu.memory_space<vmem>>, vector<1x32xf32>
      %270 = vector.extract_strided_slice %268 {offsets = [0, 0], sizes = [48, 1], strides = [1, 1]} : vector<50x1xf32> to vector<48x1xf32>
      %271 = vector.broadcast %270 : vector<48x1xf32> to vector<48x32xf32>
      %272 = vector.broadcast %269 : vector<1x32xf32> to vector<48x32xf32>
      %273 = arith.mulf %271, %272 : vector<48x32xf32>
      %274 = arith.addf %264, %273 : vector<48x32xf32>
      %c4 = arith.constant 4 : index
      %c0_149 = arith.constant 0 : index
      %275 = vector.load %arg2[%c4, %c0_149] : memref<9x32xf32, #tpu.memory_space<vmem>>, vector<1x32xf32>
      %276 = vector.extract_strided_slice %268 {offsets = [1, 0], sizes = [48, 1], strides = [1, 1]} : vector<50x1xf32> to vector<48x1xf32>
      %277 = vector.broadcast %276 : vector<48x1xf32> to vector<48x32xf32>
      %278 = vector.broadcast %275 : vector<1x32xf32> to vector<48x32xf32>
      %279 = arith.mulf %277, %278 : vector<48x32xf32>
      %280 = arith.addf %274, %279 : vector<48x32xf32>
      %c5 = arith.constant 5 : index
      %c0_150 = arith.constant 0 : index
      %281 = vector.load %arg2[%c5, %c0_150] : memref<9x32xf32, #tpu.memory_space<vmem>>, vector<1x32xf32>
      %282 = vector.extract_strided_slice %268 {offsets = [2, 0], sizes = [48, 1], strides = [1, 1]} : vector<50x1xf32> to vector<48x1xf32>
      %283 = vector.broadcast %282 : vector<48x1xf32> to vector<48x32xf32>
      %284 = vector.broadcast %281 : vector<1x32xf32> to vector<48x32xf32>
      %285 = arith.mulf %283, %284 : vector<48x32xf32>
      %286 = arith.addf %280, %285 : vector<48x32xf32>
      %c2_i32_151 = arith.constant 2 : i32
      %287 = arith.addi %241, %c2_i32_151 : i32
      %288 = arith.index_cast %287 : i32 to index
      %c0_152 = arith.constant 0 : index
      %c0_153 = arith.constant 0 : index
      %289 = vector.load %arg1[%288, %c0_152, %c0_153] : memref<50x50x1xf32, #tpu.memory_space<vmem>>, vector<1x50x1xf32>
      %290 = vector.shape_cast %289 : vector<1x50x1xf32> to vector<50x1xf32>
      %c6 = arith.constant 6 : index
      %c0_154 = arith.constant 0 : index
      %291 = vector.load %arg2[%c6, %c0_154] : memref<9x32xf32, #tpu.memory_space<vmem>>, vector<1x32xf32>
      %292 = vector.extract_strided_slice %290 {offsets = [0, 0], sizes = [48, 1], strides = [1, 1]} : vector<50x1xf32> to vector<48x1xf32>
      %293 = vector.broadcast %292 : vector<48x1xf32> to vector<48x32xf32>
      %294 = vector.broadcast %291 : vector<1x32xf32> to vector<48x32xf32>
      %295 = arith.mulf %293, %294 : vector<48x32xf32>
      %296 = arith.addf %286, %295 : vector<48x32xf32>
      %c7 = arith.constant 7 : index
      %c0_155 = arith.constant 0 : index
      %297 = vector.load %arg2[%c7, %c0_155] : memref<9x32xf32, #tpu.memory_space<vmem>>, vector<1x32xf32>
      %298 = vector.extract_strided_slice %290 {offsets = [1, 0], sizes = [48, 1], strides = [1, 1]} : vector<50x1xf32> to vector<48x1xf32>
      %299 = vector.broadcast %298 : vector<48x1xf32> to vector<48x32xf32>
      %300 = vector.broadcast %297 : vector<1x32xf32> to vector<48x32xf32>
      %301 = arith.mulf %299, %300 : vector<48x32xf32>
      %302 = arith.addf %296, %301 : vector<48x32xf32>
      %c8 = arith.constant 8 : index
      %c0_156 = arith.constant 0 : index
      %303 = vector.load %arg2[%c8, %c0_156] : memref<9x32xf32, #tpu.memory_space<vmem>>, vector<1x32xf32>
      %304 = vector.extract_strided_slice %290 {offsets = [2, 0], sizes = [48, 1], strides = [1, 1]} : vector<50x1xf32> to vector<48x1xf32>
      %305 = vector.broadcast %304 : vector<48x1xf32> to vector<48x32xf32>
      %306 = vector.broadcast %303 : vector<1x32xf32> to vector<48x32xf32>
      %307 = arith.mulf %305, %306 : vector<48x32xf32>
      %308 = arith.addf %302, %307 : vector<48x32xf32>
      %309 = vector.broadcast %0 : vector<1x32xf32> to vector<48x32xf32>
      %310 = arith.addf %308, %309 : vector<48x32xf32>
      %cst_157 = arith.constant 0.000000e+00 : f32
      %311 = vector.broadcast %cst_157 : f32 to vector<48x32xf32>
      %312 = arith.maximumf %310, %311 : vector<48x32xf32>
      %c2_i32_158 = arith.constant 2 : i32
      %313 = arith.muli %c2_i32_158, %arg19 : i32
      %c1_i32_159 = arith.constant 1 : i32
      %314 = arith.addi %313, %c1_i32_159 : i32
      %cst_160 = arith.constant 0.000000e+00 : f32
      %315 = vector.broadcast %cst_160 : f32 to vector<48x32xf32>
      %c0_i32_161 = arith.constant 0 : i32
      %316 = arith.addi %314, %c0_i32_161 : i32
      %317 = arith.index_cast %316 : i32 to index
      %c0_162 = arith.constant 0 : index
      %c0_163 = arith.constant 0 : index
      %318 = vector.load %arg1[%317, %c0_162, %c0_163] : memref<50x50x1xf32, #tpu.memory_space<vmem>>, vector<1x50x1xf32>
      %319 = vector.shape_cast %318 : vector<1x50x1xf32> to vector<50x1xf32>
      %c0_164 = arith.constant 0 : index
      %c0_165 = arith.constant 0 : index
      %320 = vector.load %arg2[%c0_164, %c0_165] : memref<9x32xf32, #tpu.memory_space<vmem>>, vector<1x32xf32>
      %321 = vector.extract_strided_slice %319 {offsets = [0, 0], sizes = [48, 1], strides = [1, 1]} : vector<50x1xf32> to vector<48x1xf32>
      %322 = vector.broadcast %321 : vector<48x1xf32> to vector<48x32xf32>
      %323 = vector.broadcast %320 : vector<1x32xf32> to vector<48x32xf32>
      %324 = arith.mulf %322, %323 : vector<48x32xf32>
      %325 = arith.addf %315, %324 : vector<48x32xf32>
      %c1_166 = arith.constant 1 : index
      %c0_167 = arith.constant 0 : index
      %326 = vector.load %arg2[%c1_166, %c0_167] : memref<9x32xf32, #tpu.memory_space<vmem>>, vector<1x32xf32>
      %327 = vector.extract_strided_slice %319 {offsets = [1, 0], sizes = [48, 1], strides = [1, 1]} : vector<50x1xf32> to vector<48x1xf32>
      %328 = vector.broadcast %327 : vector<48x1xf32> to vector<48x32xf32>
      %329 = vector.broadcast %326 : vector<1x32xf32> to vector<48x32xf32>
      %330 = arith.mulf %328, %329 : vector<48x32xf32>
      %331 = arith.addf %325, %330 : vector<48x32xf32>
      %c2_168 = arith.constant 2 : index
      %c0_169 = arith.constant 0 : index
      %332 = vector.load %arg2[%c2_168, %c0_169] : memref<9x32xf32, #tpu.memory_space<vmem>>, vector<1x32xf32>
      %333 = vector.extract_strided_slice %319 {offsets = [2, 0], sizes = [48, 1], strides = [1, 1]} : vector<50x1xf32> to vector<48x1xf32>
      %334 = vector.broadcast %333 : vector<48x1xf32> to vector<48x32xf32>
      %335 = vector.broadcast %332 : vector<1x32xf32> to vector<48x32xf32>
      %336 = arith.mulf %334, %335 : vector<48x32xf32>
      %337 = arith.addf %331, %336 : vector<48x32xf32>
      %c1_i32_170 = arith.constant 1 : i32
      %338 = arith.addi %314, %c1_i32_170 : i32
      %339 = arith.index_cast %338 : i32 to index
      %c0_171 = arith.constant 0 : index
      %c0_172 = arith.constant 0 : index
      %340 = vector.load %arg1[%339, %c0_171, %c0_172] : memref<50x50x1xf32, #tpu.memory_space<vmem>>, vector<1x50x1xf32>
      %341 = vector.shape_cast %340 : vector<1x50x1xf32> to vector<50x1xf32>
      %c3_173 = arith.constant 3 : index
      %c0_174 = arith.constant 0 : index
      %342 = vector.load %arg2[%c3_173, %c0_174] : memref<9x32xf32, #tpu.memory_space<vmem>>, vector<1x32xf32>
      %343 = vector.extract_strided_slice %341 {offsets = [0, 0], sizes = [48, 1], strides = [1, 1]} : vector<50x1xf32> to vector<48x1xf32>
      %344 = vector.broadcast %343 : vector<48x1xf32> to vector<48x32xf32>
      %345 = vector.broadcast %342 : vector<1x32xf32> to vector<48x32xf32>
      %346 = arith.mulf %344, %345 : vector<48x32xf32>
      %347 = arith.addf %337, %346 : vector<48x32xf32>
      %c4_175 = arith.constant 4 : index
      %c0_176 = arith.constant 0 : index
      %348 = vector.load %arg2[%c4_175, %c0_176] : memref<9x32xf32, #tpu.memory_space<vmem>>, vector<1x32xf32>
      %349 = vector.extract_strided_slice %341 {offsets = [1, 0], sizes = [48, 1], strides = [1, 1]} : vector<50x1xf32> to vector<48x1xf32>
      %350 = vector.broadcast %349 : vector<48x1xf32> to vector<48x32xf32>
      %351 = vector.broadcast %348 : vector<1x32xf32> to vector<48x32xf32>
      %352 = arith.mulf %350, %351 : vector<48x32xf32>
      %353 = arith.addf %347, %352 : vector<48x32xf32>
      %c5_177 = arith.constant 5 : index
      %c0_178 = arith.constant 0 : index
      %354 = vector.load %arg2[%c5_177, %c0_178] : memref<9x32xf32, #tpu.memory_space<vmem>>, vector<1x32xf32>
      %355 = vector.extract_strided_slice %341 {offsets = [2, 0], sizes = [48, 1], strides = [1, 1]} : vector<50x1xf32> to vector<48x1xf32>
      %356 = vector.broadcast %355 : vector<48x1xf32> to vector<48x32xf32>
      %357 = vector.broadcast %354 : vector<1x32xf32> to vector<48x32xf32>
      %358 = arith.mulf %356, %357 : vector<48x32xf32>
      %359 = arith.addf %353, %358 : vector<48x32xf32>
      %c2_i32_179 = arith.constant 2 : i32
      %360 = arith.addi %314, %c2_i32_179 : i32
      %361 = arith.index_cast %360 : i32 to index
      %c0_180 = arith.constant 0 : index
      %c0_181 = arith.constant 0 : index
      %362 = vector.load %arg1[%361, %c0_180, %c0_181] : memref<50x50x1xf32, #tpu.memory_space<vmem>>, vector<1x50x1xf32>
      %363 = vector.shape_cast %362 : vector<1x50x1xf32> to vector<50x1xf32>
      %c6_182 = arith.constant 6 : index
      %c0_183 = arith.constant 0 : index
      %364 = vector.load %arg2[%c6_182, %c0_183] : memref<9x32xf32, #tpu.memory_space<vmem>>, vector<1x32xf32>
      %365 = vector.extract_strided_slice %363 {offsets = [0, 0], sizes = [48, 1], strides = [1, 1]} : vector<50x1xf32> to vector<48x1xf32>
      %366 = vector.broadcast %365 : vector<48x1xf32> to vector<48x32xf32>
      %367 = vector.broadcast %364 : vector<1x32xf32> to vector<48x32xf32>
      %368 = arith.mulf %366, %367 : vector<48x32xf32>
      %369 = arith.addf %359, %368 : vector<48x32xf32>
      %c7_184 = arith.constant 7 : index
      %c0_185 = arith.constant 0 : index
      %370 = vector.load %arg2[%c7_184, %c0_185] : memref<9x32xf32, #tpu.memory_space<vmem>>, vector<1x32xf32>
      %371 = vector.extract_strided_slice %363 {offsets = [1, 0], sizes = [48, 1], strides = [1, 1]} : vector<50x1xf32> to vector<48x1xf32>
      %372 = vector.broadcast %371 : vector<48x1xf32> to vector<48x32xf32>
      %373 = vector.broadcast %370 : vector<1x32xf32> to vector<48x32xf32>
      %374 = arith.mulf %372, %373 : vector<48x32xf32>
      %375 = arith.addf %369, %374 : vector<48x32xf32>
      %c8_186 = arith.constant 8 : index
      %c0_187 = arith.constant 0 : index
      %376 = vector.load %arg2[%c8_186, %c0_187] : memref<9x32xf32, #tpu.memory_space<vmem>>, vector<1x32xf32>
      %377 = vector.extract_strided_slice %363 {offsets = [2, 0], sizes = [48, 1], strides = [1, 1]} : vector<50x1xf32> to vector<48x1xf32>
      %378 = vector.broadcast %377 : vector<48x1xf32> to vector<48x32xf32>
      %379 = vector.broadcast %376 : vector<1x32xf32> to vector<48x32xf32>
      %380 = arith.mulf %378, %379 : vector<48x32xf32>
      %381 = arith.addf %375, %380 : vector<48x32xf32>
      %382 = vector.broadcast %0 : vector<1x32xf32> to vector<48x32xf32>
      %383 = arith.addf %381, %382 : vector<48x32xf32>
      %cst_188 = arith.constant 0.000000e+00 : f32
      %384 = vector.broadcast %cst_188 : f32 to vector<48x32xf32>
      %385 = arith.maximumf %383, %384 : vector<48x32xf32>
      %386 = arith.maximumf %312, %385 : vector<48x32xf32>
      %387 = arith.truncf %386 : vector<48x32xf32> to vector<48x32xbf16>
      %cst_189 = arith.constant dense<0.000000e+00> : vector<24x32xf32>
      %388 = tpu.matmul %9, %387, %cst_189 {dimension_numbers = #tpu.dot_dimension_numbers<[1], [0], [0], [1], [0, 0, 1, 1], [], []>} : vector<24x48xbf16>, vector<48x32xbf16>, vector<24x32xf32> -> vector<24x32xf32>
      %cst_190 = arith.constant dense<0.000000e+00> : vector<24x32xf32>
      %389 = tpu.matmul %18, %387, %cst_190 {dimension_numbers = #tpu.dot_dimension_numbers<[1], [0], [0], [1], [0, 0, 1, 1], [], []>} : vector<24x48xbf16>, vector<48x32xbf16>, vector<24x32xf32> -> vector<24x32xf32>
      %390 = arith.maximumf %388, %389 : vector<24x32xf32>
      %391 = arith.index_cast %arg19 : i32 to index
      %c0_191 = arith.constant 0 : index
      %c0_192 = arith.constant 0 : index
      %392 = vector.load %arg15[%391, %c0_191, %c0_192] : memref<24x24x32xf32, #tpu.memory_space<vmem>>, vector<1x24x32xf32>
      %393 = vector.shape_cast %392 : vector<1x24x32xf32> to vector<24x32xf32>
      %394 = vector.shape_cast %390 : vector<24x32xf32> to vector<1x24x32xf32>
      tpu.vector_store %arg15[%391, %c0_191, %c0_192], %394 {strides = array<i32>} : memref<24x24x32xf32, #tpu.memory_space<vmem>>, vector<1x24x32xf32>,
    }
    %c24_i32_6 = arith.constant 24 : i32
    %c0_7 = arith.constant 0 : index
    %c0_8 = arith.constant 0 : index
    %20 = vector.load %arg5[%c0_7, %c0_8] : memref<1x64xf32, #tpu.memory_space<vmem>>, vector<1x64xf32>
    %21 = tpu.iota {dimensions = array<i32: 0>} : vector<11x22xi32>
    %22 = tpu.iota {dimensions = array<i32: 1>} : vector<11x22xi32>
    %c2_i32_9 = arith.constant 2 : i32
    %23 = vector.broadcast %c2_i32_9 : i32 to vector<11x22xi32>
    %24 = arith.muli %23, %21 : vector<11x22xi32>
    %25 = arith.cmpi eq, %22, %24 : vector<11x22xi32>
    %cst_10 = arith.constant 1.000000e+00 : f32
    %cst_11 = arith.constant 0.000000e+00 : f32
    %26 = vector.broadcast %cst_10 : f32 to vector<11x22xf32>
    %27 = vector.broadcast %cst_11 : f32 to vector<11x22xf32>
    %28 = arith.select %25, %26, %27 : vector<11x22xi1>, vector<11x22xf32>
    %29 = arith.truncf %28 : vector<11x22xf32> to vector<11x22xbf16>
    %c2_i32_12 = arith.constant 2 : i32
    %30 = vector.broadcast %c2_i32_12 : i32 to vector<11x22xi32>
    %31 = arith.muli %30, %21 : vector<11x22xi32>
    %c1_i32_13 = arith.constant 1 : i32
    %32 = vector.broadcast %c1_i32_13 : i32 to vector<11x22xi32>
    %33 = arith.addi %31, %32 : vector<11x22xi32>
    %34 = arith.cmpi eq, %22, %33 : vector<11x22xi32>
    %cst_14 = arith.constant 1.000000e+00 : f32
    %cst_15 = arith.constant 0.000000e+00 : f32
    %35 = vector.broadcast %cst_14 : f32 to vector<11x22xf32>
    %36 = vector.broadcast %cst_15 : f32 to vector<11x22xf32>
    %37 = arith.select %34, %35, %36 : vector<11x22xi1>, vector<11x22xf32>
    %38 = arith.truncf %37 : vector<11x22xf32> to vector<11x22xbf16>
    %c0_i32_16 = arith.constant 0 : i32
    %c11_i32 = arith.constant 11 : i32
    %39 = arith.addi %c0_i32_16, %c11_i32 : i32
    %c1_i32_17 = arith.constant 1 : i32
    scf.for %arg19 = %c0_i32_16 to %39 step %c1_i32_17  : i32 {
      %c2_i32_136 = arith.constant 2 : i32
      %241 = arith.muli %c2_i32_136, %arg19 : i32
      %cst_137 = arith.constant 0.000000e+00 : f32
      %242 = vector.broadcast %cst_137 : f32 to vector<22x64xf32>
      %c0_i32_138 = arith.constant 0 : i32
      %243 = arith.addi %241, %c0_i32_138 : i32
      %244 = arith.index_cast %243 : i32 to index
      %c0_139 = arith.constant 0 : index
      %c0_140 = arith.constant 0 : index
      %245 = vector.load %arg15[%244, %c0_139, %c0_140] : memref<24x24x32xf32, #tpu.memory_space<vmem>>, vector<1x24x32xf32>
      %246 = vector.shape_cast %245 : vector<1x24x32xf32> to vector<24x32xf32>
      %c0_141 = arith.constant 0 : index
      %c0_142 = arith.constant 0 : index
      %247 = vector.load %arg4[%c0_141, %c0_142] : memref<288x64xbf16, #tpu.memory_space<vmem>>, vector<32x64xbf16>
      %248 = vector.extract_strided_slice %246 {offsets = [0, 0], sizes = [22, 32], strides = [1, 1]} : vector<24x32xf32> to vector<22x32xf32>
      %249 = arith.truncf %248 : vector<22x32xf32> to vector<22x32xbf16>
      %cst_143 = arith.constant dense<0.000000e+00> : vector<22x64xf32>
      %250 = tpu.matmul %249, %247, %cst_143 {dimension_numbers = #tpu.dot_dimension_numbers<[1], [0], [0], [1], [0, 0, 1, 1], [], []>} : vector<22x32xbf16>, vector<32x64xbf16>, vector<22x64xf32> -> vector<22x64xf32>
      %251 = arith.addf %242, %250 : vector<22x64xf32>
      %c32 = arith.constant 32 : index
      %c0_144 = arith.constant 0 : index
      %252 = vector.load %arg4[%c32, %c0_144] : memref<288x64xbf16, #tpu.memory_space<vmem>>, vector<32x64xbf16>
      %253 = vector.extract_strided_slice %246 {offsets = [1, 0], sizes = [22, 32], strides = [1, 1]} : vector<24x32xf32> to vector<22x32xf32>
      %254 = arith.truncf %253 : vector<22x32xf32> to vector<22x32xbf16>
      %cst_145 = arith.constant dense<0.000000e+00> : vector<22x64xf32>
      %255 = tpu.matmul %254, %252, %cst_145 {dimension_numbers = #tpu.dot_dimension_numbers<[1], [0], [0], [1], [0, 0, 1, 1], [], []>} : vector<22x32xbf16>, vector<32x64xbf16>, vector<22x64xf32> -> vector<22x64xf32>
      %256 = arith.addf %251, %255 : vector<22x64xf32>
      %c64 = arith.constant 64 : index
      %c0_146 = arith.constant 0 : index
      %257 = vector.load %arg4[%c64, %c0_146] : memref<288x64xbf16, #tpu.memory_space<vmem>>, vector<32x64xbf16>
      %258 = vector.extract_strided_slice %246 {offsets = [2, 0], sizes = [22, 32], strides = [1, 1]} : vector<24x32xf32> to vector<22x32xf32>
      %259 = arith.truncf %258 : vector<22x32xf32> to vector<22x32xbf16>
      %cst_147 = arith.constant dense<0.000000e+00> : vector<22x64xf32>
      %260 = tpu.matmul %259, %257, %cst_147 {dimension_numbers = #tpu.dot_dimension_numbers<[1], [0], [0], [1], [0, 0, 1, 1], [], []>} : vector<22x32xbf16>, vector<32x64xbf16>, vector<22x64xf32> -> vector<22x64xf32>
      %261 = arith.addf %256, %260 : vector<22x64xf32>
      %c1_i32_148 = arith.constant 1 : i32
      %262 = arith.addi %241, %c1_i32_148 : i32
      %263 = arith.index_cast %262 : i32 to index
      %c0_149 = arith.constant 0 : index
      %c0_150 = arith.constant 0 : index
      %264 = vector.load %arg15[%263, %c0_149, %c0_150] : memref<24x24x32xf32, #tpu.memory_space<vmem>>, vector<1x24x32xf32>
      %265 = vector.shape_cast %264 : vector<1x24x32xf32> to vector<24x32xf32>
      %c96 = arith.constant 96 : index
      %c0_151 = arith.constant 0 : index
      %266 = vector.load %arg4[%c96, %c0_151] : memref<288x64xbf16, #tpu.memory_space<vmem>>, vector<32x64xbf16>
      %267 = vector.extract_strided_slice %265 {offsets = [0, 0], sizes = [22, 32], strides = [1, 1]} : vector<24x32xf32> to vector<22x32xf32>
      %268 = arith.truncf %267 : vector<22x32xf32> to vector<22x32xbf16>
      %cst_152 = arith.constant dense<0.000000e+00> : vector<22x64xf32>
      %269 = tpu.matmul %268, %266, %cst_152 {dimension_numbers = #tpu.dot_dimension_numbers<[1], [0], [0], [1], [0, 0, 1, 1], [], []>} : vector<22x32xbf16>, vector<32x64xbf16>, vector<22x64xf32> -> vector<22x64xf32>
      %270 = arith.addf %261, %269 : vector<22x64xf32>
      %c128_153 = arith.constant 128 : index
      %c0_154 = arith.constant 0 : index
      %271 = vector.load %arg4[%c128_153, %c0_154] : memref<288x64xbf16, #tpu.memory_space<vmem>>, vector<32x64xbf16>
      %272 = vector.extract_strided_slice %265 {offsets = [1, 0], sizes = [22, 32], strides = [1, 1]} : vector<24x32xf32> to vector<22x32xf32>
      %273 = arith.truncf %272 : vector<22x32xf32> to vector<22x32xbf16>
      %cst_155 = arith.constant dense<0.000000e+00> : vector<22x64xf32>
      %274 = tpu.matmul %273, %271, %cst_155 {dimension_numbers = #tpu.dot_dimension_numbers<[1], [0], [0], [1], [0, 0, 1, 1], [], []>} : vector<22x32xbf16>, vector<32x64xbf16>, vector<22x64xf32> -> vector<22x64xf32>
      %275 = arith.addf %270, %274 : vector<22x64xf32>
      %c160 = arith.constant 160 : index
      %c0_156 = arith.constant 0 : index
      %276 = vector.load %arg4[%c160, %c0_156] : memref<288x64xbf16, #tpu.memory_space<vmem>>, vector<32x64xbf16>
      %277 = vector.extract_strided_slice %265 {offsets = [2, 0], sizes = [22, 32], strides = [1, 1]} : vector<24x32xf32> to vector<22x32xf32>
      %278 = arith.truncf %277 : vector<22x32xf32> to vector<22x32xbf16>
      %cst_157 = arith.constant dense<0.000000e+00> : vector<22x64xf32>
      %279 = tpu.matmul %278, %276, %cst_157 {dimension_numbers = #tpu.dot_dimension_numbers<[1], [0], [0], [1], [0, 0, 1, 1], [], []>} : vector<22x32xbf16>, vector<32x64xbf16>, vector<22x64xf32> -> vector<22x64xf32>
      %280 = arith.addf %275, %279 : vector<22x64xf32>
      %c2_i32_158 = arith.constant 2 : i32
      %281 = arith.addi %241, %c2_i32_158 : i32
      %282 = arith.index_cast %281 : i32 to index
      %c0_159 = arith.constant 0 : index
      %c0_160 = arith.constant 0 : index
      %283 = vector.load %arg15[%282, %c0_159, %c0_160] : memref<24x24x32xf32, #tpu.memory_space<vmem>>, vector<1x24x32xf32>
      %284 = vector.shape_cast %283 : vector<1x24x32xf32> to vector<24x32xf32>
      %c192 = arith.constant 192 : index
      %c0_161 = arith.constant 0 : index
      %285 = vector.load %arg4[%c192, %c0_161] : memref<288x64xbf16, #tpu.memory_space<vmem>>, vector<32x64xbf16>
      %286 = vector.extract_strided_slice %284 {offsets = [0, 0], sizes = [22, 32], strides = [1, 1]} : vector<24x32xf32> to vector<22x32xf32>
      %287 = arith.truncf %286 : vector<22x32xf32> to vector<22x32xbf16>
      %cst_162 = arith.constant dense<0.000000e+00> : vector<22x64xf32>
      %288 = tpu.matmul %287, %285, %cst_162 {dimension_numbers = #tpu.dot_dimension_numbers<[1], [0], [0], [1], [0, 0, 1, 1], [], []>} : vector<22x32xbf16>, vector<32x64xbf16>, vector<22x64xf32> -> vector<22x64xf32>
      %289 = arith.addf %280, %288 : vector<22x64xf32>
      %c224 = arith.constant 224 : index
      %c0_163 = arith.constant 0 : index
      %290 = vector.load %arg4[%c224, %c0_163] : memref<288x64xbf16, #tpu.memory_space<vmem>>, vector<32x64xbf16>
      %291 = vector.extract_strided_slice %284 {offsets = [1, 0], sizes = [22, 32], strides = [1, 1]} : vector<24x32xf32> to vector<22x32xf32>
      %292 = arith.truncf %291 : vector<22x32xf32> to vector<22x32xbf16>
      %cst_164 = arith.constant dense<0.000000e+00> : vector<22x64xf32>
      %293 = tpu.matmul %292, %290, %cst_164 {dimension_numbers = #tpu.dot_dimension_numbers<[1], [0], [0], [1], [0, 0, 1, 1], [], []>} : vector<22x32xbf16>, vector<32x64xbf16>, vector<22x64xf32> -> vector<22x64xf32>
      %294 = arith.addf %289, %293 : vector<22x64xf32>
      %c256_165 = arith.constant 256 : index
      %c0_166 = arith.constant 0 : index
      %295 = vector.load %arg4[%c256_165, %c0_166] : memref<288x64xbf16, #tpu.memory_space<vmem>>, vector<32x64xbf16>
      %296 = vector.extract_strided_slice %284 {offsets = [2, 0], sizes = [22, 32], strides = [1, 1]} : vector<24x32xf32> to vector<22x32xf32>
      %297 = arith.truncf %296 : vector<22x32xf32> to vector<22x32xbf16>
      %cst_167 = arith.constant dense<0.000000e+00> : vector<22x64xf32>
      %298 = tpu.matmul %297, %295, %cst_167 {dimension_numbers = #tpu.dot_dimension_numbers<[1], [0], [0], [1], [0, 0, 1, 1], [], []>} : vector<22x32xbf16>, vector<32x64xbf16>, vector<22x64xf32> -> vector<22x64xf32>
      %299 = arith.addf %294, %298 : vector<22x64xf32>
      %300 = vector.broadcast %20 : vector<1x64xf32> to vector<22x64xf32>
      %301 = arith.addf %299, %300 : vector<22x64xf32>
      %cst_168 = arith.constant 0.000000e+00 : f32
      %302 = vector.broadcast %cst_168 : f32 to vector<22x64xf32>
      %303 = arith.maximumf %301, %302 : vector<22x64xf32>
      %c2_i32_169 = arith.constant 2 : i32
      %304 = arith.muli %c2_i32_169, %arg19 : i32
      %c1_i32_170 = arith.constant 1 : i32
      %305 = arith.addi %304, %c1_i32_170 : i32
      %cst_171 = arith.constant 0.000000e+00 : f32
      %306 = vector.broadcast %cst_171 : f32 to vector<22x64xf32>
      %c0_i32_172 = arith.constant 0 : i32
      %307 = arith.addi %305, %c0_i32_172 : i32
      %308 = arith.index_cast %307 : i32 to index
      %c0_173 = arith.constant 0 : index
      %c0_174 = arith.constant 0 : index
      %309 = vector.load %arg15[%308, %c0_173, %c0_174] : memref<24x24x32xf32, #tpu.memory_space<vmem>>, vector<1x24x32xf32>
      %310 = vector.shape_cast %309 : vector<1x24x32xf32> to vector<24x32xf32>
      %c0_175 = arith.constant 0 : index
      %c0_176 = arith.constant 0 : index
      %311 = vector.load %arg4[%c0_175, %c0_176] : memref<288x64xbf16, #tpu.memory_space<vmem>>, vector<32x64xbf16>
      %312 = vector.extract_strided_slice %310 {offsets = [0, 0], sizes = [22, 32], strides = [1, 1]} : vector<24x32xf32> to vector<22x32xf32>
      %313 = arith.truncf %312 : vector<22x32xf32> to vector<22x32xbf16>
      %cst_177 = arith.constant dense<0.000000e+00> : vector<22x64xf32>
      %314 = tpu.matmul %313, %311, %cst_177 {dimension_numbers = #tpu.dot_dimension_numbers<[1], [0], [0], [1], [0, 0, 1, 1], [], []>} : vector<22x32xbf16>, vector<32x64xbf16>, vector<22x64xf32> -> vector<22x64xf32>
      %315 = arith.addf %306, %314 : vector<22x64xf32>
      %c32_178 = arith.constant 32 : index
      %c0_179 = arith.constant 0 : index
      %316 = vector.load %arg4[%c32_178, %c0_179] : memref<288x64xbf16, #tpu.memory_space<vmem>>, vector<32x64xbf16>
      %317 = vector.extract_strided_slice %310 {offsets = [1, 0], sizes = [22, 32], strides = [1, 1]} : vector<24x32xf32> to vector<22x32xf32>
      %318 = arith.truncf %317 : vector<22x32xf32> to vector<22x32xbf16>
      %cst_180 = arith.constant dense<0.000000e+00> : vector<22x64xf32>
      %319 = tpu.matmul %318, %316, %cst_180 {dimension_numbers = #tpu.dot_dimension_numbers<[1], [0], [0], [1], [0, 0, 1, 1], [], []>} : vector<22x32xbf16>, vector<32x64xbf16>, vector<22x64xf32> -> vector<22x64xf32>
      %320 = arith.addf %315, %319 : vector<22x64xf32>
      %c64_181 = arith.constant 64 : index
      %c0_182 = arith.constant 0 : index
      %321 = vector.load %arg4[%c64_181, %c0_182] : memref<288x64xbf16, #tpu.memory_space<vmem>>, vector<32x64xbf16>
      %322 = vector.extract_strided_slice %310 {offsets = [2, 0], sizes = [22, 32], strides = [1, 1]} : vector<24x32xf32> to vector<22x32xf32>
      %323 = arith.truncf %322 : vector<22x32xf32> to vector<22x32xbf16>
      %cst_183 = arith.constant dense<0.000000e+00> : vector<22x64xf32>
      %324 = tpu.matmul %323, %321, %cst_183 {dimension_numbers = #tpu.dot_dimension_numbers<[1], [0], [0], [1], [0, 0, 1, 1], [], []>} : vector<22x32xbf16>, vector<32x64xbf16>, vector<22x64xf32> -> vector<22x64xf32>
      %325 = arith.addf %320, %324 : vector<22x64xf32>
      %c1_i32_184 = arith.constant 1 : i32
      %326 = arith.addi %305, %c1_i32_184 : i32
      %327 = arith.index_cast %326 : i32 to index
      %c0_185 = arith.constant 0 : index
      %c0_186 = arith.constant 0 : index
      %328 = vector.load %arg15[%327, %c0_185, %c0_186] : memref<24x24x32xf32, #tpu.memory_space<vmem>>, vector<1x24x32xf32>
      %329 = vector.shape_cast %328 : vector<1x24x32xf32> to vector<24x32xf32>
      %c96_187 = arith.constant 96 : index
      %c0_188 = arith.constant 0 : index
      %330 = vector.load %arg4[%c96_187, %c0_188] : memref<288x64xbf16, #tpu.memory_space<vmem>>, vector<32x64xbf16>
      %331 = vector.extract_strided_slice %329 {offsets = [0, 0], sizes = [22, 32], strides = [1, 1]} : vector<24x32xf32> to vector<22x32xf32>
      %332 = arith.truncf %331 : vector<22x32xf32> to vector<22x32xbf16>
      %cst_189 = arith.constant dense<0.000000e+00> : vector<22x64xf32>
      %333 = tpu.matmul %332, %330, %cst_189 {dimension_numbers = #tpu.dot_dimension_numbers<[1], [0], [0], [1], [0, 0, 1, 1], [], []>} : vector<22x32xbf16>, vector<32x64xbf16>, vector<22x64xf32> -> vector<22x64xf32>
      %334 = arith.addf %325, %333 : vector<22x64xf32>
      %c128_190 = arith.constant 128 : index
      %c0_191 = arith.constant 0 : index
      %335 = vector.load %arg4[%c128_190, %c0_191] : memref<288x64xbf16, #tpu.memory_space<vmem>>, vector<32x64xbf16>
      %336 = vector.extract_strided_slice %329 {offsets = [1, 0], sizes = [22, 32], strides = [1, 1]} : vector<24x32xf32> to vector<22x32xf32>
      %337 = arith.truncf %336 : vector<22x32xf32> to vector<22x32xbf16>
      %cst_192 = arith.constant dense<0.000000e+00> : vector<22x64xf32>
      %338 = tpu.matmul %337, %335, %cst_192 {dimension_numbers = #tpu.dot_dimension_numbers<[1], [0], [0], [1], [0, 0, 1, 1], [], []>} : vector<22x32xbf16>, vector<32x64xbf16>, vector<22x64xf32> -> vector<22x64xf32>
      %339 = arith.addf %334, %338 : vector<22x64xf32>
      %c160_193 = arith.constant 160 : index
      %c0_194 = arith.constant 0 : index
      %340 = vector.load %arg4[%c160_193, %c0_194] : memref<288x64xbf16, #tpu.memory_space<vmem>>, vector<32x64xbf16>
      %341 = vector.extract_strided_slice %329 {offsets = [2, 0], sizes = [22, 32], strides = [1, 1]} : vector<24x32xf32> to vector<22x32xf32>
      %342 = arith.truncf %341 : vector<22x32xf32> to vector<22x32xbf16>
      %cst_195 = arith.constant dense<0.000000e+00> : vector<22x64xf32>
      %343 = tpu.matmul %342, %340, %cst_195 {dimension_numbers = #tpu.dot_dimension_numbers<[1], [0], [0], [1], [0, 0, 1, 1], [], []>} : vector<22x32xbf16>, vector<32x64xbf16>, vector<22x64xf32> -> vector<22x64xf32>
      %344 = arith.addf %339, %343 : vector<22x64xf32>
      %c2_i32_196 = arith.constant 2 : i32
      %345 = arith.addi %305, %c2_i32_196 : i32
      %346 = arith.index_cast %345 : i32 to index
      %c0_197 = arith.constant 0 : index
      %c0_198 = arith.constant 0 : index
      %347 = vector.load %arg15[%346, %c0_197, %c0_198] : memref<24x24x32xf32, #tpu.memory_space<vmem>>, vector<1x24x32xf32>
      %348 = vector.shape_cast %347 : vector<1x24x32xf32> to vector<24x32xf32>
      %c192_199 = arith.constant 192 : index
      %c0_200 = arith.constant 0 : index
      %349 = vector.load %arg4[%c192_199, %c0_200] : memref<288x64xbf16, #tpu.memory_space<vmem>>, vector<32x64xbf16>
      %350 = vector.extract_strided_slice %348 {offsets = [0, 0], sizes = [22, 32], strides = [1, 1]} : vector<24x32xf32> to vector<22x32xf32>
      %351 = arith.truncf %350 : vector<22x32xf32> to vector<22x32xbf16>
      %cst_201 = arith.constant dense<0.000000e+00> : vector<22x64xf32>
      %352 = tpu.matmul %351, %349, %cst_201 {dimension_numbers = #tpu.dot_dimension_numbers<[1], [0], [0], [1], [0, 0, 1, 1], [], []>} : vector<22x32xbf16>, vector<32x64xbf16>, vector<22x64xf32> -> vector<22x64xf32>
      %353 = arith.addf %344, %352 : vector<22x64xf32>
      %c224_202 = arith.constant 224 : index
      %c0_203 = arith.constant 0 : index
      %354 = vector.load %arg4[%c224_202, %c0_203] : memref<288x64xbf16, #tpu.memory_space<vmem>>, vector<32x64xbf16>
      %355 = vector.extract_strided_slice %348 {offsets = [1, 0], sizes = [22, 32], strides = [1, 1]} : vector<24x32xf32> to vector<22x32xf32>
      %356 = arith.truncf %355 : vector<22x32xf32> to vector<22x32xbf16>
      %cst_204 = arith.constant dense<0.000000e+00> : vector<22x64xf32>
      %357 = tpu.matmul %356, %354, %cst_204 {dimension_numbers = #tpu.dot_dimension_numbers<[1], [0], [0], [1], [0, 0, 1, 1], [], []>} : vector<22x32xbf16>, vector<32x64xbf16>, vector<22x64xf32> -> vector<22x64xf32>
      %358 = arith.addf %353, %357 : vector<22x64xf32>
      %c256_205 = arith.constant 256 : index
      %c0_206 = arith.constant 0 : index
      %359 = vector.load %arg4[%c256_205, %c0_206] : memref<288x64xbf16, #tpu.memory_space<vmem>>, vector<32x64xbf16>
      %360 = vector.extract_strided_slice %348 {offsets = [2, 0], sizes = [22, 32], strides = [1, 1]} : vector<24x32xf32> to vector<22x32xf32>
      %361 = arith.truncf %360 : vector<22x32xf32> to vector<22x32xbf16>
      %cst_207 = arith.constant dense<0.000000e+00> : vector<22x64xf32>
      %362 = tpu.matmul %361, %359, %cst_207 {dimension_numbers = #tpu.dot_dimension_numbers<[1], [0], [0], [1], [0, 0, 1, 1], [], []>} : vector<22x32xbf16>, vector<32x64xbf16>, vector<22x64xf32> -> vector<22x64xf32>
      %363 = arith.addf %358, %362 : vector<22x64xf32>
      %364 = vector.broadcast %20 : vector<1x64xf32> to vector<22x64xf32>
      %365 = arith.addf %363, %364 : vector<22x64xf32>
      %cst_208 = arith.constant 0.000000e+00 : f32
      %366 = vector.broadcast %cst_208 : f32 to vector<22x64xf32>
      %367 = arith.maximumf %365, %366 : vector<22x64xf32>
      %368 = arith.maximumf %303, %367 : vector<22x64xf32>
      %369 = arith.truncf %368 : vector<22x64xf32> to vector<22x64xbf16>
      %cst_209 = arith.constant dense<0.000000e+00> : vector<11x64xf32>
      %370 = tpu.matmul %29, %369, %cst_209 {dimension_numbers = #tpu.dot_dimension_numbers<[1], [0], [0], [1], [0, 0, 1, 1], [], []>} : vector<11x22xbf16>, vector<22x64xbf16>, vector<11x64xf32> -> vector<11x64xf32>
      %cst_210 = arith.constant dense<0.000000e+00> : vector<11x64xf32>
      %371 = tpu.matmul %38, %369, %cst_210 {dimension_numbers = #tpu.dot_dimension_numbers<[1], [0], [0], [1], [0, 0, 1, 1], [], []>} : vector<11x22xbf16>, vector<22x64xbf16>, vector<11x64xf32> -> vector<11x64xf32>
      %372 = arith.maximumf %370, %371 : vector<11x64xf32>
      %373 = arith.index_cast %arg19 : i32 to index
      %c0_211 = arith.constant 0 : index
      %c0_212 = arith.constant 0 : index
      %374 = vector.load %arg16[%373, %c0_211, %c0_212] : memref<11x11x64xf32, #tpu.memory_space<vmem>>, vector<1x11x64xf32>
      %375 = vector.shape_cast %374 : vector<1x11x64xf32> to vector<11x64xf32>
      %376 = vector.shape_cast %372 : vector<11x64xf32> to vector<1x11x64xf32>
      tpu.vector_store %arg16[%373, %c0_211, %c0_212], %376 {strides = array<i32>} : memref<11x11x64xf32, #tpu.memory_space<vmem>>, vector<1x11x64xf32>,
    }
    %c11_i32_18 = arith.constant 11 : i32
    %c0_19 = arith.constant 0 : index
    %c0_20 = arith.constant 0 : index
    %40 = vector.load %arg7[%c0_19, %c0_20] : memref<1x128xf32, #tpu.memory_space<vmem>>, vector<1x128xf32>
    %41 = tpu.iota {dimensions = array<i32: 0>} : vector<4x9xi32>
    %42 = tpu.iota {dimensions = array<i32: 1>} : vector<4x9xi32>
    %c2_i32_21 = arith.constant 2 : i32
    %43 = vector.broadcast %c2_i32_21 : i32 to vector<4x9xi32>
    %44 = arith.muli %43, %41 : vector<4x9xi32>
    %45 = arith.cmpi eq, %42, %44 : vector<4x9xi32>
    %cst_22 = arith.constant 1.000000e+00 : f32
    %cst_23 = arith.constant 0.000000e+00 : f32
    %46 = vector.broadcast %cst_22 : f32 to vector<4x9xf32>
    %47 = vector.broadcast %cst_23 : f32 to vector<4x9xf32>
    %48 = arith.select %45, %46, %47 : vector<4x9xi1>, vector<4x9xf32>
    %49 = arith.truncf %48 : vector<4x9xf32> to vector<4x9xbf16>
    %c2_i32_24 = arith.constant 2 : i32
    %50 = vector.broadcast %c2_i32_24 : i32 to vector<4x9xi32>
    %51 = arith.muli %50, %41 : vector<4x9xi32>
    %c1_i32_25 = arith.constant 1 : i32
    %52 = vector.broadcast %c1_i32_25 : i32 to vector<4x9xi32>
    %53 = arith.addi %51, %52 : vector<4x9xi32>
    %54 = arith.cmpi eq, %42, %53 : vector<4x9xi32>
    %cst_26 = arith.constant 1.000000e+00 : f32
    %cst_27 = arith.constant 0.000000e+00 : f32
    %55 = vector.broadcast %cst_26 : f32 to vector<4x9xf32>
    %56 = vector.broadcast %cst_27 : f32 to vector<4x9xf32>
    %57 = arith.select %54, %55, %56 : vector<4x9xi1>, vector<4x9xf32>
    %58 = arith.truncf %57 : vector<4x9xf32> to vector<4x9xbf16>
    %c0_i32_28 = arith.constant 0 : i32
    %c4_i32 = arith.constant 4 : i32
    %59 = arith.addi %c0_i32_28, %c4_i32 : i32
    %c1_i32_29 = arith.constant 1 : i32
    scf.for %arg19 = %c0_i32_28 to %59 step %c1_i32_29  : i32 {
      %c2_i32_136 = arith.constant 2 : i32
      %241 = arith.muli %c2_i32_136, %arg19 : i32
      %cst_137 = arith.constant 0.000000e+00 : f32
      %242 = vector.broadcast %cst_137 : f32 to vector<9x128xf32>
      %c0_i32_138 = arith.constant 0 : i32
      %243 = arith.addi %241, %c0_i32_138 : i32
      %244 = arith.index_cast %243 : i32 to index
      %c0_139 = arith.constant 0 : index
      %c0_140 = arith.constant 0 : index
      %245 = vector.load %arg16[%244, %c0_139, %c0_140] : memref<11x11x64xf32, #tpu.memory_space<vmem>>, vector<1x11x64xf32>
      %246 = vector.shape_cast %245 : vector<1x11x64xf32> to vector<11x64xf32>
      %c0_141 = arith.constant 0 : index
      %c0_142 = arith.constant 0 : index
      %247 = vector.load %arg6[%c0_141, %c0_142] : memref<576x128xbf16, #tpu.memory_space<vmem>>, vector<64x128xbf16>
      %248 = vector.extract_strided_slice %246 {offsets = [0, 0], sizes = [9, 64], strides = [1, 1]} : vector<11x64xf32> to vector<9x64xf32>
      %249 = arith.truncf %248 : vector<9x64xf32> to vector<9x64xbf16>
      %cst_143 = arith.constant dense<0.000000e+00> : vector<9x128xf32>
      %250 = tpu.matmul %249, %247, %cst_143 {dimension_numbers = #tpu.dot_dimension_numbers<[1], [0], [0], [1], [0, 0, 1, 1], [], []>} : vector<9x64xbf16>, vector<64x128xbf16>, vector<9x128xf32> -> vector<9x128xf32>
      %251 = arith.addf %242, %250 : vector<9x128xf32>
      %c64 = arith.constant 64 : index
      %c0_144 = arith.constant 0 : index
      %252 = vector.load %arg6[%c64, %c0_144] : memref<576x128xbf16, #tpu.memory_space<vmem>>, vector<64x128xbf16>
      %253 = vector.extract_strided_slice %246 {offsets = [1, 0], sizes = [9, 64], strides = [1, 1]} : vector<11x64xf32> to vector<9x64xf32>
      %254 = arith.truncf %253 : vector<9x64xf32> to vector<9x64xbf16>
      %cst_145 = arith.constant dense<0.000000e+00> : vector<9x128xf32>
      %255 = tpu.matmul %254, %252, %cst_145 {dimension_numbers = #tpu.dot_dimension_numbers<[1], [0], [0], [1], [0, 0, 1, 1], [], []>} : vector<9x64xbf16>, vector<64x128xbf16>, vector<9x128xf32> -> vector<9x128xf32>
      %256 = arith.addf %251, %255 : vector<9x128xf32>
      %c128_146 = arith.constant 128 : index
      %c0_147 = arith.constant 0 : index
      %257 = vector.load %arg6[%c128_146, %c0_147] : memref<576x128xbf16, #tpu.memory_space<vmem>>, vector<64x128xbf16>
      %258 = vector.extract_strided_slice %246 {offsets = [2, 0], sizes = [9, 64], strides = [1, 1]} : vector<11x64xf32> to vector<9x64xf32>
      %259 = arith.truncf %258 : vector<9x64xf32> to vector<9x64xbf16>
      %cst_148 = arith.constant dense<0.000000e+00> : vector<9x128xf32>
      %260 = tpu.matmul %259, %257, %cst_148 {dimension_numbers = #tpu.dot_dimension_numbers<[1], [0], [0], [1], [0, 0, 1, 1], [], []>} : vector<9x64xbf16>, vector<64x128xbf16>, vector<9x128xf32> -> vector<9x128xf32>
      %261 = arith.addf %256, %260 : vector<9x128xf32>
      %c1_i32_149 = arith.constant 1 : i32
      %262 = arith.addi %241, %c1_i32_149 : i32
      %263 = arith.index_cast %262 : i32 to index
      %c0_150 = arith.constant 0 : index
      %c0_151 = arith.constant 0 : index
      %264 = vector.load %arg16[%263, %c0_150, %c0_151] : memref<11x11x64xf32, #tpu.memory_space<vmem>>, vector<1x11x64xf32>
      %265 = vector.shape_cast %264 : vector<1x11x64xf32> to vector<11x64xf32>
      %c192 = arith.constant 192 : index
      %c0_152 = arith.constant 0 : index
      %266 = vector.load %arg6[%c192, %c0_152] : memref<576x128xbf16, #tpu.memory_space<vmem>>, vector<64x128xbf16>
      %267 = vector.extract_strided_slice %265 {offsets = [0, 0], sizes = [9, 64], strides = [1, 1]} : vector<11x64xf32> to vector<9x64xf32>
      %268 = arith.truncf %267 : vector<9x64xf32> to vector<9x64xbf16>
      %cst_153 = arith.constant dense<0.000000e+00> : vector<9x128xf32>
      %269 = tpu.matmul %268, %266, %cst_153 {dimension_numbers = #tpu.dot_dimension_numbers<[1], [0], [0], [1], [0, 0, 1, 1], [], []>} : vector<9x64xbf16>, vector<64x128xbf16>, vector<9x128xf32> -> vector<9x128xf32>
      %270 = arith.addf %261, %269 : vector<9x128xf32>
      %c256_154 = arith.constant 256 : index
      %c0_155 = arith.constant 0 : index
      %271 = vector.load %arg6[%c256_154, %c0_155] : memref<576x128xbf16, #tpu.memory_space<vmem>>, vector<64x128xbf16>
      %272 = vector.extract_strided_slice %265 {offsets = [1, 0], sizes = [9, 64], strides = [1, 1]} : vector<11x64xf32> to vector<9x64xf32>
      %273 = arith.truncf %272 : vector<9x64xf32> to vector<9x64xbf16>
      %cst_156 = arith.constant dense<0.000000e+00> : vector<9x128xf32>
      %274 = tpu.matmul %273, %271, %cst_156 {dimension_numbers = #tpu.dot_dimension_numbers<[1], [0], [0], [1], [0, 0, 1, 1], [], []>} : vector<9x64xbf16>, vector<64x128xbf16>, vector<9x128xf32> -> vector<9x128xf32>
      %275 = arith.addf %270, %274 : vector<9x128xf32>
      %c320 = arith.constant 320 : index
      %c0_157 = arith.constant 0 : index
      %276 = vector.load %arg6[%c320, %c0_157] : memref<576x128xbf16, #tpu.memory_space<vmem>>, vector<64x128xbf16>
      %277 = vector.extract_strided_slice %265 {offsets = [2, 0], sizes = [9, 64], strides = [1, 1]} : vector<11x64xf32> to vector<9x64xf32>
      %278 = arith.truncf %277 : vector<9x64xf32> to vector<9x64xbf16>
      %cst_158 = arith.constant dense<0.000000e+00> : vector<9x128xf32>
      %279 = tpu.matmul %278, %276, %cst_158 {dimension_numbers = #tpu.dot_dimension_numbers<[1], [0], [0], [1], [0, 0, 1, 1], [], []>} : vector<9x64xbf16>, vector<64x128xbf16>, vector<9x128xf32> -> vector<9x128xf32>
      %280 = arith.addf %275, %279 : vector<9x128xf32>
      %c2_i32_159 = arith.constant 2 : i32
      %281 = arith.addi %241, %c2_i32_159 : i32
      %282 = arith.index_cast %281 : i32 to index
      %c0_160 = arith.constant 0 : index
      %c0_161 = arith.constant 0 : index
      %283 = vector.load %arg16[%282, %c0_160, %c0_161] : memref<11x11x64xf32, #tpu.memory_space<vmem>>, vector<1x11x64xf32>
      %284 = vector.shape_cast %283 : vector<1x11x64xf32> to vector<11x64xf32>
      %c384_162 = arith.constant 384 : index
      %c0_163 = arith.constant 0 : index
      %285 = vector.load %arg6[%c384_162, %c0_163] : memref<576x128xbf16, #tpu.memory_space<vmem>>, vector<64x128xbf16>
      %286 = vector.extract_strided_slice %284 {offsets = [0, 0], sizes = [9, 64], strides = [1, 1]} : vector<11x64xf32> to vector<9x64xf32>
      %287 = arith.truncf %286 : vector<9x64xf32> to vector<9x64xbf16>
      %cst_164 = arith.constant dense<0.000000e+00> : vector<9x128xf32>
      %288 = tpu.matmul %287, %285, %cst_164 {dimension_numbers = #tpu.dot_dimension_numbers<[1], [0], [0], [1], [0, 0, 1, 1], [], []>} : vector<9x64xbf16>, vector<64x128xbf16>, vector<9x128xf32> -> vector<9x128xf32>
      %289 = arith.addf %280, %288 : vector<9x128xf32>
      %c448 = arith.constant 448 : index
      %c0_165 = arith.constant 0 : index
      %290 = vector.load %arg6[%c448, %c0_165] : memref<576x128xbf16, #tpu.memory_space<vmem>>, vector<64x128xbf16>
      %291 = vector.extract_strided_slice %284 {offsets = [1, 0], sizes = [9, 64], strides = [1, 1]} : vector<11x64xf32> to vector<9x64xf32>
      %292 = arith.truncf %291 : vector<9x64xf32> to vector<9x64xbf16>
      %cst_166 = arith.constant dense<0.000000e+00> : vector<9x128xf32>
      %293 = tpu.matmul %292, %290, %cst_166 {dimension_numbers = #tpu.dot_dimension_numbers<[1], [0], [0], [1], [0, 0, 1, 1], [], []>} : vector<9x64xbf16>, vector<64x128xbf16>, vector<9x128xf32> -> vector<9x128xf32>
      %294 = arith.addf %289, %293 : vector<9x128xf32>
      %c512_167 = arith.constant 512 : index
      %c0_168 = arith.constant 0 : index
      %295 = vector.load %arg6[%c512_167, %c0_168] : memref<576x128xbf16, #tpu.memory_space<vmem>>, vector<64x128xbf16>
      %296 = vector.extract_strided_slice %284 {offsets = [2, 0], sizes = [9, 64], strides = [1, 1]} : vector<11x64xf32> to vector<9x64xf32>
      %297 = arith.truncf %296 : vector<9x64xf32> to vector<9x64xbf16>
      %cst_169 = arith.constant dense<0.000000e+00> : vector<9x128xf32>
      %298 = tpu.matmul %297, %295, %cst_169 {dimension_numbers = #tpu.dot_dimension_numbers<[1], [0], [0], [1], [0, 0, 1, 1], [], []>} : vector<9x64xbf16>, vector<64x128xbf16>, vector<9x128xf32> -> vector<9x128xf32>
      %299 = arith.addf %294, %298 : vector<9x128xf32>
      %300 = vector.broadcast %40 : vector<1x128xf32> to vector<9x128xf32>
      %301 = arith.addf %299, %300 : vector<9x128xf32>
      %cst_170 = arith.constant 0.000000e+00 : f32
      %302 = vector.broadcast %cst_170 : f32 to vector<9x128xf32>
      %303 = arith.maximumf %301, %302 : vector<9x128xf32>
      %c2_i32_171 = arith.constant 2 : i32
      %304 = arith.muli %c2_i32_171, %arg19 : i32
      %c1_i32_172 = arith.constant 1 : i32
      %305 = arith.addi %304, %c1_i32_172 : i32
      %cst_173 = arith.constant 0.000000e+00 : f32
      %306 = vector.broadcast %cst_173 : f32 to vector<9x128xf32>
      %c0_i32_174 = arith.constant 0 : i32
      %307 = arith.addi %305, %c0_i32_174 : i32
      %308 = arith.index_cast %307 : i32 to index
      %c0_175 = arith.constant 0 : index
      %c0_176 = arith.constant 0 : index
      %309 = vector.load %arg16[%308, %c0_175, %c0_176] : memref<11x11x64xf32, #tpu.memory_space<vmem>>, vector<1x11x64xf32>
      %310 = vector.shape_cast %309 : vector<1x11x64xf32> to vector<11x64xf32>
      %c0_177 = arith.constant 0 : index
      %c0_178 = arith.constant 0 : index
      %311 = vector.load %arg6[%c0_177, %c0_178] : memref<576x128xbf16, #tpu.memory_space<vmem>>, vector<64x128xbf16>
      %312 = vector.extract_strided_slice %310 {offsets = [0, 0], sizes = [9, 64], strides = [1, 1]} : vector<11x64xf32> to vector<9x64xf32>
      %313 = arith.truncf %312 : vector<9x64xf32> to vector<9x64xbf16>
      %cst_179 = arith.constant dense<0.000000e+00> : vector<9x128xf32>
      %314 = tpu.matmul %313, %311, %cst_179 {dimension_numbers = #tpu.dot_dimension_numbers<[1], [0], [0], [1], [0, 0, 1, 1], [], []>} : vector<9x64xbf16>, vector<64x128xbf16>, vector<9x128xf32> -> vector<9x128xf32>
      %315 = arith.addf %306, %314 : vector<9x128xf32>
      %c64_180 = arith.constant 64 : index
      %c0_181 = arith.constant 0 : index
      %316 = vector.load %arg6[%c64_180, %c0_181] : memref<576x128xbf16, #tpu.memory_space<vmem>>, vector<64x128xbf16>
      %317 = vector.extract_strided_slice %310 {offsets = [1, 0], sizes = [9, 64], strides = [1, 1]} : vector<11x64xf32> to vector<9x64xf32>
      %318 = arith.truncf %317 : vector<9x64xf32> to vector<9x64xbf16>
      %cst_182 = arith.constant dense<0.000000e+00> : vector<9x128xf32>
      %319 = tpu.matmul %318, %316, %cst_182 {dimension_numbers = #tpu.dot_dimension_numbers<[1], [0], [0], [1], [0, 0, 1, 1], [], []>} : vector<9x64xbf16>, vector<64x128xbf16>, vector<9x128xf32> -> vector<9x128xf32>
      %320 = arith.addf %315, %319 : vector<9x128xf32>
      %c128_183 = arith.constant 128 : index
      %c0_184 = arith.constant 0 : index
      %321 = vector.load %arg6[%c128_183, %c0_184] : memref<576x128xbf16, #tpu.memory_space<vmem>>, vector<64x128xbf16>
      %322 = vector.extract_strided_slice %310 {offsets = [2, 0], sizes = [9, 64], strides = [1, 1]} : vector<11x64xf32> to vector<9x64xf32>
      %323 = arith.truncf %322 : vector<9x64xf32> to vector<9x64xbf16>
      %cst_185 = arith.constant dense<0.000000e+00> : vector<9x128xf32>
      %324 = tpu.matmul %323, %321, %cst_185 {dimension_numbers = #tpu.dot_dimension_numbers<[1], [0], [0], [1], [0, 0, 1, 1], [], []>} : vector<9x64xbf16>, vector<64x128xbf16>, vector<9x128xf32> -> vector<9x128xf32>
      %325 = arith.addf %320, %324 : vector<9x128xf32>
      %c1_i32_186 = arith.constant 1 : i32
      %326 = arith.addi %305, %c1_i32_186 : i32
      %327 = arith.index_cast %326 : i32 to index
      %c0_187 = arith.constant 0 : index
      %c0_188 = arith.constant 0 : index
      %328 = vector.load %arg16[%327, %c0_187, %c0_188] : memref<11x11x64xf32, #tpu.memory_space<vmem>>, vector<1x11x64xf32>
      %329 = vector.shape_cast %328 : vector<1x11x64xf32> to vector<11x64xf32>
      %c192_189 = arith.constant 192 : index
      %c0_190 = arith.constant 0 : index
      %330 = vector.load %arg6[%c192_189, %c0_190] : memref<576x128xbf16, #tpu.memory_space<vmem>>, vector<64x128xbf16>
      %331 = vector.extract_strided_slice %329 {offsets = [0, 0], sizes = [9, 64], strides = [1, 1]} : vector<11x64xf32> to vector<9x64xf32>
      %332 = arith.truncf %331 : vector<9x64xf32> to vector<9x64xbf16>
      %cst_191 = arith.constant dense<0.000000e+00> : vector<9x128xf32>
      %333 = tpu.matmul %332, %330, %cst_191 {dimension_numbers = #tpu.dot_dimension_numbers<[1], [0], [0], [1], [0, 0, 1, 1], [], []>} : vector<9x64xbf16>, vector<64x128xbf16>, vector<9x128xf32> -> vector<9x128xf32>
      %334 = arith.addf %325, %333 : vector<9x128xf32>
      %c256_192 = arith.constant 256 : index
      %c0_193 = arith.constant 0 : index
      %335 = vector.load %arg6[%c256_192, %c0_193] : memref<576x128xbf16, #tpu.memory_space<vmem>>, vector<64x128xbf16>
      %336 = vector.extract_strided_slice %329 {offsets = [1, 0], sizes = [9, 64], strides = [1, 1]} : vector<11x64xf32> to vector<9x64xf32>
      %337 = arith.truncf %336 : vector<9x64xf32> to vector<9x64xbf16>
      %cst_194 = arith.constant dense<0.000000e+00> : vector<9x128xf32>
      %338 = tpu.matmul %337, %335, %cst_194 {dimension_numbers = #tpu.dot_dimension_numbers<[1], [0], [0], [1], [0, 0, 1, 1], [], []>} : vector<9x64xbf16>, vector<64x128xbf16>, vector<9x128xf32> -> vector<9x128xf32>
      %339 = arith.addf %334, %338 : vector<9x128xf32>
      %c320_195 = arith.constant 320 : index
      %c0_196 = arith.constant 0 : index
      %340 = vector.load %arg6[%c320_195, %c0_196] : memref<576x128xbf16, #tpu.memory_space<vmem>>, vector<64x128xbf16>
      %341 = vector.extract_strided_slice %329 {offsets = [2, 0], sizes = [9, 64], strides = [1, 1]} : vector<11x64xf32> to vector<9x64xf32>
      %342 = arith.truncf %341 : vector<9x64xf32> to vector<9x64xbf16>
      %cst_197 = arith.constant dense<0.000000e+00> : vector<9x128xf32>
      %343 = tpu.matmul %342, %340, %cst_197 {dimension_numbers = #tpu.dot_dimension_numbers<[1], [0], [0], [1], [0, 0, 1, 1], [], []>} : vector<9x64xbf16>, vector<64x128xbf16>, vector<9x128xf32> -> vector<9x128xf32>
      %344 = arith.addf %339, %343 : vector<9x128xf32>
      %c2_i32_198 = arith.constant 2 : i32
      %345 = arith.addi %305, %c2_i32_198 : i32
      %346 = arith.index_cast %345 : i32 to index
      %c0_199 = arith.constant 0 : index
      %c0_200 = arith.constant 0 : index
      %347 = vector.load %arg16[%346, %c0_199, %c0_200] : memref<11x11x64xf32, #tpu.memory_space<vmem>>, vector<1x11x64xf32>
      %348 = vector.shape_cast %347 : vector<1x11x64xf32> to vector<11x64xf32>
      %c384_201 = arith.constant 384 : index
      %c0_202 = arith.constant 0 : index
      %349 = vector.load %arg6[%c384_201, %c0_202] : memref<576x128xbf16, #tpu.memory_space<vmem>>, vector<64x128xbf16>
      %350 = vector.extract_strided_slice %348 {offsets = [0, 0], sizes = [9, 64], strides = [1, 1]} : vector<11x64xf32> to vector<9x64xf32>
      %351 = arith.truncf %350 : vector<9x64xf32> to vector<9x64xbf16>
      %cst_203 = arith.constant dense<0.000000e+00> : vector<9x128xf32>
      %352 = tpu.matmul %351, %349, %cst_203 {dimension_numbers = #tpu.dot_dimension_numbers<[1], [0], [0], [1], [0, 0, 1, 1], [], []>} : vector<9x64xbf16>, vector<64x128xbf16>, vector<9x128xf32> -> vector<9x128xf32>
      %353 = arith.addf %344, %352 : vector<9x128xf32>
      %c448_204 = arith.constant 448 : index
      %c0_205 = arith.constant 0 : index
      %354 = vector.load %arg6[%c448_204, %c0_205] : memref<576x128xbf16, #tpu.memory_space<vmem>>, vector<64x128xbf16>
      %355 = vector.extract_strided_slice %348 {offsets = [1, 0], sizes = [9, 64], strides = [1, 1]} : vector<11x64xf32> to vector<9x64xf32>
      %356 = arith.truncf %355 : vector<9x64xf32> to vector<9x64xbf16>
      %cst_206 = arith.constant dense<0.000000e+00> : vector<9x128xf32>
      %357 = tpu.matmul %356, %354, %cst_206 {dimension_numbers = #tpu.dot_dimension_numbers<[1], [0], [0], [1], [0, 0, 1, 1], [], []>} : vector<9x64xbf16>, vector<64x128xbf16>, vector<9x128xf32> -> vector<9x128xf32>
      %358 = arith.addf %353, %357 : vector<9x128xf32>
      %c512_207 = arith.constant 512 : index
      %c0_208 = arith.constant 0 : index
      %359 = vector.load %arg6[%c512_207, %c0_208] : memref<576x128xbf16, #tpu.memory_space<vmem>>, vector<64x128xbf16>
      %360 = vector.extract_strided_slice %348 {offsets = [2, 0], sizes = [9, 64], strides = [1, 1]} : vector<11x64xf32> to vector<9x64xf32>
      %361 = arith.truncf %360 : vector<9x64xf32> to vector<9x64xbf16>
      %cst_209 = arith.constant dense<0.000000e+00> : vector<9x128xf32>
      %362 = tpu.matmul %361, %359, %cst_209 {dimension_numbers = #tpu.dot_dimension_numbers<[1], [0], [0], [1], [0, 0, 1, 1], [], []>} : vector<9x64xbf16>, vector<64x128xbf16>, vector<9x128xf32> -> vector<9x128xf32>
      %363 = arith.addf %358, %362 : vector<9x128xf32>
      %364 = vector.broadcast %40 : vector<1x128xf32> to vector<9x128xf32>
      %365 = arith.addf %363, %364 : vector<9x128xf32>
      %cst_210 = arith.constant 0.000000e+00 : f32
      %366 = vector.broadcast %cst_210 : f32 to vector<9x128xf32>
      %367 = arith.maximumf %365, %366 : vector<9x128xf32>
      %368 = arith.maximumf %303, %367 : vector<9x128xf32>
      %369 = arith.truncf %368 : vector<9x128xf32> to vector<9x128xbf16>
      %cst_211 = arith.constant dense<0.000000e+00> : vector<4x128xf32>
      %370 = tpu.matmul %49, %369, %cst_211 {dimension_numbers = #tpu.dot_dimension_numbers<[1], [0], [0], [1], [0, 0, 1, 1], [], []>} : vector<4x9xbf16>, vector<9x128xbf16>, vector<4x128xf32> -> vector<4x128xf32>
      %cst_212 = arith.constant dense<0.000000e+00> : vector<4x128xf32>
      %371 = tpu.matmul %58, %369, %cst_212 {dimension_numbers = #tpu.dot_dimension_numbers<[1], [0], [0], [1], [0, 0, 1, 1], [], []>} : vector<4x9xbf16>, vector<9x128xbf16>, vector<4x128xf32> -> vector<4x128xf32>
      %372 = arith.maximumf %370, %371 : vector<4x128xf32>
      %373 = arith.index_cast %arg19 : i32 to index
      %c0_213 = arith.constant 0 : index
      %c0_214 = arith.constant 0 : index
      %374 = vector.load %arg17[%373, %c0_213, %c0_214] : memref<4x4x128xf32, #tpu.memory_space<vmem>>, vector<1x4x128xf32>
      %375 = vector.shape_cast %374 : vector<1x4x128xf32> to vector<4x128xf32>
      %376 = vector.shape_cast %372 : vector<4x128xf32> to vector<1x4x128xf32>
      tpu.vector_store %arg17[%373, %c0_213, %c0_214], %376 {strides = array<i32>} : memref<4x4x128xf32, #tpu.memory_space<vmem>>, vector<1x4x128xf32>,
    }
    %c4_i32_30 = arith.constant 4 : i32
    %c0_31 = arith.constant 0 : index
    %c0_32 = arith.constant 0 : index
    %60 = vector.load %arg9[%c0_31, %c0_32] : memref<1x256xf32, #tpu.memory_space<vmem>>, vector<1x256xf32>
    %61 = tpu.iota {dimensions = array<i32: 0>} : vector<1x2xi32>
    %62 = tpu.iota {dimensions = array<i32: 1>} : vector<1x2xi32>
    %c2_i32_33 = arith.constant 2 : i32
    %63 = vector.broadcast %c2_i32_33 : i32 to vector<1x2xi32>
    %64 = arith.muli %63, %61 : vector<1x2xi32>
    %65 = arith.cmpi eq, %62, %64 : vector<1x2xi32>
    %cst_34 = arith.constant 1.000000e+00 : f32
    %cst_35 = arith.constant 0.000000e+00 : f32
    %66 = vector.broadcast %cst_34 : f32 to vector<1x2xf32>
    %67 = vector.broadcast %cst_35 : f32 to vector<1x2xf32>
    %68 = arith.select %65, %66, %67 : vector<1x2xi1>, vector<1x2xf32>
    %69 = arith.truncf %68 : vector<1x2xf32> to vector<1x2xbf16>
    %c2_i32_36 = arith.constant 2 : i32
    %70 = vector.broadcast %c2_i32_36 : i32 to vector<1x2xi32>
    %71 = arith.muli %70, %61 : vector<1x2xi32>
    %c1_i32_37 = arith.constant 1 : i32
    %72 = vector.broadcast %c1_i32_37 : i32 to vector<1x2xi32>
    %73 = arith.addi %71, %72 : vector<1x2xi32>
    %74 = arith.cmpi eq, %62, %73 : vector<1x2xi32>
    %cst_38 = arith.constant 1.000000e+00 : f32
    %cst_39 = arith.constant 0.000000e+00 : f32
    %75 = vector.broadcast %cst_38 : f32 to vector<1x2xf32>
    %76 = vector.broadcast %cst_39 : f32 to vector<1x2xf32>
    %77 = arith.select %74, %75, %76 : vector<1x2xi1>, vector<1x2xf32>
    %78 = arith.truncf %77 : vector<1x2xf32> to vector<1x2xbf16>
    %c0_i32_40 = arith.constant 0 : i32
    %c2_i32_41 = arith.constant 2 : i32
    %79 = arith.muli %c2_i32_41, %c0_i32_40 : i32
    %cst_42 = arith.constant 0.000000e+00 : f32
    %80 = vector.broadcast %cst_42 : f32 to vector<2x256xf32>
    %c0_i32_43 = arith.constant 0 : i32
    %81 = arith.addi %79, %c0_i32_43 : i32
    %82 = arith.index_cast %81 : i32 to index
    %c0_44 = arith.constant 0 : index
    %c0_45 = arith.constant 0 : index
    %83 = vector.load %arg17[%82, %c0_44, %c0_45] : memref<4x4x128xf32, #tpu.memory_space<vmem>>, vector<1x4x128xf32>
    %84 = vector.shape_cast %83 : vector<1x4x128xf32> to vector<4x128xf32>
    %c0_46 = arith.constant 0 : index
    %c0_47 = arith.constant 0 : index
    %85 = vector.load %arg8[%c0_46, %c0_47] : memref<1152x256xbf16, #tpu.memory_space<vmem>>, vector<128x256xbf16>
    %86 = vector.extract_strided_slice %84 {offsets = [0, 0], sizes = [2, 128], strides = [1, 1]} : vector<4x128xf32> to vector<2x128xf32>
    %87 = arith.truncf %86 : vector<2x128xf32> to vector<2x128xbf16>
    %cst_48 = arith.constant dense<0.000000e+00> : vector<2x256xf32>
    %88 = tpu.matmul %87, %85, %cst_48 {dimension_numbers = #tpu.dot_dimension_numbers<[1], [0], [0], [1], [0, 0, 1, 1], [], []>} : vector<2x128xbf16>, vector<128x256xbf16>, vector<2x256xf32> -> vector<2x256xf32>
    %89 = arith.addf %80, %88 : vector<2x256xf32>
    %c128 = arith.constant 128 : index
    %c0_49 = arith.constant 0 : index
    %90 = vector.load %arg8[%c128, %c0_49] : memref<1152x256xbf16, #tpu.memory_space<vmem>>, vector<128x256xbf16>
    %91 = vector.extract_strided_slice %84 {offsets = [1, 0], sizes = [2, 128], strides = [1, 1]} : vector<4x128xf32> to vector<2x128xf32>
    %92 = arith.truncf %91 : vector<2x128xf32> to vector<2x128xbf16>
    %cst_50 = arith.constant dense<0.000000e+00> : vector<2x256xf32>
    %93 = tpu.matmul %92, %90, %cst_50 {dimension_numbers = #tpu.dot_dimension_numbers<[1], [0], [0], [1], [0, 0, 1, 1], [], []>} : vector<2x128xbf16>, vector<128x256xbf16>, vector<2x256xf32> -> vector<2x256xf32>
    %94 = arith.addf %89, %93 : vector<2x256xf32>
    %c256 = arith.constant 256 : index
    %c0_51 = arith.constant 0 : index
    %95 = vector.load %arg8[%c256, %c0_51] : memref<1152x256xbf16, #tpu.memory_space<vmem>>, vector<128x256xbf16>
    %96 = vector.extract_strided_slice %84 {offsets = [2, 0], sizes = [2, 128], strides = [1, 1]} : vector<4x128xf32> to vector<2x128xf32>
    %97 = arith.truncf %96 : vector<2x128xf32> to vector<2x128xbf16>
    %cst_52 = arith.constant dense<0.000000e+00> : vector<2x256xf32>
    %98 = tpu.matmul %97, %95, %cst_52 {dimension_numbers = #tpu.dot_dimension_numbers<[1], [0], [0], [1], [0, 0, 1, 1], [], []>} : vector<2x128xbf16>, vector<128x256xbf16>, vector<2x256xf32> -> vector<2x256xf32>
    %99 = arith.addf %94, %98 : vector<2x256xf32>
    %c1_i32_53 = arith.constant 1 : i32
    %100 = arith.addi %79, %c1_i32_53 : i32
    %101 = arith.index_cast %100 : i32 to index
    %c0_54 = arith.constant 0 : index
    %c0_55 = arith.constant 0 : index
    %102 = vector.load %arg17[%101, %c0_54, %c0_55] : memref<4x4x128xf32, #tpu.memory_space<vmem>>, vector<1x4x128xf32>
    %103 = vector.shape_cast %102 : vector<1x4x128xf32> to vector<4x128xf32>
    %c384 = arith.constant 384 : index
    %c0_56 = arith.constant 0 : index
    %104 = vector.load %arg8[%c384, %c0_56] : memref<1152x256xbf16, #tpu.memory_space<vmem>>, vector<128x256xbf16>
    %105 = vector.extract_strided_slice %103 {offsets = [0, 0], sizes = [2, 128], strides = [1, 1]} : vector<4x128xf32> to vector<2x128xf32>
    %106 = arith.truncf %105 : vector<2x128xf32> to vector<2x128xbf16>
    %cst_57 = arith.constant dense<0.000000e+00> : vector<2x256xf32>
    %107 = tpu.matmul %106, %104, %cst_57 {dimension_numbers = #tpu.dot_dimension_numbers<[1], [0], [0], [1], [0, 0, 1, 1], [], []>} : vector<2x128xbf16>, vector<128x256xbf16>, vector<2x256xf32> -> vector<2x256xf32>
    %108 = arith.addf %99, %107 : vector<2x256xf32>
    %c512 = arith.constant 512 : index
    %c0_58 = arith.constant 0 : index
    %109 = vector.load %arg8[%c512, %c0_58] : memref<1152x256xbf16, #tpu.memory_space<vmem>>, vector<128x256xbf16>
    %110 = vector.extract_strided_slice %103 {offsets = [1, 0], sizes = [2, 128], strides = [1, 1]} : vector<4x128xf32> to vector<2x128xf32>
    %111 = arith.truncf %110 : vector<2x128xf32> to vector<2x128xbf16>
    %cst_59 = arith.constant dense<0.000000e+00> : vector<2x256xf32>
    %112 = tpu.matmul %111, %109, %cst_59 {dimension_numbers = #tpu.dot_dimension_numbers<[1], [0], [0], [1], [0, 0, 1, 1], [], []>} : vector<2x128xbf16>, vector<128x256xbf16>, vector<2x256xf32> -> vector<2x256xf32>
    %113 = arith.addf %108, %112 : vector<2x256xf32>
    %c640 = arith.constant 640 : index
    %c0_60 = arith.constant 0 : index
    %114 = vector.load %arg8[%c640, %c0_60] : memref<1152x256xbf16, #tpu.memory_space<vmem>>, vector<128x256xbf16>
    %115 = vector.extract_strided_slice %103 {offsets = [2, 0], sizes = [2, 128], strides = [1, 1]} : vector<4x128xf32> to vector<2x128xf32>
    %116 = arith.truncf %115 : vector<2x128xf32> to vector<2x128xbf16>
    %cst_61 = arith.constant dense<0.000000e+00> : vector<2x256xf32>
    %117 = tpu.matmul %116, %114, %cst_61 {dimension_numbers = #tpu.dot_dimension_numbers<[1], [0], [0], [1], [0, 0, 1, 1], [], []>} : vector<2x128xbf16>, vector<128x256xbf16>, vector<2x256xf32> -> vector<2x256xf32>
    %118 = arith.addf %113, %117 : vector<2x256xf32>
    %c2_i32_62 = arith.constant 2 : i32
    %119 = arith.addi %79, %c2_i32_62 : i32
    %120 = arith.index_cast %119 : i32 to index
    %c0_63 = arith.constant 0 : index
    %c0_64 = arith.constant 0 : index
    %121 = vector.load %arg17[%120, %c0_63, %c0_64] : memref<4x4x128xf32, #tpu.memory_space<vmem>>, vector<1x4x128xf32>
    %122 = vector.shape_cast %121 : vector<1x4x128xf32> to vector<4x128xf32>
    %c768 = arith.constant 768 : index
    %c0_65 = arith.constant 0 : index
    %123 = vector.load %arg8[%c768, %c0_65] : memref<1152x256xbf16, #tpu.memory_space<vmem>>, vector<128x256xbf16>
    %124 = vector.extract_strided_slice %122 {offsets = [0, 0], sizes = [2, 128], strides = [1, 1]} : vector<4x128xf32> to vector<2x128xf32>
    %125 = arith.truncf %124 : vector<2x128xf32> to vector<2x128xbf16>
    %cst_66 = arith.constant dense<0.000000e+00> : vector<2x256xf32>
    %126 = tpu.matmul %125, %123, %cst_66 {dimension_numbers = #tpu.dot_dimension_numbers<[1], [0], [0], [1], [0, 0, 1, 1], [], []>} : vector<2x128xbf16>, vector<128x256xbf16>, vector<2x256xf32> -> vector<2x256xf32>
    %127 = arith.addf %118, %126 : vector<2x256xf32>
    %c896 = arith.constant 896 : index
    %c0_67 = arith.constant 0 : index
    %128 = vector.load %arg8[%c896, %c0_67] : memref<1152x256xbf16, #tpu.memory_space<vmem>>, vector<128x256xbf16>
    %129 = vector.extract_strided_slice %122 {offsets = [1, 0], sizes = [2, 128], strides = [1, 1]} : vector<4x128xf32> to vector<2x128xf32>
    %130 = arith.truncf %129 : vector<2x128xf32> to vector<2x128xbf16>
    %cst_68 = arith.constant dense<0.000000e+00> : vector<2x256xf32>
    %131 = tpu.matmul %130, %128, %cst_68 {dimension_numbers = #tpu.dot_dimension_numbers<[1], [0], [0], [1], [0, 0, 1, 1], [], []>} : vector<2x128xbf16>, vector<128x256xbf16>, vector<2x256xf32> -> vector<2x256xf32>
    %132 = arith.addf %127, %131 : vector<2x256xf32>
    %c1024 = arith.constant 1024 : index
    %c0_69 = arith.constant 0 : index
    %133 = vector.load %arg8[%c1024, %c0_69] : memref<1152x256xbf16, #tpu.memory_space<vmem>>, vector<128x256xbf16>
    %134 = vector.extract_strided_slice %122 {offsets = [2, 0], sizes = [2, 128], strides = [1, 1]} : vector<4x128xf32> to vector<2x128xf32>
    %135 = arith.truncf %134 : vector<2x128xf32> to vector<2x128xbf16>
    %cst_70 = arith.constant dense<0.000000e+00> : vector<2x256xf32>
    %136 = tpu.matmul %135, %133, %cst_70 {dimension_numbers = #tpu.dot_dimension_numbers<[1], [0], [0], [1], [0, 0, 1, 1], [], []>} : vector<2x128xbf16>, vector<128x256xbf16>, vector<2x256xf32> -> vector<2x256xf32>
    %137 = arith.addf %132, %136 : vector<2x256xf32>
    %138 = vector.broadcast %60 : vector<1x256xf32> to vector<2x256xf32>
    %139 = arith.addf %137, %138 : vector<2x256xf32>
    %cst_71 = arith.constant 0.000000e+00 : f32
    %140 = vector.broadcast %cst_71 : f32 to vector<2x256xf32>
    %141 = arith.maximumf %139, %140 : vector<2x256xf32>
    %c2_i32_72 = arith.constant 2 : i32
    %142 = arith.muli %c2_i32_72, %c0_i32_40 : i32
    %c1_i32_73 = arith.constant 1 : i32
    %143 = arith.addi %142, %c1_i32_73 : i32
    %cst_74 = arith.constant 0.000000e+00 : f32
    %144 = vector.broadcast %cst_74 : f32 to vector<2x256xf32>
    %c0_i32_75 = arith.constant 0 : i32
    %145 = arith.addi %143, %c0_i32_75 : i32
    %146 = arith.index_cast %145 : i32 to index
    %c0_76 = arith.constant 0 : index
    %c0_77 = arith.constant 0 : index
    %147 = vector.load %arg17[%146, %c0_76, %c0_77] : memref<4x4x128xf32, #tpu.memory_space<vmem>>, vector<1x4x128xf32>
    %148 = vector.shape_cast %147 : vector<1x4x128xf32> to vector<4x128xf32>
    %c0_78 = arith.constant 0 : index
    %c0_79 = arith.constant 0 : index
    %149 = vector.load %arg8[%c0_78, %c0_79] : memref<1152x256xbf16, #tpu.memory_space<vmem>>, vector<128x256xbf16>
    %150 = vector.extract_strided_slice %148 {offsets = [0, 0], sizes = [2, 128], strides = [1, 1]} : vector<4x128xf32> to vector<2x128xf32>
    %151 = arith.truncf %150 : vector<2x128xf32> to vector<2x128xbf16>
    %cst_80 = arith.constant dense<0.000000e+00> : vector<2x256xf32>
    %152 = tpu.matmul %151, %149, %cst_80 {dimension_numbers = #tpu.dot_dimension_numbers<[1], [0], [0], [1], [0, 0, 1, 1], [], []>} : vector<2x128xbf16>, vector<128x256xbf16>, vector<2x256xf32> -> vector<2x256xf32>
    %153 = arith.addf %144, %152 : vector<2x256xf32>
    %c128_81 = arith.constant 128 : index
    %c0_82 = arith.constant 0 : index
    %154 = vector.load %arg8[%c128_81, %c0_82] : memref<1152x256xbf16, #tpu.memory_space<vmem>>, vector<128x256xbf16>
    %155 = vector.extract_strided_slice %148 {offsets = [1, 0], sizes = [2, 128], strides = [1, 1]} : vector<4x128xf32> to vector<2x128xf32>
    %156 = arith.truncf %155 : vector<2x128xf32> to vector<2x128xbf16>
    %cst_83 = arith.constant dense<0.000000e+00> : vector<2x256xf32>
    %157 = tpu.matmul %156, %154, %cst_83 {dimension_numbers = #tpu.dot_dimension_numbers<[1], [0], [0], [1], [0, 0, 1, 1], [], []>} : vector<2x128xbf16>, vector<128x256xbf16>, vector<2x256xf32> -> vector<2x256xf32>
    %158 = arith.addf %153, %157 : vector<2x256xf32>
    %c256_84 = arith.constant 256 : index
    %c0_85 = arith.constant 0 : index
    %159 = vector.load %arg8[%c256_84, %c0_85] : memref<1152x256xbf16, #tpu.memory_space<vmem>>, vector<128x256xbf16>
    %160 = vector.extract_strided_slice %148 {offsets = [2, 0], sizes = [2, 128], strides = [1, 1]} : vector<4x128xf32> to vector<2x128xf32>
    %161 = arith.truncf %160 : vector<2x128xf32> to vector<2x128xbf16>
    %cst_86 = arith.constant dense<0.000000e+00> : vector<2x256xf32>
    %162 = tpu.matmul %161, %159, %cst_86 {dimension_numbers = #tpu.dot_dimension_numbers<[1], [0], [0], [1], [0, 0, 1, 1], [], []>} : vector<2x128xbf16>, vector<128x256xbf16>, vector<2x256xf32> -> vector<2x256xf32>
    %163 = arith.addf %158, %162 : vector<2x256xf32>
    %c1_i32_87 = arith.constant 1 : i32
    %164 = arith.addi %143, %c1_i32_87 : i32
    %165 = arith.index_cast %164 : i32 to index
    %c0_88 = arith.constant 0 : index
    %c0_89 = arith.constant 0 : index
    %166 = vector.load %arg17[%165, %c0_88, %c0_89] : memref<4x4x128xf32, #tpu.memory_space<vmem>>, vector<1x4x128xf32>
    %167 = vector.shape_cast %166 : vector<1x4x128xf32> to vector<4x128xf32>
    %c384_90 = arith.constant 384 : index
    %c0_91 = arith.constant 0 : index
    %168 = vector.load %arg8[%c384_90, %c0_91] : memref<1152x256xbf16, #tpu.memory_space<vmem>>, vector<128x256xbf16>
    %169 = vector.extract_strided_slice %167 {offsets = [0, 0], sizes = [2, 128], strides = [1, 1]} : vector<4x128xf32> to vector<2x128xf32>
    %170 = arith.truncf %169 : vector<2x128xf32> to vector<2x128xbf16>
    %cst_92 = arith.constant dense<0.000000e+00> : vector<2x256xf32>
    %171 = tpu.matmul %170, %168, %cst_92 {dimension_numbers = #tpu.dot_dimension_numbers<[1], [0], [0], [1], [0, 0, 1, 1], [], []>} : vector<2x128xbf16>, vector<128x256xbf16>, vector<2x256xf32> -> vector<2x256xf32>
    %172 = arith.addf %163, %171 : vector<2x256xf32>
    %c512_93 = arith.constant 512 : index
    %c0_94 = arith.constant 0 : index
    %173 = vector.load %arg8[%c512_93, %c0_94] : memref<1152x256xbf16, #tpu.memory_space<vmem>>, vector<128x256xbf16>
    %174 = vector.extract_strided_slice %167 {offsets = [1, 0], sizes = [2, 128], strides = [1, 1]} : vector<4x128xf32> to vector<2x128xf32>
    %175 = arith.truncf %174 : vector<2x128xf32> to vector<2x128xbf16>
    %cst_95 = arith.constant dense<0.000000e+00> : vector<2x256xf32>
    %176 = tpu.matmul %175, %173, %cst_95 {dimension_numbers = #tpu.dot_dimension_numbers<[1], [0], [0], [1], [0, 0, 1, 1], [], []>} : vector<2x128xbf16>, vector<128x256xbf16>, vector<2x256xf32> -> vector<2x256xf32>
    %177 = arith.addf %172, %176 : vector<2x256xf32>
    %c640_96 = arith.constant 640 : index
    %c0_97 = arith.constant 0 : index
    %178 = vector.load %arg8[%c640_96, %c0_97] : memref<1152x256xbf16, #tpu.memory_space<vmem>>, vector<128x256xbf16>
    %179 = vector.extract_strided_slice %167 {offsets = [2, 0], sizes = [2, 128], strides = [1, 1]} : vector<4x128xf32> to vector<2x128xf32>
    %180 = arith.truncf %179 : vector<2x128xf32> to vector<2x128xbf16>
    %cst_98 = arith.constant dense<0.000000e+00> : vector<2x256xf32>
    %181 = tpu.matmul %180, %178, %cst_98 {dimension_numbers = #tpu.dot_dimension_numbers<[1], [0], [0], [1], [0, 0, 1, 1], [], []>} : vector<2x128xbf16>, vector<128x256xbf16>, vector<2x256xf32> -> vector<2x256xf32>
    %182 = arith.addf %177, %181 : vector<2x256xf32>
    %c2_i32_99 = arith.constant 2 : i32
    %183 = arith.addi %143, %c2_i32_99 : i32
    %184 = arith.index_cast %183 : i32 to index
    %c0_100 = arith.constant 0 : index
    %c0_101 = arith.constant 0 : index
    %185 = vector.load %arg17[%184, %c0_100, %c0_101] : memref<4x4x128xf32, #tpu.memory_space<vmem>>, vector<1x4x128xf32>
    %186 = vector.shape_cast %185 : vector<1x4x128xf32> to vector<4x128xf32>
    %c768_102 = arith.constant 768 : index
    %c0_103 = arith.constant 0 : index
    %187 = vector.load %arg8[%c768_102, %c0_103] : memref<1152x256xbf16, #tpu.memory_space<vmem>>, vector<128x256xbf16>
    %188 = vector.extract_strided_slice %186 {offsets = [0, 0], sizes = [2, 128], strides = [1, 1]} : vector<4x128xf32> to vector<2x128xf32>
    %189 = arith.truncf %188 : vector<2x128xf32> to vector<2x128xbf16>
    %cst_104 = arith.constant dense<0.000000e+00> : vector<2x256xf32>
    %190 = tpu.matmul %189, %187, %cst_104 {dimension_numbers = #tpu.dot_dimension_numbers<[1], [0], [0], [1], [0, 0, 1, 1], [], []>} : vector<2x128xbf16>, vector<128x256xbf16>, vector<2x256xf32> -> vector<2x256xf32>
    %191 = arith.addf %182, %190 : vector<2x256xf32>
    %c896_105 = arith.constant 896 : index
    %c0_106 = arith.constant 0 : index
    %192 = vector.load %arg8[%c896_105, %c0_106] : memref<1152x256xbf16, #tpu.memory_space<vmem>>, vector<128x256xbf16>
    %193 = vector.extract_strided_slice %186 {offsets = [1, 0], sizes = [2, 128], strides = [1, 1]} : vector<4x128xf32> to vector<2x128xf32>
    %194 = arith.truncf %193 : vector<2x128xf32> to vector<2x128xbf16>
    %cst_107 = arith.constant dense<0.000000e+00> : vector<2x256xf32>
    %195 = tpu.matmul %194, %192, %cst_107 {dimension_numbers = #tpu.dot_dimension_numbers<[1], [0], [0], [1], [0, 0, 1, 1], [], []>} : vector<2x128xbf16>, vector<128x256xbf16>, vector<2x256xf32> -> vector<2x256xf32>
    %196 = arith.addf %191, %195 : vector<2x256xf32>
    %c1024_108 = arith.constant 1024 : index
    %c0_109 = arith.constant 0 : index
    %197 = vector.load %arg8[%c1024_108, %c0_109] : memref<1152x256xbf16, #tpu.memory_space<vmem>>, vector<128x256xbf16>
    %198 = vector.extract_strided_slice %186 {offsets = [2, 0], sizes = [2, 128], strides = [1, 1]} : vector<4x128xf32> to vector<2x128xf32>
    %199 = arith.truncf %198 : vector<2x128xf32> to vector<2x128xbf16>
    %cst_110 = arith.constant dense<0.000000e+00> : vector<2x256xf32>
    %200 = tpu.matmul %199, %197, %cst_110 {dimension_numbers = #tpu.dot_dimension_numbers<[1], [0], [0], [1], [0, 0, 1, 1], [], []>} : vector<2x128xbf16>, vector<128x256xbf16>, vector<2x256xf32> -> vector<2x256xf32>
    %201 = arith.addf %196, %200 : vector<2x256xf32>
    %202 = vector.broadcast %60 : vector<1x256xf32> to vector<2x256xf32>
    %203 = arith.addf %201, %202 : vector<2x256xf32>
    %cst_111 = arith.constant 0.000000e+00 : f32
    %204 = vector.broadcast %cst_111 : f32 to vector<2x256xf32>
    %205 = arith.maximumf %203, %204 : vector<2x256xf32>
    %206 = arith.maximumf %141, %205 : vector<2x256xf32>
    %207 = arith.truncf %206 : vector<2x256xf32> to vector<2x256xbf16>
    %cst_112 = arith.constant dense<0.000000e+00> : vector<1x256xf32>
    %208 = tpu.matmul %69, %207, %cst_112 {dimension_numbers = #tpu.dot_dimension_numbers<[1], [0], [0], [1], [0, 0, 1, 1], [], []>} : vector<1x2xbf16>, vector<2x256xbf16>, vector<1x256xf32> -> vector<1x256xf32>
    %cst_113 = arith.constant dense<0.000000e+00> : vector<1x256xf32>
    %209 = tpu.matmul %78, %207, %cst_113 {dimension_numbers = #tpu.dot_dimension_numbers<[1], [0], [0], [1], [0, 0, 1, 1], [], []>} : vector<1x2xbf16>, vector<2x256xbf16>, vector<1x256xf32> -> vector<1x256xf32>
    %210 = arith.maximumf %208, %209 : vector<1x256xf32>
    %211 = arith.index_cast %c0_i32_40 : i32 to index
    %c0_114 = arith.constant 0 : index
    %c0_115 = arith.constant 0 : index
    %212 = vector.load %arg18[%211, %c0_114, %c0_115] : memref<1x1x256xf32, #tpu.memory_space<vmem>>, vector<1x1x256xf32>
    %213 = vector.shape_cast %212 : vector<1x1x256xf32> to vector<1x256xf32>
    %214 = vector.shape_cast %210 : vector<1x256xf32> to vector<1x1x256xf32>
    tpu.vector_store %arg18[%211, %c0_114, %c0_115], %214 {strides = array<i32>} : memref<1x1x256xf32, #tpu.memory_space<vmem>>, vector<1x1x256xf32>,
    %c1_i32_116 = arith.constant 1 : i32
    %c0_117 = arith.constant 0 : index
    %c0_118 = arith.constant 0 : index
    %c0_119 = arith.constant 0 : index
    %215 = vector.load %arg18[%c0_117, %c0_118, %c0_119] : memref<1x1x256xf32, #tpu.memory_space<vmem>>, vector<1x1x256xf32>
    %216 = vector.shape_cast %215 : vector<1x1x256xf32> to vector<1x256xf32>
    %217 = arith.truncf %216 : vector<1x256xf32> to vector<1x256xbf16>
    %c0_120 = arith.constant 0 : index
    %c0_121 = arith.constant 0 : index
    %218 = vector.load %arg10[%c0_120, %c0_121] : memref<256x512xbf16, #tpu.memory_space<vmem>>, vector<256x512xbf16>
    %cst_122 = arith.constant dense<0.000000e+00> : vector<1x512xf32>
    %219 = tpu.matmul %217, %218, %cst_122 {dimension_numbers = #tpu.dot_dimension_numbers<[1], [0], [0], [1], [0, 0, 1, 1], [], []>} : vector<1x256xbf16>, vector<256x512xbf16>, vector<1x512xf32> -> vector<1x512xf32>
    %c0_123 = arith.constant 0 : index
    %c0_124 = arith.constant 0 : index
    %220 = vector.load %arg11[%c0_123, %c0_124] : memref<1x512xf32, #tpu.memory_space<vmem>>, vector<1x512xf32>
    %221 = arith.addf %219, %220 : vector<1x512xf32>
    %cst_125 = arith.constant 0.000000e+00 : f32
    %222 = vector.broadcast %cst_125 : f32 to vector<1x512xf32>
    %223 = arith.maximumf %221, %222 : vector<1x512xf32>
    %224 = arith.truncf %223 : vector<1x512xf32> to vector<1x512xbf16>
    %c0_126 = arith.constant 0 : index
    %c0_127 = arith.constant 0 : index
    %225 = vector.load %arg12[%c0_126, %c0_127] : memref<512x101xbf16, #tpu.memory_space<vmem>>, vector<512x101xbf16>
    %cst_128 = arith.constant dense<0.000000e+00> : vector<1x101xf32>
    %226 = tpu.matmul %224, %225, %cst_128 {dimension_numbers = #tpu.dot_dimension_numbers<[1], [0], [0], [1], [0, 0, 1, 1], [], []>} : vector<1x512xbf16>, vector<512x101xbf16>, vector<1x101xf32> -> vector<1x101xf32>
    %c0_129 = arith.constant 0 : index
    %c0_130 = arith.constant 0 : index
    %227 = vector.load %arg13[%c0_129, %c0_130] : memref<1x101xf32, #tpu.memory_space<vmem>>, vector<1x101xf32>
    %228 = arith.addf %226, %227 : vector<1x101xf32>
    %cst_131 = arith.constant dense<0xFF800000> : vector<1xf32>
    %229 = vector.multi_reduction <maximumf>, %228, %cst_131 [1] : vector<1x101xf32> to vector<1xf32>
    %230 = vector.shape_cast %229 : vector<1xf32> to vector<1x1xf32>
    %231 = vector.broadcast %230 : vector<1x1xf32> to vector<1x101xf32>
    %232 = arith.subf %228, %231 : vector<1x101xf32>
    %233 = math.exp %232 : vector<1x101xf32>
    %cst_132 = arith.constant dense<0.000000e+00> : vector<1xf32>
    %234 = vector.multi_reduction <add>, %233, %cst_132 [1] : vector<1x101xf32> to vector<1xf32>
    %235 = vector.shape_cast %234 : vector<1xf32> to vector<1x1xf32>
    %236 = vector.broadcast %235 : vector<1x1xf32> to vector<1x101xf32>
    %237 = arith.divf %233, %236 : vector<1x101xf32>
    %c0_133 = arith.constant 0 : index
    %c0_134 = arith.constant 0 : index
    %c0_135 = arith.constant 0 : index
    %238 = vector.load %arg14[%c0_133, %c0_134, %c0_135] : memref<1x1x101xf32, #tpu.memory_space<vmem>>, vector<1x1x101xf32>
    %239 = vector.shape_cast %238 : vector<1x1x101xf32> to vector<1x101xf32>
    %240 = vector.shape_cast %237 : vector<1x101xf32> to vector<1x1x101xf32>
    tpu.vector_store %arg14[%c0_133, %c0_134, %c0_135], %240 {strides = array<i32>} : memref<1x1x101xf32, #tpu.memory_space<vmem>>, vector<1x1x101xf32>,
    return
  }
  func.func @transform_0(%arg0: i32) -> (i32, i32, i32) {
    %c0_i32 = arith.constant 0 : i32
    %c0_i32_0 = arith.constant 0 : i32
    %c0_i32_1 = arith.constant 0 : i32
    return %arg0, %c0_i32, %c0_i32_0 : i32, i32, i32
  }
  func.func @transform_1(%arg0: i32) -> (i32, i32) {
    %c0_i32 = arith.constant 0 : i32
    %c0_i32_0 = arith.constant 0 : i32
    %c0_i32_1 = arith.constant 0 : i32
    return %c0_i32, %c0_i32_0 : i32, i32
  }
  func.func @transform_2(%arg0: i32) -> (i32, i32) {
    %c0_i32 = arith.constant 0 : i32
    %c0_i32_0 = arith.constant 0 : i32
    %c0_i32_1 = arith.constant 0 : i32
    return %c0_i32, %c0_i32_0 : i32, i32
  }
  func.func @transform_3(%arg0: i32) -> (i32, i32) {
    %c0_i32 = arith.constant 0 : i32
    %c0_i32_0 = arith.constant 0 : i32
    %c0_i32_1 = arith.constant 0 : i32
    return %c0_i32, %c0_i32_0 : i32, i32
  }
  func.func @transform_4(%arg0: i32) -> (i32, i32) {
    %c0_i32 = arith.constant 0 : i32
    %c0_i32_0 = arith.constant 0 : i32
    %c0_i32_1 = arith.constant 0 : i32
    return %c0_i32, %c0_i32_0 : i32, i32
  }
  func.func @transform_5(%arg0: i32) -> (i32, i32) {
    %c0_i32 = arith.constant 0 : i32
    %c0_i32_0 = arith.constant 0 : i32
    %c0_i32_1 = arith.constant 0 : i32
    return %c0_i32, %c0_i32_0 : i32, i32
  }
  func.func @transform_6(%arg0: i32) -> (i32, i32) {
    %c0_i32 = arith.constant 0 : i32
    %c0_i32_0 = arith.constant 0 : i32
    %c0_i32_1 = arith.constant 0 : i32
    return %c0_i32, %c0_i32_0 : i32, i32
  }
  func.func @transform_7(%arg0: i32) -> (i32, i32) {
    %c0_i32 = arith.constant 0 : i32
    %c0_i32_0 = arith.constant 0 : i32
    %c0_i32_1 = arith.constant 0 : i32
    return %c0_i32, %c0_i32_0 : i32, i32
  }
  func.func @transform_8(%arg0: i32) -> (i32, i32) {
    %c0_i32 = arith.constant 0 : i32
    %c0_i32_0 = arith.constant 0 : i32
    %c0_i32_1 = arith.constant 0 : i32
    return %c0_i32, %c0_i32_0 : i32, i32
  }
  func.func @transform_9(%arg0: i32) -> (i32, i32) {
    %c0_i32 = arith.constant 0 : i32
    %c0_i32_0 = arith.constant 0 : i32
    %c0_i32_1 = arith.constant 0 : i32
    return %c0_i32, %c0_i32_0 : i32, i32
  }
  func.func @transform_10(%arg0: i32) -> (i32, i32) {
    %c0_i32 = arith.constant 0 : i32
    %c0_i32_0 = arith.constant 0 : i32
    %c0_i32_1 = arith.constant 0 : i32
    return %c0_i32, %c0_i32_0 : i32, i32
  }
  func.func @transform_11(%arg0: i32) -> (i32, i32) {
    %c0_i32 = arith.constant 0 : i32
    %c0_i32_0 = arith.constant 0 : i32
    %c0_i32_1 = arith.constant 0 : i32
    return %c0_i32, %c0_i32_0 : i32, i32
  }
  func.func @transform_12(%arg0: i32) -> (i32, i32) {
    %c0_i32 = arith.constant 0 : i32
    %c0_i32_0 = arith.constant 0 : i32
    %c0_i32_1 = arith.constant 0 : i32
    return %c0_i32, %c0_i32_0 : i32, i32
  }
  func.func @transform_13(%arg0: i32) -> (i32, i32, i32) {
    %c0_i32 = arith.constant 0 : i32
    %c0_i32_0 = arith.constant 0 : i32
    %c0_i32_1 = arith.constant 0 : i32
    return %arg0, %c0_i32, %c0_i32_0 : i32, i32, i32
  }
}

</mosaic_0001>

<bundles_post_ra>
// kernel: convnet_forward.1
= control target key start
LH: loop header
LB: loop body
LE: loop exit
PB: predicated region body
PF: predicated region fallthrough
CT: control target
= control target key end

     0   :  { %s11590_s0 = inlined_call_operand.vmem [shape: f32[100,50,1], index: 0, kind: input, shape index: {}]   ;;  %s11591_s1 = inlined_call_operand.vmem [shape: f32[9,32], index: 1, kind: input, shape index: {}]   ;;  %s11592_s2 = inlined_call_operand.vmem [shape: f32[1,32], index: 2, kind: input, shape index: {}]   ;;  %s11593_s3 = inlined_call_operand.vmem [shape: bf16[288,64], index: 3, kind: input, shape index: {}]   ;;  %s11594_s4 = inlined_call_operand.vmem [shape: f32[1,64], index: 4, kind: input, shape index: {}]   ;;  %s11595_s5 = inlined_call_operand.vmem [shape: bf16[576,128], index: 5, kind: input, shape index: {}]   ;;  %s11596_s6 = inlined_call_operand.vmem [shape: f32[1,128], index: 6, kind: input, shape index: {}]   ;;  %s11597_s7 = inlined_call_operand.vmem [shape: bf16[1152,256], index: 7, kind: input, shape index: {}]   ;;  %s11598_s8 = inlined_call_operand.vmem [shape: f32[1,256], index: 8, kind: input, shape index: {}]   ;;  %s11599_s9 = inlined_call_operand.vmem [shape: bf16[256,512], index: 9, kind: input, shape index: {}]   ;;  %s11600_s10 = inlined_call_operand.vmem [shape: f32[1,512], index: 10, kind: input, shape index: {}]   ;;  %s11601_s11 = inlined_call_operand.vmem [shape: bf16[512,101], index: 11, kind: input, shape index: {}]   ;;  %s11602_s12 = inlined_call_operand.vmem [shape: f32[1,101], index: 12, kind: input, shape index: {}]   ;;  %s11603_s13 = inlined_call_operand.hbm [shape: f32[2,1,101], index: 13, kind: output, shape index: {}]  }
   0x1   :  { %11686 = sst [smem:[#allocation74_spill]] %s11590_s0 }
   0x2   :  { %11687 = sst [smem:[#allocation75_spill]] %s11591_s1 }
   0x3   :  { %11688 = sst [smem:[#allocation76_spill]] %s11592_s2 }
   0x4   :  { %18 = vsyncpa [#allocation7], 0 }
   0x5   :  { %20 = vsyncpa [#allocation7 + $0x1], 0  ;;  %s8617_s25 = smov 0   ;;  %s8619_s26 = smov 0  }
   0x6   :  { %s8621_s27 = smov 0   ;;  %s8623_s28 = smov 0  }
   0x7 LB: > { %s8638_s29 = sadd.s32 4294967295, %s8523_s28   ;;  %s6855_s30 = sadd.s32 4294967294, %s8523_s28   ;;  %s8523_s28 = sphi %s8623_s28, %s11904_s28   ;;  %s8519_s27 = sphi %s8621_s27, %s11903_s27   ;;  %s8515_s26 = sphi %s8619_s26, %s11902_s26   ;;  %s8511_s25 = sphi %s8617_s25, %s11901_s25  }
   0x8   : > { %s8642_s14 = sadd.s32 1, %s8523_s28   ;;  %s311_s15 = sadd.s32 1, %s8519_s27 }
   0x9   : > { %s308_s16 = ssub.s32 %s8523_s28, %s8642_s14  ;;  %p321_p0 = scmp.ne.s32.totalorder %s8519_s27, %s8515_s26 }
   0xa   : > { %p309_p1 = scmp.eq.s32.totalorder %s308_s16, 0  ;;  %p322_p2 = scmp.eq.s32.totalorder %s8638_s29, 1 }
   0xb   : > { %p327_p3 = scmp.ne.s32.totalorder %s8515_s26, %s8511_s25  ;;  %p328_p4 = scmp.eq.s32.totalorder %s6855_s30, 1 }
   0xc   : > { %s8653_s17 = scalar_select %p309_p1, %s8519_s27, %s311_s15  }
   0xd   : > { %p8655_p5 = por %p322_p2, %p321_p0  ;;  %p8659_p6 = por %p328_p4, %p327_p3 }
   0xe   : > { %p6858_p7 = scmp.ge.s32.totalorder %s8523_s28, 1  ;;  %p392_p8 = scmp.lt.s32.totalorder %s8523_s28, 3 }
  0x10   : > { %p393_p9 = pnand %p6858_p7, %p392_p8 }
  0x12   : > { %396 = sbr.rel (%p393_p9) target bundleno = 3136 (0xc40), region = 72 }
  0x19   : > { %s11604_s20 = sand.u32 1, %s8515_s26   ;;  %s436_s21 = smul.u32 50, %s8638_s29  ;;  %v11605_v1 = vlaneseq  ;;  %v8537_v10 = vmov 0.0  }
  0x1a   : > { %s11691_s2 = sld [smem:[#allocation76_spill]]  ;;  %s11694_s0 = sld [smem:[#allocation74_spill]] }
  0x1b   : > { %p437_p10 = scmp.lt.s32.totalorder %s436_s21, 99  ;;  %v8673_v2 = vshrl.u32 %v11605_v1, 7  ;;  %v450_v3 = vand.u32 127, %v11605_v1  ;;  %s8706_s22 = smov 0  }
  0x1d   : > { %11692 = vst [vmem:[#allocation9_spill] sm:$0xff] %v8673_v2  ;;  %s11906_s21 = smov (!%p437_p10, %s436_s21), 99  ;;  %v447_v4 = vadd.s32 8, %v8673_v2  ;;  %v448_v5 = vadd.s32 16, %v8673_v2  ;;  %v451_v6 = vmul.u32 2, %v8673_v2 }
  0x1e   : > { %s7935_s24 = smul.u32 56, %s11906_s21  ;;  %s8704_s21 = scalar_lea.vmem [#allocation6], %s11604_s20 }
  0x1f   : > { %v452_v7 = vmul.u32 2, %v447_v4  ;;  %v453_v8 = vmul.u32 2, %v448_v5  ;;  %vm454_vm0 = vcmp.eq.s32.totalorder %v450_v3, %v451_v6  ;;  %v462_v9 = vadd.s32 1, %v451_v6 }
  0x20   : > { %v8670_v0 = vld [vmem:[%s11691_s2] ss:$0 sm:$0xff]  ;;  %v8679_v11 = vsel %vm454_vm0, 1.0, %v8537_v10  ;;  %s8684_s16 = scalar_lea.vmem %s11694_s0, %s7935_s24 }
  0x21   : > { %11693 = vst [vmem:[#allocation10_spill] sm:$0xff] %v8679_v11  ;;  %vm455_vm1 = vcmp.eq.s32.totalorder %v450_v3, %v452_v7  ;;  %vm456_vm2 = vcmp.eq.s32.totalorder %v450_v3, %v453_v8  ;;  %v463_v12 = vadd.s32 1, %v452_v7  ;;  %v464_v13 = vadd.s32 1, %v453_v8 }
  0x22   : > { %v458_v14 = vsel %vm455_vm1, 1.0, %v8537_v10  ;;  %v8686_v15 = vsel %vm456_vm2, 1.0, %v8537_v10  ;;  %vm465_vm3 = vcmp.eq.s32.totalorder %v450_v3, %v462_v9 }
  0x23   : > { %11695 = vst [vmem:[#allocation11_spill] sm:$0xff] %v8686_v15  ;;  %v8689_v16 = vpack.c.bf16 %v458_v14, %v8679_v11  ;;  %vm466_vm4 = vcmp.eq.s32.totalorder %v450_v3, %v463_v12  ;;  %vm467_vm5 = vcmp.eq.s32.totalorder %v450_v3, %v464_v13  ;;  %v8693_v18 = vsel %vm465_vm3, 1.0, %v8537_v10 }
  0x24   : > { %11697 = vst [vmem:[#allocation13_spill] sm:$0xff] %v8693_v18  ;;  %v469_v19 = vsel %vm466_vm4, 1.0, %v8537_v10  ;;  %v8695_v20 = vsel %vm467_vm5, 1.0, %v8537_v10 }
  0x25   : > { %11696 = vst [vmem:[#allocation12_spill] sm:$0xff] %v8689_v16  ;;  %11698 = vst [vmem:[#allocation14_spill] sm:$0xff] %v8695_v20  ;;  %v8698_v21 = vpack.c.bf16 %v469_v19, %v8693_v18 }
  0x27   : > { %11699 = vst [vmem:[#allocation15_spill] sm:$0xff] %v8698_v21 }
  0x28 LB: >> { %v8538_v23 = vmov 0   ;;  %s6861_s23 = smul.u32 112, %s8527_s22  ;;  %vm1285_vm6 = vcmask 392192   ;;  %s11702_s1 = sld [smem:[#allocation75_spill]]  ;;  %vm560_vm7 = vcmask 1046528   ;;  %vm605_vm8 = vcmask 1045504   ;;  %s8527_s22 = sphi %s8706_s22, %s478_s22  }
  0x29   : >> { %8009 = vset.pattern.permute.xlu1 %v8538_v23  ;;  %8008 = vset.pattern.permute.xlu0 %v8538_v23  ;;  %s1397_s30 = smul.u32 24, %s8527_s22  ;;  %vm1399_vm9 = vcmask 261120   ;;  %s478_s22 = sadd.s32 1, %s8527_s22  }
  0x2a   : >> { %s8713_s24 = scalar_lea.vmem %s8684_s16, %s6861_s23  ;;  %p475_p11 = scmp.ge.s32.totalorder %s478_s22, 24  }
  0x2b   : >> { %v484_v24 = vld [vmem:[%s8713_s24 + $0x10] sm:$0xff]  ;;  %v482_v25 = vld [vmem:[%s8713_s24] sm:$0xff]  ;;  %v6867_v26 = vld [vmem:[%s8713_s24 + $0x38] sm:$0xff]  ;;  %s1398_s15 = scalar_lea.vmem [#allocation2], %s1397_s30  ;;  %s9449_s0 = smov (%p475_p11), 0  }
  0x2c   : >> { %502 = vperm.xlu1 %8009, %v484_v24   ;;  %492 = vperm.xlu0 %8008, %v482_v25   ;;  %v483_v27 = vld [vmem:[%s8713_s24 + $0x8] sm:$0xff]  ;;  %v6868_v29 = vld [vmem:[%s8713_s24 + $0x40] sm:$0xff]  ;;  %v485_v31 = vld [vmem:[%s8713_s24 + $0x18] sm:$0xff] }
  0x2d   : >> { %v6869_v28 = vld [vmem:[%s8713_s24 + $0x48] sm:$0xff]  ;;  %v486_v30 = vld [vmem:[%s8713_s24 + $0x20] sm:$0xff]  ;;  %v6871_v32 = vld [vmem:[%s8713_s24 + $0x58] sm:$0xff] }
  0x2e   : >> { %v6870_v33 = vld [vmem:[%s8713_s24 + $0x50] sm:$0xff]  ;;  %v6880_v34 = vld [vmem:[%s8713_s24 + $0x78] sm:$0xff]  ;;  %v487_v36 = vld [vmem:[%s8713_s24 + $0x28] sm:$0xff] }
  0x2f   : >> { %v6879_v35 = vld [vmem:[%s8713_s24 + $0x70] sm:$0xff]  ;;  %v6881_v37 = vld [vmem:[%s8713_s24 + $0x80] sm:$0xff]  ;;  %v6882_v40 = vld [vmem:[%s8713_s24 + $0x88] sm:$0xff] }
  0x30   : >> { %644 = vperm.xlu1 %8009, %v6867_v26   ;;  %497 = vperm.xlu0 %8008, %v483_v27   ;;  %v6872_v38 = vld [vmem:[%s8713_s24 + $0x60] sm:$0xff]  ;;  %v488_v39 = vld [vmem:[%s8713_s24 + $0x30] sm:$0x3]  ;;  %v6873_v41 = vld [vmem:[%s8713_s24 + $0x68] sm:$0x3] }
  0x31   : >> { %v6892_v42 = vld [vmem:[%s8713_s24 + $0xa8] sm:$0xff]  ;;  %v6883_v43 = vld [vmem:[%s8713_s24 + $0x90] sm:$0xff]  ;;  %v6894_v44 = vld [vmem:[%s8713_s24 + $0xb8] sm:$0xff] }
  0x32   : >> { %v6893_v45 = vld [vmem:[%s8713_s24 + $0xb0] sm:$0xff]  ;;  %v6885_v46 = vld [vmem:[%s8713_s24 + $0xa0] sm:$0x3]  ;;  %v6884_v47 = vld [vmem:[%s8713_s24 + $0x98] sm:$0xff] }
  0x33   : >> { %v6896_v48 = vld [vmem:[%s8713_s24 + $0xc8] sm:$0xff]  ;;  %v6895_v49 = vld [vmem:[%s8713_s24 + $0xc0] sm:$0xff]  ;;  %v6898_v50 = vld [vmem:[%s8713_s24 + $0xd8] sm:$0x3] }
  0x34   : >> { %654 = vperm.xlu1 %8009, %v6869_v28   ;;  %649 = vperm.xlu0 %8008, %v6868_v29   ;;  %v6897_v51 = vld [vmem:[%s8713_s24 + $0xd0] sm:$0xff]  ;;  %v11700_v16 = vld [vmem:[#allocation12_spill] sm:$0xff]  ;;  %v8772_v60 = vld [vmem:[%s11702_s1 + $0x4] ss:$0 sm:$0xff] }
  0x35   : >> { %7533 = vmatprep.mubr.msk.bf16.mxu0 %vm1285_vm6, %v11700_v16  ;;  %v11701_v21 = vld [vmem:[#allocation15_spill] sm:$0xff]  ;;  %v8750_v52 = vld [vmem:[%s11702_s1 + $0x1] ss:$0 sm:$0xff]  ;;  %v8755_v53 = vld [vmem:[%s11702_s1 + $0x2] ss:$0 sm:$0xff] }
  0x36   : >> { %7543 = vmatprep.mubr.msk.bf16.mxu1 %vm1285_vm6, %v11701_v21  ;;  %v8760_v56 = vld [vmem:[%s11702_s1] ss:$0 sm:$0xff]  ;;  %v8777_v61 = vld [vmem:[%s11702_s1 + $0x5] ss:$0 sm:$0xff]  ;;  %v8787_v4 = vld [vmem:[%s11702_s1 + $0x3] ss:$0 sm:$0xff] }
  0x38   : >> { %512 = vperm.xlu1 %8009, %v486_v30   ;;  %507 = vperm.xlu0 %8008, %v485_v31  }
  0x3c   : >> { %664 = vperm.xlu1 %8009, %v6871_v32   ;;  %659 = vperm.xlu0 %8008, %v6870_v33  }
  0x40   : >> { %799 = vperm.xlu1 %8009, %v6880_v34   ;;  %794 = vperm.xlu0 %8008, %v6879_v35  }
  0x44   : >> { %517 = vperm.xlu1 %8009, %v487_v36   ;;  %804 = vperm.xlu0 %8008, %v6881_v37  }
  0x48   : >> { %669 = vperm.xlu1 %8009, %v6872_v38   ;;  %539 = vperm.xlu0 %8008, %v488_v39  }
  0x4c   : >> { %809 = vperm.xlu1 %8009, %v6882_v40   ;;  %691 = vperm.xlu0 %8008, %v6873_v41  }
  0x50   : >> { %1141 = vperm.xlu1 %8009, %v6892_v42   ;;  %814 = vperm.xlu0 %8008, %v6883_v43  }
  0x54   : >> { %1151 = vperm.xlu1 %8009, %v6894_v44   ;;  %1146 = vperm.xlu0 %8008, %v6893_v45  }
  0x58   : >> { %841 = vperm.xlu1 %8009, %v6885_v46   ;;  %819 = vperm.xlu0 %8008, %v6884_v47  }
  0x5c   : >> { %1161 = vperm.xlu1 %8009, %v6896_v48   ;;  %1156 = vperm.xlu0 %8008, %v6895_v49  }
  0x60   : >> { %1183 = vperm.xlu1 %8009, %v6898_v50   ;;  %1166 = vperm.xlu0 %8008, %v6897_v51  }
  0xab   : >> { %v503_v54 = vpop.permute.xlu1 %502  ;;  %v493_v55 = vpop.permute.xlu0 %492 }
  0xac   : >> { %v8763_v57 = vmul.f32 %v8750_v52, %v503_v54  ;;  %v8766_v58 = vmul.f32 %v8755_v53, %v503_v54  ;;  %v546_v59 = vmul.f32 %v8750_v52, %v493_v55  ;;  %v591_v62 = vmul.f32 %v8755_v53, %v493_v55 }
  0xad   : >> { %v8781_v63 = vmul.f32 %v8760_v56, %v503_v54  ;;  %v524_v3 = vmul.f32 %v8760_v56, %v493_v55 }
  0xae   : >> { %v564_v7 = vrot.slane %v8763_v57, 1  ;;  %v609_v8 = vrot.slane %v8766_v58, 2  ;;  %v561_v12 = vrot.slane %v546_v59, 1  ;;  %v606_v23 = vrot.slane %v591_v62, 2  ;;  %v8930_v58 = vld [vmem:[%s11702_s1 + $0x6] ss:$0 sm:$0xff] }
  0xaf   : >> { %v645_v5 = vpop.permute.xlu1 %644  ;;  %v498_v6 = vpop.permute.xlu0 %497 }
  0xb0   : >> { %v698_v9 = vmul.f32 %v8772_v60, %v645_v5  ;;  %v8793_v10 = vmul.f32 %v8777_v61, %v645_v5  ;;  %v8796_v13 = vmul.f32 %v8750_v52, %v645_v5  ;;  %v8799_v14 = vmul.f32 %v8755_v53, %v645_v5 }
  0xb1   : >> { %v547_v19 = vmul.f32 %v8750_v52, %v498_v6  ;;  %v676_v24 = vmul.f32 %v8787_v4, %v645_v5  ;;  %v8804_v25 = vmul.f32 %v8760_v56, %v645_v5  ;;  %v592_v26 = vmul.f32 %v8755_v53, %v498_v6 }
  0xb2   : >> { %v712_v27 = vrot.slane %v698_v9, 1  ;;  %v525_v29 = vmul.f32 %v8760_v56, %v498_v6 }
  0xb3   : >> { %v562_v30 = vrot.slane %v547_v19, 1  ;;  %v655_v31 = vpop.permute.xlu1 %654  ;;  %v650_v32 = vpop.permute.xlu0 %649  ;;  %v607_v35 = vrot.slane %v592_v26, 2 }
  0xb4   : >> { %v8812_v36 = vmul.f32 %v8772_v60, %v655_v31  ;;  %v8819_v39 = vmul.f32 %v8777_v61, %v655_v31  ;;  %v8822_v40 = vmul.f32 %v8750_v52, %v655_v31  ;;  %v8825_v43 = vmul.f32 %v8787_v4, %v655_v31 }
  0xb5   : >> { %v563_v37 = vsel %vm560_vm7, %v561_v12, %v562_v30  ;;  %v565_v38 = vsel %vm560_vm7, %v562_v30, %v564_v7  ;;  %v8828_v44 = vmul.f32 %v8760_v56, %v655_v31  ;;  %v608_v45 = vsel %vm605_vm8, %v606_v23, %v607_v35 }
  0xb6   : >> { %v580_v41 = vadd.f32 %v563_v37, %v524_v3  ;;  %v581_v42 = vadd.f32 %v565_v38, %v525_v29  ;;  %v610_v46 = vsel %vm605_vm8, %v607_v35, %v609_v8  ;;  %v715_v47 = vrot.slane %v8812_v36, 1 }
  0xb7   : >> { %v8836_v48 = vmul.f32 %v8755_v53, %v655_v31  ;;  %v513_v49 = vpop.permute.xlu1 %512  ;;  %v677_v54 = vmul.f32 %v8787_v4, %v650_v32  ;;  %v699_v55 = vmul.f32 %v8772_v60, %v650_v32  ;;  %v508_v59 = vpop.permute.xlu0 %507  ;;  %v11613_v62 = vrot.slane %v8819_v39, 2 }
  0xb8   : >> { %v625_v50 = vadd.f32 %v608_v45, %v580_v41  ;;  %v626_v51 = vadd.f32 %v610_v46, %v581_v42  ;;  %v11606_v3 = vrot.slane %v8822_v40, 1  ;;  %v8843_v5 = vmul.f32 %v8777_v61, %v650_v32 }
  0xb9   : >> { %v8846_v6 = vmul.f32 %v8750_v52, %v650_v32  ;;  %v713_v19 = vrot.slane %v699_v55, 1  ;;  %v8850_v23 = vmul.f32 %v8755_v53, %v650_v32  ;;  %v950_v29 = vmul.f32 %v8760_v56, %v650_v32 }
  0xba   : >> { %v683_v12 = vadd.f32 %v677_v54, %v626_v51  ;;  %v8852_v26 = vadd.f32 %v676_v24, %v625_v50  ;;  %v8857_v31 = vmul.f32 %v8750_v52, %v513_v49  ;;  %v757_v37 = vrot.slane %v8843_v5, 2 }
  0xbb   : >> { %v11607_v30 = vrot.slane %v8846_v6, 1  ;;  %v716_v35 = vsel %vm560_vm7, %v713_v19, %v715_v47  ;;  %v8864_v38 = vmul.f32 %v8760_v56, %v513_v49  ;;  %v8867_v41 = vmul.f32 %v8755_v53, %v513_v49  ;;  %v665_v24 = vpop.permute.xlu1 %664  ;;  %v660_v55 = vpop.permute.xlu0 %659 }
  0xbc   : >> { %v8870_v32 = vsel %vm560_vm7, %v712_v27, %v713_v19  ;;  %v732_v42 = vadd.f32 %v716_v35, %v683_v12  ;;  %v11609_v50 = vrot.slane %v8857_v31, 1  ;;  %v527_v51 = vmul.f32 %v8760_v56, %v508_v59 }
  0xbd   : >> { %v979_v45 = vsel %vm560_vm7, %v11607_v30, %v11606_v3  ;;  %v549_v49 = vmul.f32 %v8750_v52, %v508_v59  ;;  %v594_v54 = vmul.f32 %v8755_v53, %v508_v59  ;;  %v11608_v12 = vrot.slane %v8867_v41, 2 }
  0xbe   : >> { %v8882_v27 = vadd.f32 %v979_v45, %v950_v29  ;;  %v8886_v19 = vmul.f32 %v8772_v60, %v665_v24  ;;  %v8889_v35 = vmul.f32 %v8777_v61, %v665_v24  ;;  %v8892_v17 = vmul.f32 %v8787_v4, %v665_v24 }
  0xbf   : >> { %v566_v1 = vrot.slane %v549_v49, 1  ;;  %v611_v22 = vrot.slane %v594_v54, 2  ;;  %v8895_v9 = vmul.f32 %v8750_v52, %v665_v24  ;;  %v8899_v29 = vmul.f32 %v8760_v56, %v665_v24  ;;  %v795_v28 = vpop.permute.xlu0 %794 }
  0xc0   : >> { %v8902_v45 = vmul.f32 %v8755_v53, %v665_v24  ;;  %v701_v3 = vmul.f32 %v8772_v60, %v660_v55  ;;  %v679_v46 = vmul.f32 %v8787_v4, %v660_v55  ;;  %v8925_v34 = vmul.f32 %v8750_v52, %v660_v55 }
  0xc1   : >> { %v567_v49 = vsel %vm560_vm7, %v564_v7, %v566_v1  ;;  %v569_v54 = vsel %vm560_vm7, %v566_v1, %v11609_v50  ;;  %v612_v24 = vsel %vm605_vm8, %v609_v8, %v611_v22  ;;  %v614_v57 = vsel %vm605_vm8, %v611_v22, %v11608_v12  ;;  %v800_v7 = vpop.permute.xlu1 %799 }
  0xc2   : >> { %v582_v33 = vadd.f32 %v567_v49, %v8781_v63  ;;  %v583_v30 = vadd.f32 %v569_v54, %v527_v51  ;;  %v717_v59 = vrot.slane %v701_v3, 1  ;;  %v8922_v1 = vmul.f32 %v8777_v61, %v660_v55  ;;  %v8939_v3 = vld [vmem:[%s11702_s1 + $0x7] ss:$0 sm:$0xff]  ;;  %v8944_v49 = vld [vmem:[%s11702_s1 + $0x8] ss:$0 sm:$0xff] }
  0xc3   : >> { %v8934_v22 = vmul.f32 %v8755_v53, %v660_v55  ;;  %v11614_v54 = vrot.slane %v8925_v34, 1  ;;  %v11703_v51 = vrot.slane %v8886_v19, 1  ;;  %v827_v2 = vmul.f32 %v8930_v58, %v800_v7  ;;  %v805_v5 = vpop.permute.xlu0 %804 }
  0xc4   : >> { %v627_v63 = vadd.f32 %v612_v24, %v582_v33  ;;  %v628_v8 = vadd.f32 %v614_v57, %v583_v30  ;;  %v718_v33 = vsel %vm560_vm7, %v715_v47, %v717_v59  ;;  %v952_v30 = vmul.f32 %v8760_v56, %v660_v55 }
  0xc5   : >> { %v760_v24 = vsel %vm605_vm8, %v757_v37, %v11613_v62  ;;  %v720_v12 = vsel %vm560_vm7, %v717_v59, %v11703_v51  ;;  %v11704_v47 = vrot.slane %v8895_v9, 1  ;;  %v8967_v18 = vmul.f32 %v8939_v3, %v800_v7 }
  0xc6   : >> { %v685_v57 = vadd.f32 %v679_v46, %v628_v8  ;;  %v776_v36 = vadd.f32 %v760_v24, %v732_v42  ;;  %v8970_v46 = vmul.f32 %v8944_v49, %v800_v7  ;;  %v684_v59 = vadd.f32 %v8825_v43, %v627_v63  ;;  %v518_v24 = vpop.permute.xlu1 %517 }
  0xc7   : >> { %v983_v55 = vsel %vm560_vm7, %v11614_v54, %v11704_v47  ;;  %11705 = vst [vmem:[#allocation16_spill] sm:$0xff] %v8967_v18  ;;  %v8977_v51 = vmul.f32 %v8772_v60, %v800_v7  ;;  %v8984_v54 = vmul.f32 %v8787_v4, %v800_v7  ;;  %v8987_v50 = vmul.f32 %v8777_v61, %v800_v7 }
  0xc8   : >> { %11706 = vst [vmem:[#allocation17_spill] sm:$0xff] %v8970_v46  ;;  %v8973_v8 = vadd.f32 %v720_v12, %v685_v57  ;;  %v8979_v62 = vadd.f32 %v983_v55, %v952_v30  ;;  %v8981_v47 = vadd.f32 %v827_v2, %v776_v36  ;;  %v731_v63 = vadd.f32 %v8870_v32, %v8852_v26 }
  0xc9   : >> { %v826_v57 = vmul.f32 %v8930_v58, %v795_v28  ;;  %v11709_v2 = vrot.slane %v8793_v10, 2  ;;  %v9001_v7 = vmul.f32 %v8939_v3, %v795_v28  ;;  %v9004_v55 = vmul.f32 %v8944_v49, %v795_v28 }
  0xca   : >> { %11707 = vst [vmem:[#allocation18_spill] sm:$0xff] %v8979_v62  ;;  %11708 = vst [vmem:[#allocation19_spill] sm:$0xff] %v8981_v47  ;;  %v9008_v26 = vmul.f32 %v8787_v4, %v795_v28  ;;  %v9011_v32 = vmul.f32 %v8772_v60, %v795_v28  ;;  %v9014_v10 = vmul.f32 %v8777_v61, %v795_v28  ;;  %v670_v11 = vpop.permute.xlu1 %669  ;;  %v11713_v20 = vrot.slane %v8922_v1, 2 }
  0xcb   : >> { %v758_v36 = vsel %vm605_vm8, %v11709_v2, %v757_v37  ;;  %11710 = vst [vmem:[#allocation20_spill] sm:$0xff] %v9001_v7  ;;  %11711 = vst [vmem:[#allocation21_spill] sm:$0xff] %v9004_v55  ;;  %v529_v37 = vmul.f32 %v8760_v56, %v518_v24  ;;  %v551_v2 = vmul.f32 %v8750_v52, %v518_v24  ;;  %v11714_v28 = vrot.slane %v8819_v39, 2 }
  0xcc   : >> { %v775_v43 = vadd.f32 %v758_v36, %v731_v63  ;;  %v596_v42 = vmul.f32 %v8755_v53, %v518_v24  ;;  %v733_v12 = vadd.f32 %v718_v33, %v684_v59  ;;  %v828_v46 = vmul.f32 %v8930_v58, %v805_v5 }
  0xcd   : >> { %v570_v21 = vrot.slane %v551_v2, 1  ;;  %v762_v15 = vsel %vm605_vm8, %v11714_v28, %v11713_v20  ;;  %v9034_v36 = vmul.f32 %v8944_v49, %v805_v5  ;;  %v11717_v59 = vrot.slane %v8857_v31, 1  ;;  %v540_v31 = vpop.permute.xlu0 %539 }
  0xce   : >> { %v9019_v30 = vadd.f32 %v826_v57, %v775_v43  ;;  %v615_v16 = vrot.slane %v596_v42, 2  ;;  %v777_v43 = vadd.f32 %v762_v15, %v733_v12  ;;  %v9031_v57 = vmul.f32 %v8939_v3, %v805_v5 }
  0xcf   : >> { %11716 = vst [vmem:[#allocation24_spill] sm:$0xff] %v9034_v36  ;;  %v571_v42 = vsel %vm560_vm7, %v11717_v59, %v570_v21  ;;  %v9041_v39 = vmul.f32 %v8772_v60, %v805_v5  ;;  %v9044_v20 = vmul.f32 %v8777_v61, %v805_v5  ;;  %v11718_v12 = vrot.slane %v8867_v41, 2 }
  0xd0   : >> { %11712 = vst [vmem:[#allocation22_spill] sm:$0xff] %v9019_v30  ;;  %11715 = vst [vmem:[#allocation23_spill] sm:$0xff] %v9031_v57  ;;  %v584_v15 = vadd.f32 %v571_v42, %v8864_v38  ;;  %v9050_v28 = vadd.f32 %v828_v46, %v777_v43  ;;  %v9053_v63 = vmul.f32 %v8787_v4, %v805_v5  ;;  %v810_v5 = vpop.permute.xlu1 %809  ;;  %v11721_v57 = vrot.slane %v8922_v1, 2 }
  0xd1   : >> { %v616_v2 = vsel %vm605_vm8, %v11718_v12, %v615_v16  ;;  %v703_v24 = vmul.f32 %v8772_v60, %v670_v11  ;;  %v9059_v55 = vmul.f32 %v8777_v61, %v670_v11  ;;  %v9063_v42 = vmul.f32 %v8750_v52, %v670_v11 }
  0xd2   : >> { %11719 = vst [vmem:[#allocation25_spill] sm:$0xff] %v9050_v28  ;;  %v629_v38 = vadd.f32 %v616_v2, %v584_v15  ;;  %v9066_v46 = vmul.f32 %v8755_v53, %v670_v11  ;;  %v954_v33 = vmul.f32 %v8760_v56, %v670_v11  ;;  %v552_v59 = vmul.f32 %v8750_v52, %v540_v31 }
  0xd3   : >> { %v721_v12 = vrot.slane %v703_v24, 1  ;;  %v765_v15 = vrot.slane %v9059_v55, 2  ;;  %v681_v2 = vmul.f32 %v8787_v4, %v670_v11  ;;  %v597_v41 = vmul.f32 %v8755_v53, %v540_v31  ;;  %v692_v31 = vpop.permute.xlu0 %691 }
  0xd4   : >> { %v686_v28 = vadd.f32 %v8892_v17, %v629_v38  ;;  %v572_v30 = vrot.slane %v552_v59, 1  ;;  %v829_v43 = vmul.f32 %v8930_v58, %v810_v5  ;;  %v11720_v56 = vrot.slane %v8889_v35, 2 }
  0xd5   : >> { %v617_v24 = vrot.slane %v597_v41, 2  ;;  %v9084_v55 = vmul.f32 %v8939_v3, %v810_v5  ;;  %v9087_v11 = vmul.f32 %v8944_v49, %v810_v5  ;;  %v9092_v47 = vmul.f32 %v8772_v60, %v810_v5 }
  0xd6   : >> { %v764_v17 = vsel %vm605_vm8, %v11721_v57, %v11720_v56  ;;  %v573_v38 = vsel %vm560_vm7, %v570_v21, %v572_v30  ;;  %v9095_v41 = vmul.f32 %v8777_v61, %v810_v5  ;;  %v11722_v1 = vrot.slane %v8886_v19, 1 }
  0xd7   : >> { %v778_v59 = vadd.f32 %v764_v17, %v8973_v8  ;;  %v585_v56 = vadd.f32 %v573_v38, %v529_v37  ;;  %v618_v36 = vsel %vm605_vm8, %v615_v16, %v617_v24  ;;  %v9102_v7 = vmul.f32 %v8787_v4, %v810_v5 }
  0xd8   : >> { %v722_v57 = vsel %vm560_vm7, %v11722_v1, %v721_v12  ;;  %v704_v30 = vmul.f32 %v8772_v60, %v692_v31  ;;  %v748_v62 = vmul.f32 %v8777_v61, %v692_v31  ;;  %v967_v19 = vmul.f32 %v8750_v52, %v692_v31 }
  0xd9   : >> { %v9104_v18 = vadd.f32 %v829_v43, %v778_v59  ;;  %v630_v17 = vadd.f32 %v618_v36, %v585_v56  ;;  %v1006_v37 = vmul.f32 %v8755_v53, %v692_v31  ;;  %v1070_v16 = vrot.slane %v9092_v47, 1  ;;  %v1142_v43 = vpop.permute.xlu1 %1141 }
  0xda   : >> { %v723_v24 = vrot.slane %v704_v30, 1  ;;  %v11723_v38 = vrot.slane %v8846_v6, 1  ;;  %v11724_v59 = vrot.slane %v8796_v13, 1  ;;  %v767_v36 = vrot.slane %v748_v62, 2 }
  0xdb   : >> { %v687_v8 = vadd.f32 %v681_v2, %v630_v17  ;;  %v986_v56 = vrot.slane %v967_v19, 1  ;;  %v1025_v21 = vrot.slane %v1006_v37, 2  ;;  %v11725_v31 = vrot.slane %v8850_v23, 2  ;;  %v815_v2 = vpop.permute.xlu0 %814 }
  0xdc   : >> { %v977_v1 = vsel %vm560_vm7, %v11724_v59, %v11723_v38  ;;  %v724_v52 = vsel %vm560_vm7, %v721_v12, %v723_v24  ;;  %v11726_v5 = vrot.slane %v8799_v14, 2  ;;  %v11727_v6 = vrot.slane %v8977_v51, 1 }
  0xdd   : >> { %v994_v53 = vadd.f32 %v977_v1, %v8804_v25  ;;  %v11728_v13 = vrot.slane %v9011_v32, 1  ;;  %v736_v62 = vadd.f32 %v724_v52, %v687_v8  ;;  %v11729_v17 = vrot.slane %v9063_v42, 1 }
  0xde   : >> { %v1016_v30 = vsel %vm605_vm8, %v11726_v5, %v11725_v31  ;;  %v11730_v25 = vrot.slane %v8987_v50, 2  ;;  %v11731_v19 = vrot.slane %v9014_v10, 2  ;;  %v1169_v37 = vmul.f32 %v8930_v58, %v1142_v43 }
  0xdf   : >> { %v1067_v38 = vsel %vm560_vm7, %v11728_v13, %v11727_v6  ;;  %v987_v12 = vsel %vm560_vm7, %v11729_v17, %v986_v56  ;;  %v768_v5 = vsel %vm605_vm8, %v765_v15, %v767_v36  ;;  %v1033_v24 = vadd.f32 %v1016_v30, %v994_v53 }
  0xe0   : >> { %v1106_v14 = vsel %vm605_vm8, %v11731_v19, %v11730_v25  ;;  %v1186_v32 = vmul.f32 %v8939_v3, %v1142_v43  ;;  %v9143_v59 = vmul.f32 %v8944_v49, %v1142_v43  ;;  %v9145_v8 = vadd.f32 %v987_v12, %v954_v33  ;;  %v1152_v33 = vpop.permute.xlu1 %1151 }
  0xe1   : >> { %v11732_v1 = vrot.slane %v9066_v46, 2  ;;  %v735_v10 = vadd.f32 %v722_v57, %v686_v28  ;;  %v830_v52 = vmul.f32 %v8930_v58, %v815_v2  ;;  %v9153_v31 = vadd.f32 %v768_v5, %v736_v62 }
  0xe2   : >> { %v1045_v36 = vadd.f32 %v9008_v26, %v1033_v24  ;;  %v11733_v53 = vrot.slane %v8889_v35, 2  ;;  %v9160_v43 = vmul.f32 %v8939_v3, %v815_v2  ;;  %v1200_v6 = vrot.slane %v1186_v32, 1 }
  0xe3   : >> { %v9150_v56 = vsel %vm605_vm8, %v11732_v1, %v1025_v21  ;;  %v9163_v21 = vmul.f32 %v8944_v49, %v815_v2  ;;  %v9166_v28 = vmul.f32 %v8772_v60, %v815_v2  ;;  %v1239_v62 = vrot.slane %v9143_v59, 2 }
  0xe4   : >> { %v766_v30 = vsel %vm605_vm8, %v11733_v53, %v765_v15  ;;  %v1084_v57 = vadd.f32 %v1067_v38, %v1045_v36  ;;  %v9170_v26 = vmul.f32 %v8777_v61, %v815_v2  ;;  %v11734_v35 = vrot.slane %v8925_v34, 1 }
  0xe5   : >> { %v779_v13 = vadd.f32 %v766_v30, %v735_v10  ;;  %v11735_v15 = vrot.slane %v8822_v40, 1  ;;  %v869_v25 = vrot.slane %v9160_v43, 1  ;;  %v9181_v19 = vmul.f32 %v8787_v4, %v815_v2 }
  0xe6   : >> { %v1123_v5 = vadd.f32 %v1106_v14, %v1084_v57  ;;  %v1072_v32 = vrot.slane %v9166_v28, 1  ;;  %v11736_v34 = vrot.slane %v8934_v22, 2  ;;  %v11737_v40 = vrot.slane %v8836_v48, 2 }
  0xe7   : >> { %v981_v17 = vsel %vm560_vm7, %v11735_v15, %v11734_v35  ;;  %v9177_v12 = vadd.f32 %v830_v52, %v779_v13  ;;  %v1111_v1 = vrot.slane %v9170_v26, 2  ;;  %v11738_v2 = vrot.slane %v9041_v39, 1  ;;  %v1147_v52 = vpop.permute.xlu0 %1146 }
  0xe8   : >> { %v996_v38 = vadd.f32 %v981_v17, %v8828_v44  ;;  %v1020_v59 = vsel %vm605_vm8, %v11737_v40, %v11736_v34  ;;  %v9198_v14 = vmul.f32 %v8939_v3, %v1152_v33  ;;  %v11739_v36 = vrot.slane %v9095_v41, 2 }
  0xe9   : >> { %v1071_v44 = vsel %vm560_vm7, %v11738_v2, %v1070_v16  ;;  %v11740_v53 = vrot.slane %v9044_v20, 2  ;;  %v1171_v13 = vmul.f32 %v8930_v58, %v1152_v33  ;;  %v9207_v57 = vmul.f32 %v8944_v49, %v1152_v33 }
  0xea   : >> { %v1035_v10 = vadd.f32 %v1020_v59, %v996_v38  ;;  %v11741_v35 = vmov %v11737_v40  ;;  %v11742_v15 = vrot.slane %v8850_v23, 2  ;;  %v842_v38 = vpop.permute.xlu1 %841  ;;  %v1175_v34 = vadd.f32 %v1169_v37, %v1123_v5 }
  0xeb   : >> { %v1110_v30 = vsel %vm605_vm8, %v11740_v53, %v11739_v36  ;;  %v11743_v36 = vrot.slane %v8977_v51, 1  ;;  %v1203_v33 = vrot.slane %v9198_v14, 1  ;;  %v1242_v48 = vrot.slane %v9207_v57, 2 }
  0xec   : >> { %v1018_v17 = vsel %vm605_vm8, %v11742_v15, %v11741_v35  ;;  %v1047_v40 = vadd.f32 %v9053_v63, %v1035_v10  ;;  %v1187_v23 = vmul.f32 %v8939_v3, %v1147_v52  ;;  %v1226_v35 = vmul.f32 %v8944_v49, %v1147_v52 }
  0xed   : >> { %v1034_v59 = vadd.f32 %v1018_v17, %v8882_v27  ;;  %v1069_v53 = vsel %vm560_vm7, %v11743_v36, %v11738_v2  ;;  %v9227_v63 = vmul.f32 %v8939_v3, %v842_v38  ;;  %v9230_v27 = vmul.f32 %v8944_v49, %v842_v38 }
  0xee   : >> { %v1086_v15 = vadd.f32 %v1071_v44, %v1047_v40  ;;  %v11744_v51 = vrot.slane %v9044_v20, 2  ;;  %v11745_v39 = vrot.slane %v8987_v50, 2  ;;  %v1170_v10 = vmul.f32 %v8930_v58, %v1147_v52 }
  0xef   : >> { %v1046_v37 = vadd.f32 %v8984_v54, %v1034_v59  ;;  %v1201_v17 = vrot.slane %v1187_v23, 1  ;;  %v1240_v2 = vrot.slane %v1226_v35, 2  ;;  %v9239_v54 = vmul.f32 %v8772_v60, %v842_v38  ;;  %v820_v59 = vpop.permute.xlu0 %819 }
  0xf0   : >> { %v1108_v5 = vsel %vm605_vm8, %v11745_v39, %v11744_v51  ;;  %v1125_v36 = vadd.f32 %v1110_v30, %v1086_v15  ;;  %v9242_v40 = vmul.f32 %v8777_v61, %v842_v38  ;;  %v873_v20 = vrot.slane %v9227_v63, 1  ;;  %v1162_v51 = vpop.permute.xlu1 %1161 }
  0xf1   : >> { %v1085_v44 = vadd.f32 %v1069_v53, %v1046_v37  ;;  %v1202_v24 = vsel %vm560_vm7, %v1200_v6, %v1201_v17  ;;  %v1204_v50 = vsel %vm560_vm7, %v1201_v17, %v1203_v33  ;;  %v917_v52 = vrot.slane %v9230_v27, 2 }
  0xf2   : >> { %v1219_v30 = vadd.f32 %v1202_v24, %v1175_v34  ;;  %v1241_v53 = vsel %vm605_vm8, %v1239_v62, %v1240_v2  ;;  %v1243_v38 = vsel %vm605_vm8, %v1240_v2, %v1242_v48  ;;  %v1177_v35 = vadd.f32 %v1171_v13, %v1125_v36 }
  0xf3   : >> { %v1124_v23 = vadd.f32 %v1108_v5, %v1085_v44  ;;  %v831_v15 = vmul.f32 %v8930_v58, %v820_v59  ;;  %v9256_v6 = vmul.f32 %v8939_v3, %v820_v59  ;;  %v9259_v37 = vmul.f32 %v8944_v49, %v820_v59 }
  0xf4   : >> { %v1258_v17 = vadd.f32 %v1241_v53, %v1219_v30  ;;  %v1056_v24 = vmul.f32 %v8772_v60, %v820_v59  ;;  %v9263_v62 = vmul.f32 %v8777_v61, %v820_v59  ;;  %v1076_v34 = vrot.slane %v9239_v54, 1 }
  0xf5   : >> { %v1176_v39 = vadd.f32 %v1170_v10, %v1124_v23  ;;  %v1115_v13 = vrot.slane %v9242_v40, 2  ;;  %v9268_v5 = vadd.f32 %v831_v15, %v9153_v31  ;;  %v11746_v2 = vrot.slane %v9063_v42, 1 }
  0xf6   : >> { %v11747_v36 = vrot.slane %v8895_v9, 1  ;;  %v9276_v23 = vadd.f32 %v8670_v0, %v1258_v17  ;;  %v1074_v60 = vrot.slane %v1056_v24, 1  ;;  %v1113_v61 = vrot.slane %v9263_v62, 2  ;;  %v1157_v24 = vpop.permute.xlu0 %1156 }
  0xf7   : >> { %v1220_v10 = vadd.f32 %v1204_v50, %v1176_v39  ;;  %v871_v54 = vrot.slane %v9256_v6, 1  ;;  %v915_v30 = vrot.slane %v9259_v37, 2  ;;  %v9283_v53 = vmul.f32 %v8939_v3, %v1162_v51 }
  0xf8   : >> { %v985_v44 = vsel %vm560_vm7, %v11747_v36, %v11746_v2  ;;  %v1270_v9 = vmax.f32 %v9276_v23, 0.0  ;;  %v11748_v50 = vrot.slane %v9066_v46, 2  ;;  %v11749_v15 = vrot.slane %v8902_v45, 2 }
  0xf9   : >> { %v998_v31 = vadd.f32 %v985_v44, %v8899_v29  ;;  %v1259_v42 = vadd.f32 %v1243_v38, %v1220_v10  ;;  %v1173_v17 = vmul.f32 %v8930_v58, %v1162_v51  ;;  %v1075_v29 = vsel %vm560_vm7, %v1072_v32, %v1074_v60  ;;  %v1184_v44 = vpop.permute.xlu1 %1183 }
  0xfa   : >> { %v1024_v39 = vsel %vm605_vm8, %v11749_v15, %v11748_v50  ;;  %v1229_v2 = vmul.f32 %v8944_v49, %v1162_v51  ;;  %v11750_v38 = vmov %v11749_v15  ;;  %v11751_v36 = vrot.slane %v8934_v22, 2  ;;  %v11752_v15 = vld [vmem:[#allocation18_spill] sm:$0xff] }
  0xfb   : >> { %v1037_v62 = vadd.f32 %v1024_v39, %v998_v31  ;;  %v9302_v10 = vadd.f32 %v8670_v0, %v1259_v42  ;;  %v1114_v31 = vsel %vm605_vm8, %v1111_v1, %v1113_v61  ;;  %v1207_v50 = vrot.slane %v9283_v53, 1 }
  0xfc   : >> { %v1022_v46 = vsel %vm605_vm8, %v11751_v36, %v11750_v38  ;;  %v1073_v45 = vsel %vm560_vm7, %v1070_v16, %v1072_v32  ;;  %v11753_v22 = vrot.slane %v9095_v41, 2  ;;  %v1189_v38 = vmul.f32 %v8939_v3, %v1157_v24 }
  0xfd   : >> { %v1036_v39 = vadd.f32 %v1022_v46, %v11752_v15  ;;  %v1049_v51 = vadd.f32 %v9181_v19, %v1037_v62  ;;  %v1246_v36 = vrot.slane %v1229_v2, 2  ;;  %v1228_v46 = vmul.f32 %v8944_v49, %v1157_v24 }
  0xfe   : >> { %v1112_v42 = vsel %vm605_vm8, %v11753_v22, %v1111_v1  ;;  %v1192_v19 = vmul.f32 %v8939_v3, %v1184_v44  ;;  %v1172_v47 = vmul.f32 %v8930_v58, %v1157_v24  ;;  %v1205_v62 = vrot.slane %v1189_v38, 1 }
  0xff   : >> { %v1048_v53 = vadd.f32 %v9102_v7, %v1036_v39  ;;  %v1088_v28 = vadd.f32 %v1075_v29, %v1049_v51  ;;  %v1231_v16 = vmul.f32 %v8944_v49, %v1184_v44  ;;  %v1271_v26 = vmax.f32 %v9302_v10, 0.0  ;;  %v1167_v39 = vpop.permute.xlu0 %1166 }
 0x100   : >> { %v1244_v32 = vrot.slane %v1228_v46, 2  ;;  %v1044_v1 = vmul.f32 %v8787_v4, %v820_v59  ;;  %v1206_v7 = vsel %vm560_vm7, %v1203_v33, %v1205_v62  ;;  %v1211_v2 = vrot.slane %v1192_v19, 1  ;;  %v11756_v46 = vld [vmem:[#allocation20_spill] sm:$0xff]  ;;  %v11758_v19 = vld [vmem:[#allocation23_spill] sm:$0xff] }
 0x101   : >> { %v1087_v41 = vadd.f32 %v1073_v45, %v1048_v53  ;;  %v1127_v15 = vadd.f32 %v1114_v31, %v1088_v28  ;;  %v1038_v29 = vadd.f32 %v9150_v56, %v9145_v8  ;;  %v1208_v51 = vsel %vm560_vm7, %v1205_v62, %v1207_v50 }
 0x102   : >> { %v1221_v44 = vadd.f32 %v1206_v7, %v1177_v35  ;;  %v1250_v22 = vrot.slane %v1231_v16, 2  ;;  %v1245_v45 = vsel %vm605_vm8, %v1242_v48, %v1244_v32  ;;  %v1247_v4 = vsel %vm605_vm8, %v1244_v32, %v1246_v36  ;;  %v11754_v35 = vld [vmem:[#allocation16_spill] sm:$0xff] }
 0x103   : >> { %v1126_v24 = vadd.f32 %v1112_v42, %v1087_v41  ;;  %v1050_v59 = vadd.f32 %v1044_v1, %v1038_v29  ;;  %v1077_v14 = vsel %vm560_vm7, %v1074_v60, %v1076_v34  ;;  %v1174_v38 = vmul.f32 %v8930_v58, %v1167_v39  ;;  %v11762_v1 = vld [vmem:[#allocation19_spill] sm:$0xff] }
 0x104   : >> { %v1260_v31 = vadd.f32 %v1245_v45, %v1221_v44  ;;  %v1191_v8 = vmul.f32 %v8939_v3, %v1167_v39  ;;  %v1230_v42 = vmul.f32 %v8944_v49, %v1167_v39  ;;  %v11755_v53 = vrot.slane %v11754_v35, 1 }
 0x105   : >> { %v1178_v33 = vadd.f32 %v1172_v47, %v1126_v24  ;;  %v1089_v56 = vadd.f32 %v1077_v14, %v1050_v59  ;;  %v11757_v57 = vrot.slane %v11756_v46, 1  ;;  %v11759_v28 = vrot.slane %v11758_v19, 1  ;;  %v11761_v47 = vld [vmem:[#allocation22_spill] sm:$0xff]  ;;  %v11765_v59 = vld [vmem:[#allocation21_spill] sm:$0xff] }
 0x106   : >> { %v11760_v62 = vmov %v11755_v53  ;;  %v1116_v58 = vsel %vm605_vm8, %v1113_v61, %v1115_v13  ;;  %v1209_v3 = vrot.slane %v1191_v8, 1  ;;  %v1179_v16 = vadd.f32 %v1173_v17, %v1127_v15  ;;  %v11763_v13 = vld [vmem:[#allocation17_spill] sm:$0xff] }
 0x107   : >> { %v864_v48 = vsel %vm560_vm7, %v11757_v57, %v11755_v53  ;;  %v866_v34 = vsel %vm560_vm7, %v11760_v62, %v11759_v28  ;;  %v1222_v60 = vadd.f32 %v1208_v51, %v1178_v33  ;;  %v1128_v41 = vadd.f32 %v1116_v58, %v1089_v56  ;;  %v11767_v33 = vld [vmem:[#allocation24_spill] sm:$0xff] }
 0x108   : >> { %v881_v49 = vadd.f32 %v864_v48, %v11761_v47  ;;  %v1248_v32 = vrot.slane %v1230_v42, 2  ;;  %v882_v7 = vadd.f32 %v866_v34, %v11762_v1  ;;  %v1266_v39 = vadd.f32 %v8670_v0, %v1260_v31 }
 0x109   : >> { %v1261_v29 = vadd.f32 %v1247_v4, %v1222_v60  ;;  %v1210_v24 = vsel %vm560_vm7, %v1207_v50, %v1209_v3  ;;  %v1212_v44 = vsel %vm560_vm7, %v1209_v3, %v1211_v2  ;;  %v1180_v51 = vadd.f32 %v1174_v38, %v1128_v41 }
 0x10a   : >> { %v1223_v45 = vadd.f32 %v1210_v24, %v1179_v16  ;;  %v1249_v40 = vsel %vm605_vm8, %v1246_v36, %v1248_v32  ;;  %v11764_v61 = vrot.slane %v11763_v13, 2  ;;  %v11766_v14 = vrot.slane %v11765_v59, 2 }
 0x10b   : >> { %v1267_v15 = vadd.f32 %v8670_v0, %v1261_v29  ;;  %v11768_v4 = vrot.slane %v11767_v33, 2  ;;  %v11770_v2 = vrot.slane %v9084_v55, 1  ;;  %v11771_v38 = vmov %v11759_v28  ;;  %v11773_v28 = vld [vmem:[#allocation25_spill] sm:$0xff] }
 0x10c   : >> { %v908_v17 = vsel %vm605_vm8, %v11766_v14, %v11764_v61  ;;  %v11769_v31 = vmov %v11764_v61  ;;  %v1224_v56 = vadd.f32 %v1212_v44, %v1180_v51  ;;  %v1262_v42 = vadd.f32 %v1249_v40, %v1223_v45 }
 0x10d   : >> { %v910_v50 = vsel %vm605_vm8, %v11769_v31, %v11768_v4  ;;  %v925_v8 = vadd.f32 %v908_v17, %v881_v49  ;;  %v868_v36 = vsel %vm560_vm7, %v11771_v38, %v11770_v2  ;;  %v11772_v53 = vmov %v11770_v2 }
 0x10e   : >> { %v926_v35 = vadd.f32 %v910_v50, %v882_v7  ;;  %v870_v46 = vsel %vm560_vm7, %v11772_v53, %v869_v25  ;;  %v1251_v57 = vsel %vm605_vm8, %v1248_v32, %v1250_v22  ;;  %v883_v62 = vadd.f32 %v868_v36, %v11773_v28 }
 0x10f   : >> { %v937_v48 = vadd.f32 %v8670_v0, %v925_v8  ;;  %v884_v34 = vadd.f32 %v870_v46, %v9104_v18  ;;  %v1272_v19 = vmax.f32 %v1266_v39, 0.0  ;;  %v1263_v60 = vadd.f32 %v1251_v57, %v1224_v56 }
 0x110   : >> { %v938_v58 = vadd.f32 %v8670_v0, %v926_v35  ;;  %v11774_v3 = vrot.slane %v9087_v11, 2  ;;  %v11775_v47 = vmov %v11768_v4  ;;  %v11776_v16 = vrot.slane %v9163_v21, 2  ;;  %v11781_v4 = vld [vmem:[#allocation14_spill] sm:$0xff] }
 0x111   : >> { %v943_v49 = vmax.f32 %v937_v48, 0.0  ;;  %v872_v18 = vsel %vm560_vm7, %v869_v25, %v871_v54  ;;  %v1273_v1 = vmax.f32 %v1267_v15, 0.0  ;;  %v1268_v7 = vadd.f32 %v8670_v0, %v1262_v42  ;;  %v11779_v15 = vld [vmem:[#allocation11_spill] sm:$0xff]  ;;  %v9447_v48 = vld [vmem:[%s11594_s4] ss:$0 sm:$0xff] (%p475_p11) }
 0x112   : >> { %v912_v55 = vsel %vm605_vm8, %v11775_v47, %v11774_v3  ;;  %v11777_v22 = vmov %v11774_v3  ;;  %v944_v29 = vmax.f32 %v938_v58, 0.0  ;;  %v874_v11 = vsel %vm560_vm7, %v871_v54, %v873_v20 }
 0x113   : >> { %v914_v41 = vsel %vm605_vm8, %v11777_v22, %v11776_v16  ;;  %v927_v32 = vadd.f32 %v912_v55, %v883_v62  ;;  %v1276_v24 = vmax.f32 %v943_v49, %v1270_v9  ;;  %v885_v43 = vadd.f32 %v872_v18, %v9177_v12 }
 0x114   : >> { %v928_v39 = vadd.f32 %v914_v41, %v884_v34  ;;  %v1269_v25 = vadd.f32 %v8670_v0, %v1263_v60  ;;  %v1277_v51 = vmax.f32 %v944_v29, %v1271_v26  ;;  %v886_v23 = vadd.f32 %v874_v11, %v9268_v5 }
 0x115   : >> { %v939_v44 = vadd.f32 %v8670_v0, %v927_v32  ;;  %v11778_v63 = vmov %v11776_v16  ;;  %v918_v12 = vsel %vm605_vm8, %v915_v30, %v917_v52  ;;  %v1274_v40 = vmax.f32 %v1268_v7, 0.0 }
 0x116   : >> { %v940_v45 = vadd.f32 %v8670_v0, %v928_v39  ;;  %v916_v6 = vsel %vm605_vm8, %v11778_v63, %v915_v30  ;;  %v1282_v20 = vpack.c.bf16 %v1277_v51, %v1276_v24  ;;  %v930_v26 = vadd.f32 %v918_v12, %v886_v23 }
 0x117   : >> { %v945_v9 = vmax.f32 %v939_v44, 0.0  ;;  %v929_v10 = vadd.f32 %v916_v6, %v885_v43  ;;  %v1275_v5 = vmax.f32 %v1269_v25, 0.0  ;;  %v11780_v33 = vpack.c.bf16 %v11779_v15, %v11779_v15 }
 0x118   : >> { %v946_v54 = vmax.f32 %v940_v45, 0.0  ;;  %7527 = vmatprep.subr.bf16.mxu0 %v1282_v20  ;;  %7537 = vmatprep.subr.bf16.mxu1 %v1282_v20  ;;  %v942_v59 = vadd.f32 %v8670_v0, %v930_v26  ;;  %v11782_v31 = vpack.c.bf16 %v11781_v4, %v11781_v4 }
 0x119   : >> { %v1278_v13 = vmax.f32 %v945_v9, %v1272_v19  ;;  %v941_v21 = vadd.f32 %v8670_v0, %v929_v10  ;;  %7528 = vmatpush3.bf16.msra.mxu0 %v1282_v20  ;;  %7538 = vmatpush3.bf16.msra.mxu1 %v1282_v20 }
 0x11a   : >> { %v1279_v61 = vmax.f32 %v946_v54, %v1273_v1  ;;  %v948_v52 = vmax.f32 %v942_v59, 0.0 }
 0x11b   : >> { %v947_v37 = vmax.f32 %v941_v21, 0.0 }
 0x11c   : >> { %v1283_v27 = vpack.c.bf16 %v1279_v61, %v1278_v13  ;;  %v1281_v14 = vmax.f32 %v948_v52, %v1275_v5 }
 0x11d   : >> { %v1280_v30 = vmax.f32 %v947_v37, %v1274_v40 }
 0x11e   : >> { %7529 = vmatprep.subr.bf16.mxu0 %v1283_v27  ;;  %7539 = vmatprep.subr.bf16.mxu1 %v1283_v27 }
 0x11f   : >> { %7530 = vmatpush3.bf16.msra.mxu0 %v1283_v27  ;;  %7540 = vmatpush3.bf16.msra.mxu1 %v1283_v27  ;;  %v1284_v17 = vpack.c.bf16 %v1281_v14, %v1280_v30 }
 0x121   : >> { %7531 = vmatprep.subr.bf16.mxu0 %v1284_v17  ;;  %7541 = vmatprep.subr.bf16.mxu1 %v1284_v17 }
 0x123   : >> { %7532 = vmatpush3.bf16.msra.mxu0 %v1284_v17  ;;  %7542 = vmatpush3.bf16.msra.mxu1 %v1284_v17 }
 0x126   : >> { %7534 = vmatmul.mubr.msk.bf16.vlgmr.msra.gmra.mrb[0].mxu0 %vm1285_vm6, %v11780_v33  ;;  %7544 = vmatmul.mubr.msk.bf16.vlgmr.msra.gmra.mrb[0].mxu1 %vm1285_vm6, %v11782_v31 }
 0x1f9   : >> { %v7535_v50 = vpop.f32.mrb[0].mxu0  ;;  %v7545_v8 = vpop.f32.mrb[0].mxu1  ;;  %477 = sbr.rel (!%p475_p11) target bundleno = 40 (0x28), region = 146 }
 0x1fa   : >> { %v1396_v2 = vmax.f32 %v7535_v50, %v7545_v8  ;;  %v1326_v38 = vpop.f32.mrb[1].mxu0  ;;  %v1380_v36 = vpop.f32.mrb[1].mxu1 }
 0x1fb   : >> { %v1394_v56 = vmax.f32 %v1326_v38, %v1380_v36  ;;  %v7536_v42 = vpop.f32.mrb[2].mxu0  ;;  %v7546_v35 = vpop.f32.mrb[2].mxu1 }
 0x1fc   : >> { %1402 = vst.msk [vmem:[%s1398_s15 + $0x10] sm:$0xff] %vm1399_vm9, %v1396_v2  ;;  %v1329_v53 = vpop.f32.mrb[3].mxu0  ;;  %v1383_v46 = vpop.f32.mrb[3].mxu1 }
 0x1fd   : >> { %1400 = vst.msk [vmem:[%s1398_s15] sm:$0xff] %vm1399_vm9, %v1394_v56  ;;  %v1395_v57 = vmax.f32 %v1329_v53, %v1383_v46 }
 0x1ff   : >> { %1401 = vst.msk [vmem:[%s1398_s15 + $0x8] sm:$0xff] %vm1399_vm9, %v1395_v57 }
 0x200 LB: >> { %v9457_v28 = vld [vmem:[%s11593_s3] sm:$0xff]   ;;  %v9462_v0 = vld [vmem:[%s11593_s3 + $0x10] sm:$0xff]   ;;  %v9468_v62 = vld [vmem:[%s11593_s3 + $0x8] sm:$0xff]   ;;  %s6904_s23 = smul.u32 48, %s8531_s0  ;;  %vm1426_vm10 = vsmask.f32 7424  ;;  %s8531_s0 = sphi %s9449_s0, %s1409_s0  }
 0x201   : >> { %7555 = vmatprep.subr.bf16.mxu1 %v9457_v28  ;;  %7547 = vmatprep.subr.bf16.mxu0 %v9462_v0  ;;  %v9476_v34 = vld [vmem:[%s11593_s3 + $0x18] sm:$0xff]   ;;  %v9483_v19 = vld [vmem:[%s11593_s3 + $0x30] sm:$0xff]   ;;  %v9497_v49 = vld [vmem:[%s11593_s3 + $0x20] sm:$0xff]   ;;  %vm8540_vm11 = vmmov 0   ;;  %vm2666_vm12 = vcmask 1042432   ;;  %vm2662_vm13 = vcmask 179200  }
 0x202   : >> { %7556 = vmatpush3.bf16.msra.mxu1 %v9457_v28  ;;  %7548 = vmatpush3.bf16.msra.mxu0 %v9462_v0  ;;  %s9486_s16 = scalar_lea.vmem [#allocation2], %s6904_s23  ;;  %v9506_v18 = vld [vmem:[%s11593_s3 + $0x38] sm:$0xff]   ;;  %v9525_v23 = vld [vmem:[%s11593_s3 + $0x50] sm:$0xff]   ;;  %v9535_v12 = vld [vmem:[%s11593_s3 + $0x28] sm:$0xff]   ;;  %vm2759_vm14 = vcmask 523264   ;;  %vm2761_vm15 = vcmask 518144  }
 0x203   : >> { %7557 = vmatprep.subr.bf16.mxu1 %v9468_v62  ;;  %7549 = vmatprep.subr.bf16.mxu0 %v9476_v34  ;;  %v9550_v40 = vld [vmem:[%s11593_s3 + $0x58] sm:$0xff]   ;;  %v9564_v61 = vld [vmem:[%s11593_s3 + $0x40] sm:$0xff]   ;;  %v9572_v27 = vld [vmem:[%s11593_s3 + $0x70] sm:$0xff]  }
 0x204   : >> { %v9587_v15 = vld [vmem:[%s11593_s3 + $0x48] sm:$0xff]   ;;  %v9600_v2 = vld [vmem:[%s11593_s3 + $0x78] sm:$0xff]   ;;  %v9610_v56 = vld [vmem:[%s11593_s3 + $0x60] sm:$0xff]  }
 0x205   : >> { %v9622_v57 = vld [vmem:[%s11593_s3 + $0x68] sm:$0xff]  }
 0x206   : >> { %v1413_v60 = vld [vmem:[%s9486_s16] sm:$0xff]  ;;  %v1414_v58 = vld [vmem:[%s9486_s16 + $0x8] sm:$0xff]  ;;  %v1415_v3 = vld [vmem:[%s9486_s16 + $0x10] sm:$0xff]  ;;  %7558 = vmatpush3.bf16.msra.mxu1 %v9468_v62  ;;  %7550 = vmatpush3.bf16.msra.mxu0 %v9476_v34 }
 0x207   : >> { %v1420_v47 = vpack.c.bf16 %v1414_v58, %v1413_v60  ;;  %v9491_v55 = vpack.c.bf16 %v1415_v3, %v1415_v3  ;;  %7571 = vmatprep.subr.bf16.mxu1 %v9483_v19  ;;  %7563 = vmatprep.subr.bf16.mxu0 %v9497_v49  ;;  %v6919_v1 = vld [vmem:[%s9486_s16 + $0x18] sm:$0xff]  ;;  %v6920_v24 = vld [vmem:[%s9486_s16 + $0x20] sm:$0xff]  ;;  %v6921_v11 = vld [vmem:[%s9486_s16 + $0x28] sm:$0xff] }
 0x208   : >> { %v9517_v43 = vpack.c.bf16 %v6920_v24, %v6919_v1  ;;  %v9520_v45 = vpack.c.bf16 %v6921_v11, %v6921_v11  ;;  %v6936_v37 = vld [vmem:[%s9486_s16 + $0x30] sm:$0xff]  ;;  %v6937_v52 = vld [vmem:[%s9486_s16 + $0x38] sm:$0xff]  ;;  %v6938_v30 = vld [vmem:[%s9486_s16 + $0x40] sm:$0xff] }
 0x209   : >> { %7559 = vmatprep.mubr.msk.bf16.mxu1 %vm1399_vm9, %v1420_v47  ;;  %v1428_v16 = vshrl.u32 %v1420_v47, 16  ;;  %v1430_v22 = vshll.u32 %v1420_v47, 16  ;;  %v1435_v41 = vshll.u32 %v9491_v55, 16  ;;  %v1439_v32 = vshrl.u32 %v9491_v55, 16  ;;  %v9635_v58 = vld [vmem:[%s11593_s3 + $0x80] sm:$0xff]  }
 0x20a   : >> { %v1580_v7 = vrot.slane %v1420_v47, 1  ;;  %7560 = vmatmul.mubr.msk.bf16.vlgmr.msra.gmra.mrb[0].mxu1 %vm1399_vm9, %v9491_v55  ;;  %v1581_v44 = vrot.slane %v9491_v55, 1  ;;  %v1825_v63 = vrot.slane %v9517_v43, 1  ;;  %v9538_v20 = vrot.slane %v9520_v45, 1  ;;  %v9649_v55 = vld [vmem:[%s11593_s3 + $0x88] sm:$0xff]  }
 0x20b   : >> { %v1432_v29 = vrot.slane %v1430_v22, 1  ;;  %v1437_v39 = vrot.slane %v1435_v41, 1  ;;  %7572 = vmatpush3.bf16.msra.mxu1 %v9483_v19  ;;  %7575 = vmatprep.mubr.msk.bf16.mxu1 %vm1399_vm9, %v9517_v43  ;;  %v1737_v54 = vshrl.u32 %v9517_v43, 16  ;;  %v1739_v10 = vshll.u32 %v9517_v43, 16 }
 0x20c   : >> { %7573 = vmatprep.subr.bf16.mxu1 %v9506_v18  ;;  %v1582_v9 = vsel %vm560_vm7, %v1580_v7, %v1581_v44  ;;  %v1743_v26 = vshll.u32 %v9520_v45, 16  ;;  %v9554_v13 = vsel %vm560_vm7, %v1825_v63, %v9538_v20  ;;  %v9578_v14 = vpack.c.bf16 %v6937_v52, %v6936_v37 }
 0x20d   : >> { %v1433_v25 = vor.u32 %v1432_v29, %v1428_v16  ;;  %v1441_v51 = vor.u32 %v1439_v32, %v1437_v39  ;;  %v1741_v5 = vrot.slane %v1739_v10, 1  ;;  %v9581_v17 = vpack.c.bf16 %v6938_v30, %v6938_v30 }
 0x20e   : >> { %v1745_v59 = vrot.slane %v1743_v26, 1  ;;  %v1982_v4 = vshrl.u32 %v9578_v14, 16  ;;  %v1984_v31 = vshll.u32 %v9578_v14, 16  ;;  %v1747_v8 = vshrl.u32 %v9520_v45, 16 }
 0x20f   : >> { %v1438_v6 = vsel %vm1426_vm10, %v1433_v25, %v1437_v39  ;;  %7574 = vmatpush3.bf16.msra.mxu1 %v9506_v18  ;;  %v1742_v21 = vor.u32 %v1741_v5, %v1737_v54  ;;  %v1988_v50 = vshll.u32 %v9581_v17, 16  ;;  %v1992_v35 = vshrl.u32 %v9581_v17, 16 }
 0x210   : >> { %7551 = vmatprep.mubr.msk.bf16.mxu0 %vm1399_vm9, %v1438_v6  ;;  %7587 = vmatprep.subr.bf16.mxu1 %v9525_v23  ;;  %v1986_v38 = vrot.slane %v1984_v31, 1  ;;  %v1749_v53 = vor.u32 %v1747_v8, %v1745_v59  ;;  %v2070_v3 = vrot.slane %v9578_v14, 1  ;;  %v9639_v47 = vrot.slane %v9581_v17, 1 }
 0x211   : >> { %7552 = vmatmul.mubr.msk.bf16.vlgmr.msra.gmra.mrb[0].mxu0 %vm1399_vm9, %v1441_v51  ;;  %v1746_v33 = vsel %vm1426_vm10, %v1742_v21, %v1745_v59  ;;  %v1990_v36 = vrot.slane %v1988_v50, 1 }
 0x212   : >> { %7564 = vmatpush3.bf16.msra.mxu0 %v9497_v49  ;;  %7567 = vmatprep.mubr.msk.bf16.mxu0 %vm1399_vm9, %v1582_v9  ;;  %v1987_v42 = vor.u32 %v1986_v38, %v1982_v4  ;;  %v2072_v16 = vsel %vm560_vm7, %v2070_v3, %v9639_v47 }
 0x213   : >> { %7565 = vmatprep.subr.bf16.mxu0 %v9535_v12  ;;  %7576 = vmatmul.mubr.msk.bf16.vlgmr.msra.gmra.mrb[4].mxu1 %vm1399_vm9, %v9520_v45  ;;  %v1994_v60 = vor.u32 %v1992_v35, %v1990_v36 }
 0x214   : >> { %7588 = vmatpush3.bf16.msra.mxu1 %v9525_v23  ;;  %7591 = vmatprep.mubr.msk.bf16.mxu1 %vm1399_vm9, %v9554_v13  ;;  %v1991_v46 = vsel %vm1426_vm10, %v1987_v42, %v1990_v36 }
 0x215   : >> { %7589 = vmatprep.subr.bf16.mxu1 %v9550_v40 }
 0x216   : >> { %7566 = vmatpush3.bf16.msra.mxu0 %v9535_v12 }
 0x217   : >> { %7579 = vmatprep.subr.bf16.mxu0 %v9564_v61 }
 0x218   : >> { %7590 = vmatpush3.bf16.msra.mxu1 %v9550_v40 }
 0x219   : >> { %7568 = vmatmul.mubr.msk.bf16.vlgmr.msra.gmra.mrb[4].mxu0 %vm1399_vm9, %v1581_v44  ;;  %7603 = vmatprep.subr.bf16.mxu1 %v9572_v27 }
 0x21a   : >> { %7580 = vmatpush3.bf16.msra.mxu0 %v9564_v61  ;;  %7583 = vmatprep.mubr.msk.bf16.mxu0 %vm1399_vm9, %v1746_v33 }
 0x21b   : >> { %7581 = vmatprep.subr.bf16.mxu0 %v9587_v15  ;;  %7592 = vmatmul.mubr.msk.bf16.vlgmr.msra.gmra.mrb[8].mxu1 %vm1399_vm9, %v9538_v20 }
 0x21c   : >> { %7604 = vmatpush3.bf16.msra.mxu1 %v9572_v27  ;;  %7607 = vmatprep.mubr.msk.bf16.mxu1 %vm1399_vm9, %v1991_v46 }
 0x21d   : >> { %7605 = vmatprep.subr.bf16.mxu1 %v9600_v2 }
 0x21e   : >> { %7582 = vmatpush3.bf16.msra.mxu0 %v9587_v15 }
 0x21f   : >> { %7595 = vmatprep.subr.bf16.mxu0 %v9610_v56 }
 0x220   : >> { %7606 = vmatpush3.bf16.msra.mxu1 %v9600_v2 }
 0x221   : >> { %7584 = vmatmul.mubr.msk.bf16.vlgmr.msra.gmra.mrb[8].mxu0 %vm1399_vm9, %v1749_v53  ;;  %7619 = vmatprep.subr.bf16.mxu1 %v9462_v0 }
 0x222   : >> { %7596 = vmatpush3.bf16.msra.mxu0 %v9610_v56  ;;  %7599 = vmatprep.mubr.msk.bf16.mxu0 %vm1399_vm9, %v9578_v14 }
 0x223   : >> { %7597 = vmatprep.subr.bf16.mxu0 %v9622_v57  ;;  %7608 = vmatmul.mubr.msk.bf16.vlgmr.msra.gmra.mrb[12].mxu1 %vm1399_vm9, %v1994_v60 }
 0x224   : >> { %7620 = vmatpush3.bf16.msra.mxu1 %v9462_v0  ;;  %7623 = vmatprep.mubr.msk.bf16.mxu1 %vm1399_vm9, %v1746_v33  ;;  %v6966_v0 = vld [vmem:[%s9486_s16 + $0x48] sm:$0xff] }
 0x225   : >> { %7621 = vmatprep.subr.bf16.mxu1 %v9476_v34 }
 0x226   : >> { %7598 = vmatpush3.bf16.msra.mxu0 %v9622_v57 }
 0x227   : >> { %7611 = vmatprep.subr.bf16.mxu0 %v9635_v58 }
 0x228   : >> { %7622 = vmatpush3.bf16.msra.mxu1 %v9476_v34  ;;  %v6967_v34 = vld [vmem:[%s9486_s16 + $0x50] sm:$0xff] }
 0x229   : >> { %7600 = vmatmul.mubr.msk.bf16.vlgmr.msra.gmra.mrb[12].mxu0 %vm1399_vm9, %v9581_v17  ;;  %7635 = vmatprep.subr.bf16.mxu1 %v9497_v49 }
 0x22a   : >> { %7612 = vmatpush3.bf16.msra.mxu0 %v9635_v58  ;;  %7615 = vmatprep.mubr.msk.bf16.mxu0 %vm1399_vm9, %v2072_v16 }
 0x22b   : >> { %7613 = vmatprep.subr.bf16.mxu0 %v9649_v55  ;;  %7624 = vmatmul.mubr.msk.bf16.vlgmr.msra.gmra.mrb[16].mxu1 %vm1399_vm9, %v1749_v53 }
 0x22c   : >> { %7636 = vmatpush3.bf16.msra.mxu1 %v9497_v49  ;;  %7639 = vmatprep.mubr.msk.bf16.mxu1 %vm1399_vm9, %v9554_v13  ;;  %v6968_v49 = vld [vmem:[%s9486_s16 + $0x58] sm:$0xff]  ;;  %s6977_s16 = sshll.u32 %s8531_s0, 4  ;;  %s1409_s0 = sadd.s32 1, %s8531_s0  }
 0x22d   : >> { %7637 = vmatprep.subr.bf16.mxu1 %v9535_v12  ;;  %s2758_s23 = scalar_lea.vmem [#allocation3], %s6977_s16  ;;  %p1406_p12 = scmp.ge.s32.totalorder %s1409_s0, 11  }
 0x22e   : >> { %7614 = vmatpush3.bf16.msra.mxu0 %v9649_v55  ;;  %s9755_s15 = smov (%p1406_p12), 0  }
 0x22f   : >> { %7627 = vmatprep.subr.bf16.mxu0 %v9457_v28 }
 0x230   : >> { %7638 = vmatpush3.bf16.msra.mxu1 %v9535_v12 }
 0x231   : >> { %7616 = vmatmul.mubr.msk.bf16.vlgmr.msra.gmra.mrb[16].mxu0 %vm1399_vm9, %v9639_v47  ;;  %7651 = vmatprep.subr.bf16.mxu1 %v9564_v61 }
 0x232   : >> { %7628 = vmatpush3.bf16.msra.mxu0 %v9457_v28  ;;  %7631 = vmatprep.mubr.msk.bf16.mxu0 %vm1399_vm9, %v9517_v43  ;;  %v2460_v28 = vpack.c.bf16 %v6967_v34, %v6966_v0  ;;  %v8539_v43 = vmov 0.0  }
 0x233   : >> { %7629 = vmatprep.subr.bf16.mxu0 %v9468_v62  ;;  %7640 = vmatmul.mubr.msk.bf16.vlgmr.msra.gmra.mrb[20].mxu1 %vm1399_vm9, %v9538_v20 }
 0x234   : >> { %7652 = vmatpush3.bf16.msra.mxu1 %v9564_v61  ;;  %7655 = vmatprep.mubr.msk.bf16.mxu1 %vm1399_vm9, %v1991_v46  ;;  %v2521_v22 = vshll.u32 %v2460_v28, 16  ;;  %v2591_v41 = vrot.slane %v2460_v28, 1 }
 0x235   : >> { %7653 = vmatprep.subr.bf16.mxu1 %v9587_v15 }
 0x236   : >> { %7630 = vmatpush3.bf16.msra.mxu0 %v9468_v62  ;;  %v2461_v62 = vpack.c.bf16 %v6968_v49, %v6968_v49  ;;  %v2523_v1 = vrot.slane %v2521_v22, 1 }
 0x237   : >> { %7643 = vmatprep.subr.bf16.mxu0 %v9483_v19 }
 0x238   : >> { %7654 = vmatpush3.bf16.msra.mxu1 %v9587_v15  ;;  %v2592_v32 = vrot.slane %v2461_v62, 1  ;;  %v2525_v7 = vshll.u32 %v2461_v62, 16  ;;  %v2529_v44 = vshrl.u32 %v2461_v62, 16 }
 0x239   : >> { %7632 = vmatmul.mubr.msk.bf16.vlgmr.msra.gmra.mrb[20].mxu0 %vm1399_vm9, %v9520_v45  ;;  %7667 = vmatprep.subr.bf16.mxu1 %v9610_v56 }
 0x23a   : >> { %7644 = vmatpush3.bf16.msra.mxu0 %v9483_v19  ;;  %7647 = vmatprep.mubr.msk.bf16.mxu0 %vm1399_vm9, %v9578_v14  ;;  %v2519_v19 = vshrl.u32 %v2460_v28, 16  ;;  %v2593_v29 = vsel %vm560_vm7, %v2591_v41, %v2592_v32  ;;  %v2527_v39 = vrot.slane %v2525_v7, 1 }
 0x23b   : >> { %7645 = vmatprep.subr.bf16.mxu0 %v9506_v18  ;;  %7656 = vmatmul.mubr.msk.bf16.vlgmr.msra.gmra.mrb[24].mxu1 %vm1399_vm9, %v1994_v60 }
 0x23c   : >> { %7668 = vmatpush3.bf16.msra.mxu1 %v9610_v56  ;;  %7671 = vmatprep.mubr.msk.bf16.mxu1 %vm1399_vm9, %v2460_v28  ;;  %v2531_v11 = vor.u32 %v2529_v44, %v2527_v39 }
 0x23d   : >> { %7669 = vmatprep.subr.bf16.mxu1 %v9622_v57 }
 0x23e   : >> { %7646 = vmatpush3.bf16.msra.mxu0 %v9506_v18  ;;  %v2524_v18 = vor.u32 %v2523_v1, %v2519_v19 }
 0x23f   : >> { %7659 = vmatprep.subr.bf16.mxu0 %v9525_v23 }
 0x240   : >> { %7670 = vmatpush3.bf16.msra.mxu1 %v9622_v57  ;;  %v2528_v24 = vsel %vm1426_vm10, %v2524_v18, %v2527_v39 }
 0x241   : >> { %7648 = vmatmul.mubr.msk.bf16.vlgmr.msra.gmra.mrb[24].mxu0 %vm1399_vm9, %v9581_v17  ;;  %7683 = vmatprep.subr.bf16.mxu1 %v9635_v58 }
 0x242   : >> { %7660 = vmatpush3.bf16.msra.mxu0 %v9525_v23  ;;  %7663 = vmatprep.mubr.msk.bf16.mxu0 %vm1399_vm9, %v2072_v16 }
 0x243   : >> { %7661 = vmatprep.subr.bf16.mxu0 %v9550_v40  ;;  %7672 = vmatmul.mubr.msk.bf16.vlgmr.msra.gmra.mrb[28].mxu1 %vm1399_vm9, %v2461_v62 }
 0x244   : >> { %7684 = vmatpush3.bf16.msra.mxu1 %v9635_v58  ;;  %7687 = vmatprep.mubr.msk.bf16.mxu1 %vm1399_vm9, %v2593_v29 }
 0x245   : >> { %7685 = vmatprep.subr.bf16.mxu1 %v9649_v55 }
 0x246   : >> { %7662 = vmatpush3.bf16.msra.mxu0 %v9550_v40 }
 0x247   : >> { %7675 = vmatprep.subr.bf16.mxu0 %v9572_v27 }
 0x248   : >> { %7686 = vmatpush3.bf16.msra.mxu1 %v9649_v55 }
 0x249   : >> { %7664 = vmatmul.mubr.msk.bf16.vlgmr.msra.gmra.mrb[28].mxu0 %vm1399_vm9, %v9639_v47  ;;  %7699 = vmatprep.subr.bf16.mxu1 %v8539_v43 }
 0x24a   : >> { %7676 = vmatpush3.bf16.msra.mxu0 %v9572_v27  ;;  %7679 = vmatprep.mubr.msk.bf16.mxu0 %vm1399_vm9, %v2528_v24 }
 0x24b   : >> { %7677 = vmatprep.subr.bf16.mxu0 %v9600_v2  ;;  %7688 = vmatmul.mubr.msk.bf16.vlgmr.msra.gmra.mrb[32].mxu1 %vm1399_vm9, %v2592_v32 }
 0x24c   : >> { %7703 = vmatprep.mubr.msk.bf16.mxu1 %vm8540_vm11, %v8539_v43 }
 0x24e   : >> { %7678 = vmatpush3.bf16.msra.mxu0 %v9600_v2 }
 0x24f   : >> { %7691 = vmatprep.subr.bf16.mxu0 %v8539_v43 }
 0x251   : >> { %7680 = vmatmul.mubr.msk.bf16.vlgmr.msra.gmra.mrb[32].mxu0 %vm1399_vm9, %v2531_v11 }
 0x252   : >> { %7695 = vmatprep.mubr.msk.bf16.mxu0 %vm8540_vm11, %v8539_v43 }
 0x2dd   : >> { %v7561_v25 = vpop.f32.mrb[0].mxu1 }
 0x2de   : >> { %v1559_v51 = vpop.f32.mrb[1].mxu1 }
 0x2df   : >> { %v7562_v45 = vpop.f32.mrb[2].mxu1 }
 0x2e0   : >> { %v1562_v23 = vpop.f32.mrb[3].mxu1 }
 0x2e4   : >> { %v7553_v9 = vpop.f32.mrb[0].mxu0 }
 0x2e5   : >> { %v1568_v63 = vadd.f32 %v7561_v25, %v7553_v9  ;;  %v1495_v6 = vpop.f32.mrb[1].mxu0 }
 0x2e6   : >> { %v1560_v12 = vadd.f32 %v1559_v51, %v1495_v6  ;;  %v7554_v20 = vpop.f32.mrb[2].mxu0  ;;  %v7577_v54 = vpop.f32.mrb[4].mxu1 }
 0x2e7   : >> { %v1498_v10 = vpop.f32.mrb[3].mxu0  ;;  %v1716_v26 = vpop.f32.mrb[5].mxu1 }
 0x2e8   : >> { %v1563_v40 = vadd.f32 %v1562_v23, %v1498_v10  ;;  %v7578_v13 = vpop.f32.mrb[6].mxu1 }
 0x2e9   : >> { %v1719_v5 = vpop.f32.mrb[7].mxu1 }
 0x2ec   : >> { %v7569_v61 = vpop.f32.mrb[4].mxu0 }
 0x2ed   : >> { %v1651_v21 = vadd.f32 %v7569_v61, %v1568_v63  ;;  %v1635_v59 = vpop.f32.mrb[5].mxu0 }
 0x2ee   : >> { %v1649_v27 = vadd.f32 %v1635_v59, %v1560_v12  ;;  %v7570_v37 = vpop.f32.mrb[6].mxu0  ;;  %v7593_v52 = vpop.f32.mrb[8].mxu1 }
 0x2ef   : >> { %v1638_v30 = vpop.f32.mrb[7].mxu0  ;;  %v1732_v14 = vadd.f32 %v7577_v54, %v1651_v21  ;;  %v1880_v17 = vpop.f32.mrb[9].mxu1 }
 0x2f0   : >> { %v1650_v15 = vadd.f32 %v1638_v30, %v1563_v40  ;;  %v1730_v33 = vadd.f32 %v1716_v26, %v1649_v27  ;;  %v7594_v4 = vpop.f32.mrb[10].mxu1 }
 0x2f1   : >> { %v1883_v31 = vpop.f32.mrb[11].mxu1 }
 0x2f2   : >> { %v1731_v50 = vadd.f32 %v1719_v5, %v1650_v15 }
 0x2f4   : >> { %v7585_v8 = vpop.f32.mrb[8].mxu0 }
 0x2f5   : >> { %v1818_v2 = vadd.f32 %v7585_v8, %v1732_v14  ;;  %v1802_v38 = vpop.f32.mrb[9].mxu0 }
 0x2f6   : >> { %v1816_v36 = vadd.f32 %v1802_v38, %v1730_v33  ;;  %v7586_v56 = vpop.f32.mrb[10].mxu0  ;;  %v7609_v42 = vpop.f32.mrb[12].mxu1 }
 0x2f7   : >> { %v1805_v35 = vpop.f32.mrb[11].mxu0  ;;  %v1896_v53 = vadd.f32 %v7593_v52, %v1818_v2  ;;  %v2047_v46 = vpop.f32.mrb[13].mxu1 }
 0x2f8   : >> { %v1817_v57 = vadd.f32 %v1805_v35, %v1731_v50  ;;  %v1894_v60 = vadd.f32 %v1880_v17, %v1816_v36  ;;  %v7610_v58 = vpop.f32.mrb[14].mxu1 }
 0x2f9   : >> { %v2050_v3 = vpop.f32.mrb[15].mxu1 }
 0x2fa   : >> { %v1895_v47 = vadd.f32 %v1883_v31, %v1817_v57 }
 0x2fc   : >> { %v7601_v55 = vpop.f32.mrb[12].mxu0 }
 0x2fd   : >> { %v1977_v16 = vadd.f32 %v7601_v55, %v1896_v53  ;;  %v1961_v0 = vpop.f32.mrb[13].mxu0 }
 0x2fe   : >> { %v1975_v34 = vadd.f32 %v1961_v0, %v1894_v60  ;;  %v7602_v28 = vpop.f32.mrb[14].mxu0  ;;  %v7625_v49 = vpop.f32.mrb[16].mxu1 }
 0x2ff   : >> { %v1964_v62 = vpop.f32.mrb[15].mxu0  ;;  %v2063_v22 = vadd.f32 %v7609_v42, %v1977_v16  ;;  %v2188_v41 = vpop.f32.mrb[17].mxu1 }
 0x300   : >> { %v1976_v32 = vadd.f32 %v1964_v62, %v1895_v47  ;;  %v2061_v19 = vadd.f32 %v2047_v46, %v1975_v34  ;;  %v7626_v1 = vpop.f32.mrb[18].mxu1 }
 0x301   : >> { %v2191_v7 = vpop.f32.mrb[19].mxu1 }
 0x302   : >> { %v2062_v29 = vadd.f32 %v2050_v3, %v1976_v32 }
 0x304   : >> { %v7617_v18 = vpop.f32.mrb[16].mxu0 }
 0x305   : >> { %v2141_v39 = vadd.f32 %v7617_v18, %v2063_v22  ;;  %v2125_v24 = vpop.f32.mrb[17].mxu0 }
 0x306   : >> { %v2139_v44 = vadd.f32 %v2125_v24, %v2061_v19  ;;  %v7618_v11 = vpop.f32.mrb[18].mxu0  ;;  %v7641_v25 = vpop.f32.mrb[20].mxu1 }
 0x307   : >> { %v2128_v51 = vpop.f32.mrb[19].mxu0  ;;  %v2284_v45 = vpop.f32.mrb[21].mxu1  ;;  %v2150_v19 = vadd.f32 %v9447_v48, %v2141_v39 }
 0x308   : >> { %v2140_v23 = vadd.f32 %v2128_v51, %v2062_v29  ;;  %v7642_v9 = vpop.f32.mrb[22].mxu1  ;;  %v2148_v29 = vadd.f32 %v9447_v48, %v2139_v44 }
 0x309   : >> { %v2287_v63 = vpop.f32.mrb[23].mxu1  ;;  %v2153_v9 = vmax.f32 %v2150_v19, 0.0 }
 0x30c   : >> { %v7633_v6 = vpop.f32.mrb[20].mxu0 }
 0x30d   : >> { %v2245_v12 = vadd.f32 %v7633_v6, %v7625_v49  ;;  %v2236_v20 = vpop.f32.mrb[21].mxu0  ;;  %v2151_v6 = vmax.f32 %v2148_v29, 0.0 }
 0x30e   : >> { %v2237_v54 = vadd.f32 %v2236_v20, %v2188_v41  ;;  %v7634_v10 = vpop.f32.mrb[22].mxu0  ;;  %v7657_v26 = vpop.f32.mrb[24].mxu1 }
 0x30f   : >> { %v2239_v40 = vpop.f32.mrb[23].mxu0  ;;  %v2300_v13 = vadd.f32 %v7641_v25, %v2245_v12  ;;  %v2386_v5 = vpop.f32.mrb[25].mxu1  ;;  %v2149_v25 = vadd.f32 %v9447_v48, %v2140_v23 }
 0x310   : >> { %v2240_v61 = vadd.f32 %v2239_v40, %v2191_v7  ;;  %v2298_v21 = vadd.f32 %v2284_v45, %v2237_v54  ;;  %v7658_v59 = vpop.f32.mrb[26].mxu1 }
 0x311   : >> { %v2389_v27 = vpop.f32.mrb[27].mxu1  ;;  %v2152_v54 = vmax.f32 %v2149_v25, 0.0 }
 0x312   : >> { %v2299_v37 = vadd.f32 %v2287_v63, %v2240_v61  ;;  %v11784_v61 = vld [vmem:[#allocation15_spill] sm:$0xff] }
 0x314   : >> { %v7649_v52 = vpop.f32.mrb[24].mxu0 }
 0x315   : >> { %v2351_v30 = vadd.f32 %v7649_v52, %v2300_v13  ;;  %v2335_v14 = vpop.f32.mrb[25].mxu0 }
 0x316   : >> { %v2349_v17 = vadd.f32 %v2335_v14, %v2298_v21  ;;  %v7650_v15 = vpop.f32.mrb[26].mxu0  ;;  %v7673_v33 = vpop.f32.mrb[28].mxu1 }
 0x317   : >> { %v2338_v4 = vpop.f32.mrb[27].mxu0  ;;  %v2402_v31 = vadd.f32 %v7657_v26, %v2351_v30  ;;  %v2502_v50 = vpop.f32.mrb[29].mxu1 }
 0x318   : >> { %v2350_v8 = vadd.f32 %v2338_v4, %v2299_v37  ;;  %v2400_v2 = vadd.f32 %v2386_v5, %v2349_v17  ;;  %v7674_v38 = vpop.f32.mrb[30].mxu1  ;;  %v11783_v5 = vld [vmem:[#allocation12_spill] sm:$0xff]  ;;  %v11785_v4 = vld [vmem:[#allocation10_spill] sm:$0xff] (%p1406_p12) }
 0x319   : >> { %v2505_v36 = vpop.f32.mrb[31].mxu1 }
 0x31a   : >> { %v2401_v56 = vadd.f32 %v2389_v27, %v2350_v8 }
 0x31c   : >> { %v7665_v42 = vpop.f32.mrb[28].mxu0 }
 0x31d   : >> { %v2453_v35 = vadd.f32 %v7665_v42, %v2402_v31  ;;  %v2437_v53 = vpop.f32.mrb[29].mxu0  ;;  %v9749_v31 = vpack.c.bf16 (%p1406_p12), %v11785_v4, %v11785_v4 }
 0x31e   : >> { %v2451_v46 = vadd.f32 %v2437_v53, %v2400_v2  ;;  %v7666_v57 = vpop.f32.mrb[30].mxu0  ;;  %v7689_v60 = vpop.f32.mrb[32].mxu1 }
 0x31f   : >> { %v2440_v58 = vpop.f32.mrb[31].mxu0  ;;  %v2518_v3 = vadd.f32 %v7673_v33, %v2453_v35  ;;  %v2634_v47 = vpop.f32.mrb[33].mxu1  ;;  %v9745_v33 = vld [vmem:[%s11596_s6] ss:$0 sm:$0xff] (%p1406_p12)  ;;  %11786 = vst [vmem:[#allocation11_spill] sm:$0xff] (%p1406_p12), %v9749_v31 }
 0x320   : >> { %v2452_v55 = vadd.f32 %v2440_v58, %v2401_v56  ;;  %v2516_v16 = vadd.f32 %v2502_v50, %v2451_v46  ;;  %v7690_v0 = vpop.f32.mrb[34].mxu1  ;;  %v11787_v50 = vld [vmem:[#allocation13_spill] sm:$0xff] (%p1406_p12) }
 0x321   : >> { %v2637_v34 = vpop.f32.mrb[35].mxu1  ;;  %v9753_v8 = vpack.c.bf16 (%p1406_p12), %v11787_v50, %v11787_v50 }
 0x322   : >> { %v2517_v28 = vadd.f32 %v2505_v36, %v2452_v55 }
 0x323   : > { %11788 = vst [vmem:[#allocation14_spill] sm:$0xff] (%p1406_p12), %v9753_v8 }
 0x324   : >> { %v7681_v49 = vpop.f32.mrb[32].mxu0 }
 0x325   : >> { %v2588_v62 = vadd.f32 %v7681_v49, %v2518_v3  ;;  %v2572_v22 = vpop.f32.mrb[33].mxu0 }
 0x326   : >> { %v2586_v41 = vadd.f32 %v2572_v22, %v2516_v16  ;;  %v7682_v32 = vpop.f32.mrb[34].mxu0 }
 0x327   : >> { %v2650_v1 = vadd.f32 %v7689_v60, %v2588_v62  ;;  %v2575_v7 = vpop.f32.mrb[35].mxu0 }
 0x328   : >> { %v2648_v18 = vadd.f32 %v2634_v47, %v2586_v41  ;;  %v2587_v24 = vadd.f32 %v2575_v7, %v2517_v28 }
 0x329   : >> { %v2653_v11 = vadd.f32 %v9447_v48, %v2650_v1 }
 0x32a   : >> { %v2651_v51 = vadd.f32 %v9447_v48, %v2648_v18  ;;  %v2649_v45 = vadd.f32 %v2637_v34, %v2587_v24 }
 0x32b   : >> { %v2656_v63 = vmax.f32 %v2653_v11, 0.0 }
 0x32c   : >> { %v2654_v12 = vmax.f32 %v2651_v51, 0.0  ;;  %v2652_v20 = vadd.f32 %v9447_v48, %v2649_v45 }
 0x32d   : >> { %v2659_v39 = vmax.f32 %v2153_v9, %v2656_v63 }
 0x32e   : >> { %v2657_v10 = vmax.f32 %v2151_v6, %v2654_v12  ;;  %v2655_v44 = vmax.f32 %v2652_v20, 0.0 }
 0x32f   : >> { %v2661_v13 = vpack.c.bf16 %v2659_v39, %v2659_v39 }
 0x330   : >> { %v2658_v26 = vmax.f32 %v2152_v54, %v2655_v44 }
 0x331   : >> { %v2668_v23 = vsel %vm2666_vm12, %v2661_v13, 0 }
 0x332   : >> { %v2660_v40 = vpack.c.bf16 %v2658_v26, %v2657_v10 }
 0x334   : >> { %7692 = vmatpush3.bf16.msra.mxu0 %v2660_v40  ;;  %7700 = vmatpush3.bf16.msra.mxu1 %v2660_v40 }
 0x335   : >> { %7693 = vmatprep.subr.bf16.mxu0 %v8539_v43  ;;  %7701 = vmatprep.subr.bf16.mxu1 %v8539_v43 }
 0x338   : >> { %7694 = vmatpush3.bf16.msra.mxu0 %v2668_v23  ;;  %7702 = vmatpush3.bf16.msra.mxu1 %v2668_v23 }
 0x33b   : >> { %7696 = vmatmul.mubr.msk.bf16.vlgmr.msra.gmra.mrb[36].mxu0 %vm2662_vm13, %v11783_v5  ;;  %7704 = vmatmul.mubr.msk.bf16.vlgmr.msra.gmra.mrb[36].mxu1 %vm2662_vm13, %v11784_v61 }
 0x40d   : > { %1408 = sbr.rel (!%p1406_p12) target bundleno = 512 (0x200), region = 157 }
 0x40e   : >> { %v2704_v21 = vpop.f32.mrb[36].mxu0  ;;  %v2748_v59 = vpop.f32.mrb[36].mxu1 }
 0x40f   : >> { %v2755_v27 = vmax.f32 %v2704_v21, %v2748_v59  ;;  %v7697_v37 = vpop.f32.mrb[37].mxu0  ;;  %v7705_v52 = vpop.f32.mrb[37].mxu1 }
 0x410   : >> { %v2707_v30 = vpop.f32.mrb[38].mxu0  ;;  %v2751_v14 = vpop.f32.mrb[38].mxu1 }
 0x411   : >> { %2760 = vst.msk [vmem:[%s2758_s23] sm:$0xff] %vm2759_vm14, %v2755_v27  ;;  %v2756_v43 = vmax.f32 %v2707_v30, %v2751_v14  ;;  %v7698_v17 = vpop.f32.mrb[39].mxu0  ;;  %v7706_v15 = vpop.f32.mrb[39].mxu1 }
 0x413   : >> { %2762 = vst.msk [vmem:[%s2758_s23 + $0x8] sm:$0x7] %vm2761_vm15, %v2756_v43 }
 0x414 LB: >> { %v9763_v48 = vld [vmem:[%s11595_s5 + $0x20] sm:$0xff]   ;;  %v8541_v2 = vmov 0.0   ;;  %v9776_v36 = vld [vmem:[%s11595_s5 + $0x28] sm:$0xff]   ;;  %vm8542_vm0 = vmmov 0   ;;  %s7297_s22 = sshll.u32 %s8535_s15, 5  ;;  %v9795_v42 = vld [vmem:[%s11595_s5 + $0x30] sm:$0xff]   ;;  %s8535_s15 = sphi %s9755_s15, %s2771_s15  }
 0x415   : >> { %7707 = vmatprep.subr.bf16.mxu0 %v8541_v2  ;;  %7719 = vmatprep.subr.bf16.mxu1 %v8541_v2  ;;  %v9770_v38 = vld [vmem:[%s11595_s5] sm:$0xff]   ;;  %v9786_v56 = vld [vmem:[%s11595_s5 + $0x8] sm:$0xff]   ;;  %v9802_v35 = vld [vmem:[%s11595_s5 + $0x10] sm:$0xff]   ;;  %s9805_s0 = scalar_lea.vmem [#allocation3], %s7297_s22  ;;  %vm3940_vm1 = vcmask 1043456   ;;  %vm3941_vm2 = vcmask 1044480  }
 0x416   : >> { %7708 = vmatpush3.bf16.msra.mxu0 %v9763_v48  ;;  %7715 = vmatprep.mubr.msk.bf16.mxu0 %vm8542_vm0, %v8541_v2  ;;  %v9813_v60 = vld [vmem:[%s11595_s5 + $0x38] sm:$0xff]   ;;  %v9827_v16 = vld [vmem:[%s11595_s5 + $0x40] sm:$0xff]   ;;  %v9843_v28 = vld [vmem:[%s11595_s5 + $0x48] sm:$0xff]   ;;  %vm3936_vm3 = vcmask 72704  }
 0x417   : >> { %7720 = vmatpush3.bf16.msra.mxu1 %v9770_v38  ;;  %7709 = vmatprep.subr.bf16.mxu0 %v8541_v2  ;;  %v9820_v58 = vld [vmem:[%s11595_s5 + $0x18] sm:$0xff]   ;;  %v9834_v34 = vld [vmem:[%s11595_s5 + $0x60] sm:$0xff]   ;;  %v9850_v49 = vld [vmem:[%s11595_s5 + $0x68] sm:$0xff]  }
 0x418   : >> { %7721 = vmatprep.subr.bf16.mxu1 %v8541_v2  ;;  %7727 = vmatprep.mubr.msk.bf16.mxu1 %vm8542_vm0, %v8541_v2  ;;  %v9861_v62 = vld [vmem:[%s11595_s5 + $0x50] sm:$0xff]   ;;  %v9874_v41 = vld [vmem:[%s11595_s5 + $0x58] sm:$0xff]   ;;  %v9893_v18 = vld [vmem:[%s11595_s5 + $0x80] sm:$0xff]  }
 0x419   : >> { %v9868_v22 = vld [vmem:[%s11595_s5 + $0x70] sm:$0xff]   ;;  %v9879_v32 = vld [vmem:[%s11595_s5 + $0x78] sm:$0xff]   ;;  %v9900_v24 = vld [vmem:[%s11595_s5 + $0xa0] sm:$0xff]  }
 0x41a   : >> { %7710 = vmatpush3.bf16.msra.mxu0 %v9776_v36  ;;  %v2775_v53 = vld [vmem:[%s9805_s0] sm:$0xff]  ;;  %v2776_v46 = vld [vmem:[%s9805_s0 + $0x8] sm:$0x7]  ;;  %v6997_v19 = vld [vmem:[%s9805_s0 + $0x10] sm:$0xff] }
 0x41b   : >> { %7722 = vmatpush3.bf16.msra.mxu1 %v9786_v56  ;;  %7711 = vmatprep.subr.bf16.mxu0 %v8541_v2  ;;  %v2785_v57 = vpack.c.bf16 %v2776_v46, %v2775_v53  ;;  %v6998_v1 = vld [vmem:[%s9805_s0 + $0x18] sm:$0x7]  ;;  %v9910_v11 = vld [vmem:[%s11595_s5 + $0x88] sm:$0xff]   ;;  %v9929_v45 = vld [vmem:[%s11595_s5 + $0x90] sm:$0xff]  }
 0x41c   : >> { %7723 = vmatprep.subr.bf16.mxu1 %v8541_v2  ;;  %v9888_v29 = vpack.c.bf16 %v6998_v1, %v6997_v19  ;;  %v9917_v25 = vld [vmem:[%s11595_s5 + $0xa8] sm:$0xff]   ;;  %v9936_v9 = vld [vmem:[%s11595_s5 + $0xb0] sm:$0xff]   ;;  %v9944_v12 = vld [vmem:[%s11595_s5 + $0x98] sm:$0xff]  }
 0x41d   : >> { %v2795_v3 = vshrl.u32 %v2785_v57, 16  ;;  %v2797_v47 = vshll.u32 %v2785_v57, 16  ;;  %v2946_v7 = vrot.slane %v2785_v57, 1  ;;  %v9951_v20 = vld [vmem:[%s11595_s5 + $0xb8] sm:$0xff]   ;;  %v9961_v10 = vld [vmem:[%s11595_s5 + $0xc0] sm:$0xff]   ;;  %v9982_v13 = vld [vmem:[%s11595_s5 + $0xc8] sm:$0xff]  }
 0x41e   : >> { %7712 = vmatpush3.bf16.msra.mxu0 %v9795_v42  ;;  %v3111_v51 = vshll.u32 %v9888_v29, 16  ;;  %v3109_v63 = vshrl.u32 %v9888_v29, 16  ;;  %v3194_v54 = vrot.slane %v9888_v29, 1  ;;  %v9968_v44 = vld [vmem:[%s11595_s5 + $0xe0] sm:$0xff]   ;;  %v7017_v40 = vld [vmem:[%s9805_s0 + $0x28] sm:$0x7] }
 0x41f   : >> { %7724 = vmatpush3.bf16.msra.mxu1 %v9802_v35  ;;  %7713 = vmatprep.subr.bf16.mxu0 %v8541_v2  ;;  %v2799_v55 = vrot.slane %v2797_v47, 1  ;;  %v7016_v26 = vld [vmem:[%s9805_s0 + $0x20] sm:$0xff]  ;;  %v9991_v5 = vld [vmem:[%s11595_s5 + $0xe8] sm:$0xff]   ;;  %v10002_v61 = vld [vmem:[%s11595_s5 + $0xd0] sm:$0xff]  }
 0x420   : >> { %7725 = vmatprep.subr.bf16.mxu1 %v8541_v2  ;;  %v3113_v6 = vrot.slane %v3111_v51, 1  ;;  %v9984_v23 = vpack.c.bf16 %v7017_v40, %v7016_v26  ;;  %v10010_v59 = vld [vmem:[%s11595_s5 + $0xf0] sm:$0xff]   ;;  %v10017_v27 = vld [vmem:[%s11595_s5 + $0xd8] sm:$0xff]   ;;  %v10034_v43 = vld [vmem:[%s11595_s5 + $0x100] sm:$0xff]  }
 0x421   : >> { %v2800_v0 = vor.u32 %v2799_v55, %v2795_v3  ;;  %v10025_v30 = vld [vmem:[%s11595_s5 + $0xf8] sm:$0xff]   ;;  %v10047_v17 = vld [vmem:[%s11595_s5 + $0x108] sm:$0xff]   ;;  %v10060_v15 = vld [vmem:[%s11595_s5 + $0x110] sm:$0xff]  }
 0x422   : >> { %7714 = vmatpush3.bf16.msra.mxu0 %v9813_v60  ;;  %v9954_v39 = vor.u32 %v3113_v6, %v3109_v63  ;;  %v3359_v21 = vshll.u32 %v9984_v23, 16  ;;  %v3357_v37 = vshrl.u32 %v9984_v23, 16  ;;  %v10069_v4 = vld [vmem:[%s11595_s5 + $0x118] sm:$0xff]   ;;  %v3442_v50 = vrot.slane %v9984_v23, 1 }
 0x423   : >> { %7726 = vmatpush3.bf16.msra.mxu1 %v9820_v58  ;;  %7731 = vmatprep.subr.bf16.mxu0 %v8541_v2 }
 0x424   : >> { %7743 = vmatprep.subr.bf16.mxu1 %v8541_v2  ;;  %v3361_v52 = vrot.slane %v3359_v21, 1 }
 0x425   : >> { %7716 = vmatmul.mubr.msk.bf16.vlgmr.msra.gmra.mrb[0].mxu0 %vm2759_vm14, %v2800_v0 }
 0x426   : >> { %7728 = vmatmul.mubr.msk.bf16.vlgmr.msra.gmra.mrb[0].mxu1 %vm2759_vm14, %v2785_v57  ;;  %7732 = vmatpush3.bf16.msra.mxu0 %v9827_v16  ;;  %v10029_v14 = vor.u32 %v3361_v52, %v3357_v37 }
 0x427   : >> { %7744 = vmatpush3.bf16.msra.mxu1 %v9834_v34  ;;  %7733 = vmatprep.subr.bf16.mxu0 %v8541_v2 }
 0x428   : >> { %7745 = vmatprep.subr.bf16.mxu1 %v8541_v2  ;;  %7739 = vmatprep.mubr.msk.bf16.mxu0 %vm8542_vm0, %v8541_v2 }
 0x429   : >> { %7751 = vmatprep.mubr.msk.bf16.mxu1 %vm8542_vm0, %v8541_v2 }
 0x42a   : >> { %7734 = vmatpush3.bf16.msra.mxu0 %v9843_v28 }
 0x42b   : >> { %7746 = vmatpush3.bf16.msra.mxu1 %v9850_v49  ;;  %7735 = vmatprep.subr.bf16.mxu0 %v8541_v2 }
 0x42c   : >> { %7747 = vmatprep.subr.bf16.mxu1 %v8541_v2 }
 0x42e   : >> { %7736 = vmatpush3.bf16.msra.mxu0 %v9861_v62 }
 0x42f   : >> { %7748 = vmatpush3.bf16.msra.mxu1 %v9868_v22  ;;  %7737 = vmatprep.subr.bf16.mxu0 %v8541_v2 }
 0x430   : >> { %7749 = vmatprep.subr.bf16.mxu1 %v8541_v2 }
 0x432   : >> { %7738 = vmatpush3.bf16.msra.mxu0 %v9874_v41 }
 0x433   : >> { %7750 = vmatpush3.bf16.msra.mxu1 %v9879_v32  ;;  %7755 = vmatprep.subr.bf16.mxu0 %v8541_v2 }
 0x434   : >> { %7767 = vmatprep.subr.bf16.mxu1 %v8541_v2 }
 0x435   : >> { %7740 = vmatmul.mubr.msk.bf16.vlgmr.msra.gmra.mrb[4].mxu0 %vm2759_vm14, %v2946_v7 }
 0x436   : >> { %7752 = vmatmul.mubr.msk.bf16.vlgmr.msra.gmra.mrb[4].mxu1 %vm2759_vm14, %v9888_v29  ;;  %7756 = vmatpush3.bf16.msra.mxu0 %v9893_v18 }
 0x437   : >> { %7768 = vmatpush3.bf16.msra.mxu1 %v9900_v24  ;;  %7757 = vmatprep.subr.bf16.mxu0 %v8541_v2 }
 0x438   : >> { %7769 = vmatprep.subr.bf16.mxu1 %v8541_v2  ;;  %7763 = vmatprep.mubr.msk.bf16.mxu0 %vm8542_vm0, %v8541_v2 }
 0x439   : >> { %7775 = vmatprep.mubr.msk.bf16.mxu1 %vm8542_vm0, %v8541_v2 }
 0x43a   : >> { %7758 = vmatpush3.bf16.msra.mxu0 %v9910_v11 }
 0x43b   : >> { %7770 = vmatpush3.bf16.msra.mxu1 %v9917_v25  ;;  %7759 = vmatprep.subr.bf16.mxu0 %v8541_v2 }
 0x43c   : >> { %7771 = vmatprep.subr.bf16.mxu1 %v8541_v2 }
 0x43e   : >> { %7760 = vmatpush3.bf16.msra.mxu0 %v9929_v45 }
 0x43f   : >> { %7772 = vmatpush3.bf16.msra.mxu1 %v9936_v9  ;;  %7761 = vmatprep.subr.bf16.mxu0 %v8541_v2 }
 0x440   : >> { %7773 = vmatprep.subr.bf16.mxu1 %v8541_v2 }
 0x442   : >> { %7762 = vmatpush3.bf16.msra.mxu0 %v9944_v12 }
 0x443   : >> { %7774 = vmatpush3.bf16.msra.mxu1 %v9951_v20  ;;  %7779 = vmatprep.subr.bf16.mxu0 %v8541_v2 }
 0x444   : >> { %7791 = vmatprep.subr.bf16.mxu1 %v8541_v2 }
 0x445   : >> { %7764 = vmatmul.mubr.msk.bf16.vlgmr.msra.gmra.mrb[8].mxu0 %vm2759_vm14, %v9954_v39 }
 0x446   : >> { %7776 = vmatmul.mubr.msk.bf16.vlgmr.msra.gmra.mrb[8].mxu1 %vm2759_vm14, %v3194_v54  ;;  %7780 = vmatpush3.bf16.msra.mxu0 %v9961_v10 }
 0x447   : >> { %7792 = vmatpush3.bf16.msra.mxu1 %v9968_v44  ;;  %7781 = vmatprep.subr.bf16.mxu0 %v8541_v2 }
 0x448   : >> { %7793 = vmatprep.subr.bf16.mxu1 %v8541_v2  ;;  %7787 = vmatprep.mubr.msk.bf16.mxu0 %vm8542_vm0, %v8541_v2 }
 0x449   : >> { %7799 = vmatprep.mubr.msk.bf16.mxu1 %vm8542_vm0, %v8541_v2 }
 0x44a   : >> { %7782 = vmatpush3.bf16.msra.mxu0 %v9982_v13 }
 0x44b   : >> { %7794 = vmatpush3.bf16.msra.mxu1 %v9991_v5  ;;  %7783 = vmatprep.subr.bf16.mxu0 %v8541_v2 }
 0x44c   : >> { %7795 = vmatprep.subr.bf16.mxu1 %v8541_v2 }
 0x44e   : >> { %7784 = vmatpush3.bf16.msra.mxu0 %v10002_v61 }
 0x44f   : >> { %7796 = vmatpush3.bf16.msra.mxu1 %v10010_v59  ;;  %7785 = vmatprep.subr.bf16.mxu0 %v8541_v2 }
 0x450   : >> { %7797 = vmatprep.subr.bf16.mxu1 %v8541_v2 }
 0x452   : >> { %7786 = vmatpush3.bf16.msra.mxu0 %v10017_v27 }
 0x453   : >> { %7798 = vmatpush3.bf16.msra.mxu1 %v10025_v30  ;;  %7803 = vmatprep.subr.bf16.mxu0 %v8541_v2 }
 0x454   : >> { %7815 = vmatprep.subr.bf16.mxu1 %v8541_v2 }
 0x455   : >> { %7788 = vmatmul.mubr.msk.bf16.vlgmr.msra.gmra.mrb[12].mxu0 %vm2759_vm14, %v9984_v23 }
 0x456   : >> { %7800 = vmatmul.mubr.msk.bf16.vlgmr.msra.gmra.mrb[12].mxu1 %vm2759_vm14, %v10029_v14  ;;  %7804 = vmatpush3.bf16.msra.mxu0 %v10034_v43 }
 0x457   : >> { %7816 = vmatpush3.bf16.msra.mxu1 %v9763_v48  ;;  %7805 = vmatprep.subr.bf16.mxu0 %v8541_v2  ;;  %v7042_v48 = vld [vmem:[%s9805_s0 + $0x30] sm:$0xff] }
 0x458   : >> { %7817 = vmatprep.subr.bf16.mxu1 %v8541_v2  ;;  %7811 = vmatprep.mubr.msk.bf16.mxu0 %vm8542_vm0, %v8541_v2 }
 0x459   : >> { %7823 = vmatprep.mubr.msk.bf16.mxu1 %vm8542_vm0, %v8541_v2 }
 0x45a   : >> { %7806 = vmatpush3.bf16.msra.mxu0 %v10047_v17 }
 0x45b   : >> { %7818 = vmatpush3.bf16.msra.mxu1 %v9776_v36  ;;  %7807 = vmatprep.subr.bf16.mxu0 %v8541_v2 }
 0x45c   : >> { %7819 = vmatprep.subr.bf16.mxu1 %v8541_v2 }
 0x45e   : >> { %7808 = vmatpush3.bf16.msra.mxu0 %v10060_v15 }
 0x45f   : >> { %7820 = vmatpush3.bf16.msra.mxu1 %v9795_v42  ;;  %7809 = vmatprep.subr.bf16.mxu0 %v8541_v2 }
 0x460   : >> { %7821 = vmatprep.subr.bf16.mxu1 %v8541_v2 }
 0x462   : >> { %7810 = vmatpush3.bf16.msra.mxu0 %v10069_v4 }
 0x463   : >> { %7822 = vmatpush3.bf16.msra.mxu1 %v9813_v60  ;;  %7827 = vmatprep.subr.bf16.mxu0 %v8541_v2 }
 0x464   : >> { %7839 = vmatprep.subr.bf16.mxu1 %v8541_v2 }
 0x465   : >> { %7812 = vmatmul.mubr.msk.bf16.vlgmr.msra.gmra.mrb[16].mxu0 %vm2759_vm14, %v3442_v50 }
 0x466   : >> { %7824 = vmatmul.mubr.msk.bf16.vlgmr.msra.gmra.mrb[16].mxu1 %vm2759_vm14, %v9954_v39  ;;  %7828 = vmatpush3.bf16.msra.mxu0 %v9770_v38  ;;  %v7043_v38 = vld [vmem:[%s9805_s0 + $0x38] sm:$0x7]  ;;  %s7049_s0 = sshll.u32 %s8535_s15, 2  ;;  %s2771_s15 = sadd.s32 1, %s8535_s15  }
 0x467   : >> { %7840 = vmatpush3.bf16.msra.mxu1 %v9827_v16  ;;  %7829 = vmatprep.subr.bf16.mxu0 %v8541_v2  ;;  %v3782_v36 = vpack.c.bf16 %v7043_v38, %v7042_v48  ;;  %s4032_s30 = scalar_lea.vmem [#allocation4], %s7049_s0  ;;  %p2768_p13 = scmp.ge.s32.totalorder %s2771_s15, 4  }
 0x468   : >> { %7841 = vmatprep.subr.bf16.mxu1 %v8541_v2  ;;  %7835 = vmatprep.mubr.msk.bf16.mxu0 %vm8542_vm0, %v8541_v2  ;;  %vm5747_vm4 = vcmask (%p2768_p13), 1040384   ;;  %vm5743_vm5 = vcmask (%p2768_p13), 15360   ;;  %vm6711_vm7 = vcmask (%p2768_p13), 819200   ;;  %s7294_s24 = sshll.u32 (%p2768_p13), %s8638_s29, 4  ;;  %s6737_s16 = sshll.u32 (%p2768_p13), %s8704_s21, 4  ;;  %s11546_s16 = int_to_ptr.vmem [resolvable:$true] %s6737_s16 }
 0x469   : >> { %7847 = vmatprep.mubr.msk.bf16.mxu1 %vm8542_vm0, %v8541_v2  ;;  %v3829_v42 = vshrl.u32 %v3782_v36, 16  ;;  %v3882_v46 = vrot.slane %v3782_v36, 1  ;;  %s11544_s23 = scalar_lea.hbm (%p2768_p13), %s11603_s13, %s7294_s24  ;;  %s11900_s22 = sand.u32 (%p2768_p13), 1, %s8515_s26  }
 0x46a   : >> { %7830 = vmatpush3.bf16.msra.mxu0 %v9786_v56  ;;  %v3831_v56 = vshll.u32 %v3782_v36, 16  ;;  %s6725_s15 = scalar_lea.sflag (%p2768_p13), [#allocation7], %s11900_s22  ;;  %s8449_s0 = scalar_lea.vmem (%p2768_p13), %s11546_s16, 16 }
 0x46b   : >> { %7842 = vmatpush3.bf16.msra.mxu1 %v9843_v28  ;;  %7831 = vmatprep.subr.bf16.mxu0 %v8541_v2  ;;  %p8450_p0 = scmp.ne.s32.totalorder (%p2768_p13), %s11546_s16, %s8449_s0  ;;  %s8546_s29 = smov (%p2768_p13), [#allocation6]  }
 0x46c   : >> { %7843 = vmatprep.subr.bf16.mxu1 %v8541_v2 }
 0x46d   : > { %p8451_p1 = pnand (%p2768_p13), %p8450_p0, %p8655_p5 }
 0x46e   : >> { %7832 = vmatpush3.bf16.msra.mxu0 %v9802_v35  ;;  %v3833_v35 = vrot.slane %v3831_v56, 1 }
 0x46f   : >> { %7844 = vmatpush3.bf16.msra.mxu1 %v9861_v62  ;;  %7833 = vmatprep.subr.bf16.mxu0 %v8541_v2  ;;  %p8452_p2 = pneg (%p2768_p13), %p8451_p1 }
 0x470   : >> { %7845 = vmatprep.subr.bf16.mxu1 %v8541_v2  ;;  %v3834_v53 = vor.u32 %v3833_v35, %v3829_v42 }
 0x472   : >> { %7834 = vmatpush3.bf16.msra.mxu0 %v9820_v58 }
 0x473   : >> { %7846 = vmatpush3.bf16.msra.mxu1 %v9874_v41  ;;  %7851 = vmatprep.subr.bf16.mxu0 %v8541_v2 }
 0x474   : >> { %7863 = vmatprep.subr.bf16.mxu1 %v8541_v2 }
 0x475   : >> { %7836 = vmatmul.mubr.msk.bf16.vlgmr.msra.gmra.mrb[20].mxu0 %vm2759_vm14, %v9888_v29 }
 0x476   : >> { %7848 = vmatmul.mubr.msk.bf16.vlgmr.msra.gmra.mrb[20].mxu1 %vm2759_vm14, %v3194_v54  ;;  %7852 = vmatpush3.bf16.msra.mxu0 %v9834_v34 }
 0x477   : >> { %7864 = vmatpush3.bf16.msra.mxu1 %v9893_v18  ;;  %7853 = vmatprep.subr.bf16.mxu0 %v8541_v2 }
 0x478   : >> { %7865 = vmatprep.subr.bf16.mxu1 %v8541_v2  ;;  %7859 = vmatprep.mubr.msk.bf16.mxu0 %vm8542_vm0, %v8541_v2 }
 0x479   : >> { %7871 = vmatprep.mubr.msk.bf16.mxu1 %vm8542_vm0, %v8541_v2 }
 0x47a   : >> { %7854 = vmatpush3.bf16.msra.mxu0 %v9850_v49 }
 0x47b   : >> { %7866 = vmatpush3.bf16.msra.mxu1 %v9910_v11  ;;  %7855 = vmatprep.subr.bf16.mxu0 %v8541_v2 }
 0x47c   : >> { %7867 = vmatprep.subr.bf16.mxu1 %v8541_v2 }
 0x47e   : >> { %7856 = vmatpush3.bf16.msra.mxu0 %v9868_v22 }
 0x47f   : >> { %7868 = vmatpush3.bf16.msra.mxu1 %v9929_v45  ;;  %7857 = vmatprep.subr.bf16.mxu0 %v8541_v2 }
 0x480   : >> { %7869 = vmatprep.subr.bf16.mxu1 %v8541_v2 }
 0x482   : >> { %7858 = vmatpush3.bf16.msra.mxu0 %v9879_v32 }
 0x483   : >> { %7870 = vmatpush3.bf16.msra.mxu1 %v9944_v12  ;;  %7875 = vmatprep.subr.bf16.mxu0 %v8541_v2 }
 0x484   : >> { %7887 = vmatprep.subr.bf16.mxu1 %v8541_v2 }
 0x485   : >> { %7860 = vmatmul.mubr.msk.bf16.vlgmr.msra.gmra.mrb[24].mxu0 %vm2759_vm14, %v9984_v23 }
 0x486   : >> { %7872 = vmatmul.mubr.msk.bf16.vlgmr.msra.gmra.mrb[24].mxu1 %vm2759_vm14, %v10029_v14  ;;  %7876 = vmatpush3.bf16.msra.mxu0 %v9900_v24 }
 0x487   : >> { %7888 = vmatpush3.bf16.msra.mxu1 %v9961_v10  ;;  %7877 = vmatprep.subr.bf16.mxu0 %v8541_v2 }
 0x488   : >> { %7889 = vmatprep.subr.bf16.mxu1 %v8541_v2  ;;  %7883 = vmatprep.mubr.msk.bf16.mxu0 %vm8542_vm0, %v8541_v2 }
 0x489   : >> { %7895 = vmatprep.mubr.msk.bf16.mxu1 %vm8542_vm0, %v8541_v2 }
 0x48a   : >> { %7878 = vmatpush3.bf16.msra.mxu0 %v9917_v25 }
 0x48b   : >> { %7890 = vmatpush3.bf16.msra.mxu1 %v9982_v13  ;;  %7879 = vmatprep.subr.bf16.mxu0 %v8541_v2 }
 0x48c   : >> { %7891 = vmatprep.subr.bf16.mxu1 %v8541_v2 }
 0x48e   : >> { %7880 = vmatpush3.bf16.msra.mxu0 %v9936_v9 }
 0x48f   : >> { %7892 = vmatpush3.bf16.msra.mxu1 %v10002_v61  ;;  %7881 = vmatprep.subr.bf16.mxu0 %v8541_v2 }
 0x490   : >> { %7893 = vmatprep.subr.bf16.mxu1 %v8541_v2 }
 0x492   : >> { %7882 = vmatpush3.bf16.msra.mxu0 %v9951_v20 }
 0x493   : >> { %7894 = vmatpush3.bf16.msra.mxu1 %v10017_v27  ;;  %7899 = vmatprep.subr.bf16.mxu0 %v8541_v2 }
 0x494   : >> { %7911 = vmatprep.subr.bf16.mxu1 %v8541_v2 }
 0x495   : >> { %7884 = vmatmul.mubr.msk.bf16.vlgmr.msra.gmra.mrb[28].mxu0 %vm2759_vm14, %v3442_v50 }
 0x496   : >> { %7896 = vmatmul.mubr.msk.bf16.vlgmr.msra.gmra.mrb[28].mxu1 %vm2759_vm14, %v3782_v36  ;;  %7900 = vmatpush3.bf16.msra.mxu0 %v9968_v44 }
 0x497   : >> { %7912 = vmatpush3.bf16.msra.mxu1 %v10034_v43  ;;  %7901 = vmatprep.subr.bf16.mxu0 %v8541_v2 }
 0x498   : >> { %7913 = vmatprep.subr.bf16.mxu1 %v8541_v2  ;;  %7907 = vmatprep.mubr.msk.bf16.mxu0 %vm8542_vm0, %v8541_v2 }
 0x499   : >> { %7919 = vmatprep.mubr.msk.bf16.mxu1 %vm8542_vm0, %v8541_v2 }
 0x49a   : >> { %7902 = vmatpush3.bf16.msra.mxu0 %v9991_v5 }
 0x49b   : >> { %7914 = vmatpush3.bf16.msra.mxu1 %v10047_v17  ;;  %7903 = vmatprep.subr.bf16.mxu0 %v8541_v2 }
 0x49c   : >> { %7915 = vmatprep.subr.bf16.mxu1 %v8541_v2 }
 0x49e   : >> { %7904 = vmatpush3.bf16.msra.mxu0 %v10010_v59 }
 0x49f   : >> { %7916 = vmatpush3.bf16.msra.mxu1 %v10060_v15  ;;  %7905 = vmatprep.subr.bf16.mxu0 %v8541_v2 }
 0x4a0   : >> { %7917 = vmatprep.subr.bf16.mxu1 %v8541_v2 }
 0x4a2   : >> { %7906 = vmatpush3.bf16.msra.mxu0 %v10025_v30 }
 0x4a3   : >> { %7918 = vmatpush3.bf16.msra.mxu1 %v10069_v4  ;;  %7923 = vmatprep.subr.bf16.mxu0 %v8541_v2 }
 0x4a4   : >> { %7929 = vmatprep.subr.bf16.mxu1 %v8541_v2 }
 0x4a5   : >> { %7908 = vmatmul.mubr.msk.bf16.vlgmr.msra.gmra.mrb[32].mxu0 %vm2759_vm14, %v3834_v53 }
 0x4a6   : >> { %7920 = vmatmul.mubr.msk.bf16.vlgmr.msra.gmra.mrb[32].mxu1 %vm2759_vm14, %v3882_v46  ;;  %7925 = vmatprep.mubr.msk.bf16.mxu0 %vm8542_vm0, %v8541_v2 }
 0x4a7   : >> { %7931 = vmatprep.mubr.msk.bf16.mxu1 %vm8542_vm0, %v8541_v2 }
 0x4f8   : >> { %v2863_v57 = vpop.f32.mrb[0].mxu0 }
 0x4f9   : >> { %v2930_v60 = vpop.f32.mrb[0].mxu1  ;;  %v7717_v58 = vpop.f32.mrb[1].mxu0 }
 0x4fa   : >> { %v2931_v3 = vadd.f32 %v2930_v60, %v2863_v57  ;;  %v7729_v47 = vpop.f32.mrb[1].mxu1  ;;  %v2866_v55 = vpop.f32.mrb[2].mxu0 }
 0x4fb   : >> { %v2933_v16 = vpop.f32.mrb[2].mxu1  ;;  %v7718_v0 = vpop.f32.mrb[3].mxu0 }
 0x4fc   : >> { %v2934_v34 = vadd.f32 %v2933_v16, %v2866_v55  ;;  %v7730_v28 = vpop.f32.mrb[3].mxu1 }
 0x508   : >> { %v3008_v49 = vpop.f32.mrb[4].mxu0 }
 0x509   : >> { %v3015_v62 = vadd.f32 %v3008_v49, %v2931_v3  ;;  %v3092_v22 = vpop.f32.mrb[4].mxu1  ;;  %v7741_v41 = vpop.f32.mrb[5].mxu0 }
 0x50a   : >> { %v7753_v32 = vpop.f32.mrb[5].mxu1  ;;  %v3011_v19 = vpop.f32.mrb[6].mxu0 }
 0x50b   : >> { %v3099_v1 = vadd.f32 %v3092_v22, %v3015_v62  ;;  %v3016_v7 = vadd.f32 %v3011_v19, %v2934_v34  ;;  %v3095_v29 = vpop.f32.mrb[6].mxu1  ;;  %v7742_v2 = vpop.f32.mrb[7].mxu0 }
 0x50c   : >> { %v7754_v18 = vpop.f32.mrb[7].mxu1 }
 0x50d   : >> { %v3100_v24 = vadd.f32 %v3095_v29, %v3016_v7 }
 0x518   : >> { %v3176_v11 = vpop.f32.mrb[8].mxu0 }
 0x519   : >> { %v3183_v25 = vadd.f32 %v3176_v11, %v3099_v1  ;;  %v3256_v51 = vpop.f32.mrb[8].mxu1  ;;  %v7765_v45 = vpop.f32.mrb[9].mxu0 }
 0x51a   : >> { %v7777_v9 = vpop.f32.mrb[9].mxu1  ;;  %v3179_v63 = vpop.f32.mrb[10].mxu0 }
 0x51b   : >> { %v3263_v6 = vadd.f32 %v3256_v51, %v3183_v25  ;;  %v3184_v12 = vadd.f32 %v3179_v63, %v3100_v24  ;;  %v3259_v20 = vpop.f32.mrb[10].mxu1  ;;  %v7766_v39 = vpop.f32.mrb[11].mxu0 }
 0x51c   : >> { %v7778_v54 = vpop.f32.mrb[11].mxu1 }
 0x51d   : >> { %v3264_v10 = vadd.f32 %v3259_v20, %v3184_v12 }
 0x528   : >> { %v3340_v44 = vpop.f32.mrb[12].mxu0 }
 0x529   : >> { %v3347_v26 = vadd.f32 %v3340_v44, %v3263_v6  ;;  %v3424_v40 = vpop.f32.mrb[12].mxu1  ;;  %v7789_v13 = vpop.f32.mrb[13].mxu0 }
 0x52a   : >> { %v7801_v23 = vpop.f32.mrb[13].mxu1  ;;  %v3343_v5 = vpop.f32.mrb[14].mxu0 }
 0x52b   : >> { %v3431_v61 = vadd.f32 %v3424_v40, %v3347_v26  ;;  %v3348_v21 = vadd.f32 %v3343_v5, %v3264_v10  ;;  %v3427_v59 = vpop.f32.mrb[14].mxu1  ;;  %v7790_v27 = vpop.f32.mrb[15].mxu0 }
 0x52c   : >> { %v7802_v37 = vpop.f32.mrb[15].mxu1 }
 0x52d   : >> { %v3432_v52 = vadd.f32 %v3427_v59, %v3348_v21 }
 0x538   : >> { %v3504_v30 = vpop.f32.mrb[16].mxu0 }
 0x539   : >> { %v3511_v14 = vadd.f32 %v3504_v30, %v3431_v61  ;;  %v3557_v43 = vpop.f32.mrb[16].mxu1  ;;  %v7813_v17 = vpop.f32.mrb[17].mxu0 }
 0x53a   : >> { %v7825_v15 = vpop.f32.mrb[17].mxu1  ;;  %v3507_v4 = vpop.f32.mrb[18].mxu0 }
 0x53b   : >> { %v3512_v50 = vadd.f32 %v3507_v4, %v3432_v52  ;;  %v3560_v48 = vpop.f32.mrb[18].mxu1  ;;  %v7814_v38 = vpop.f32.mrb[19].mxu0  ;;  %v3519_v13 = vadd.f32 %v9745_v33, %v3511_v14 }
 0x53c   : >> { %v7826_v36 = vpop.f32.mrb[19].mxu1 }
 0x53d   : >> { %v3520_v27 = vadd.f32 %v9745_v33, %v3512_v50  ;;  %v3521_v30 = vmax.f32 %v3519_v13, 0.0  ;;  %v8106_v13 = vld [vmem:[%s11597_s7 + $0xf4] ss:$8 sps:$4 sm:$0xff] (%p2768_p13)  }
 0x53f   : >> { %v3522_v15 = vmax.f32 %v3520_v27, 0.0  ;;  %v10300_v27 = vld [vmem:[%s11597_s7 + $0x104] ss:$8 sps:$4 sm:$0xff] (%p2768_p13)  }
 0x548   : >> { %v3598_v56 = vpop.f32.mrb[20].mxu0 }
 0x549   : >> { %v3599_v42 = vadd.f32 %v3598_v56, %v3557_v43  ;;  %v3639_v35 = vpop.f32.mrb[20].mxu1  ;;  %v7837_v53 = vpop.f32.mrb[21].mxu0 }
 0x54a   : >> { %v7849_v46 = vpop.f32.mrb[21].mxu1  ;;  %v3601_v57 = vpop.f32.mrb[22].mxu0 }
 0x54b   : >> { %v3646_v60 = vadd.f32 %v3639_v35, %v3599_v42  ;;  %v3602_v58 = vadd.f32 %v3601_v57, %v3560_v48  ;;  %v3642_v3 = vpop.f32.mrb[22].mxu1  ;;  %v7838_v47 = vpop.f32.mrb[23].mxu0  ;;  %v8543_v48 = vmov 65535  }
 0x54c   : >> { %v7850_v55 = vpop.f32.mrb[23].mxu1  ;;  %v3942_v38 = vsel %vm3940_vm1, 4294967295, %v8543_v48  ;;  %v10336_v48 = vld [vmem:[%s11597_s7 + $0x124] ss:$8 sps:$4 sm:$0xff] (%p2768_p13)  }
 0x54d   : >> { %v3647_v16 = vadd.f32 %v3642_v3, %v3602_v58  ;;  %v3943_v56 = vsel %vm3941_vm2, %v3942_v38, 0  ;;  %v8129_v38 = vld [vmem:[%s11597_s7 + $0x1a4] ss:$8 sps:$4 sm:$0xff] (%p2768_p13)  }
 0x558   : >> { %v3682_v0 = vpop.f32.mrb[24].mxu0 }
 0x559   : >> { %v3689_v34 = vadd.f32 %v3682_v0, %v3646_v60  ;;  %v3725_v28 = vpop.f32.mrb[24].mxu1  ;;  %v7861_v49 = vpop.f32.mrb[25].mxu0  ;;  %v8066_v0 = vld [vmem:[%s11597_s7 + $0x4] ss:$8 sps:$4 sm:$0xff] (%p2768_p13)  }
 0x55a   : >> { %v7873_v62 = vpop.f32.mrb[25].mxu1  ;;  %v3685_v22 = vpop.f32.mrb[26].mxu0  ;;  %v8070_v49 = vld [vmem:[%s11597_s7 + $0x94] ss:$8 sps:$4 sm:$0xff] (%p2768_p13)  }
 0x55b   : >> { %v3732_v41 = vadd.f32 %v3725_v28, %v3689_v34  ;;  %v3690_v32 = vadd.f32 %v3685_v22, %v3647_v16  ;;  %v3728_v19 = vpop.f32.mrb[26].mxu1  ;;  %v7862_v1 = vpop.f32.mrb[27].mxu0  ;;  %v8064_v16 = vld [vmem:[%s11597_s7 + $0x84] ss:$8 sps:$4 sm:$0xff] (%p2768_p13)   ;;  %v11630_v34 = vmov (%p2768_p13), 0  }
 0x55c   : >> { %v7874_v7 = vpop.f32.mrb[27].mxu1  ;;  %v8068_v28 = vld [vmem:[%s11597_s7 + $0x80] ss:$8 sps:$4 sm:$0xff] (%p2768_p13)   ;;  %v8072_v62 = vld [vmem:[%s11597_s7 + $0x14] ss:$8 sps:$4 sm:$0xff] (%p2768_p13)  }
 0x55d   : >> { %v3733_v29 = vadd.f32 %v3728_v19, %v3690_v32  ;;  %v8074_v22 = vld [vmem:[%s11597_s7 + $0x90] ss:$8 sps:$4 sm:$0xff] (%p2768_p13)   ;;  %v8076_v32 = vld [vmem:[%s11597_s7 + $0xa4] ss:$8 sps:$4 sm:$0xff] (%p2768_p13)   ;;  %v8080_v1 = vld [vmem:[%s11597_s7 + $0xa0] ss:$8 sps:$4 sm:$0xff] (%p2768_p13)  }
 0x55e   : > { %v8078_v19 = vld [vmem:[%s11597_s7 + $0x24] ss:$8 sps:$4 sm:$0xff] (%p2768_p13)   ;;  %v8081_v7 = vld [vmem:[%s11597_s7 + $0x20] ss:$8 sps:$4 sm:$0xff] (%p2768_p13)  }
 0x568   : >> { %v3768_v2 = vpop.f32.mrb[28].mxu0 }
 0x569   : >> { %v3775_v18 = vadd.f32 %v3768_v2, %v3732_v41  ;;  %v3820_v24 = vpop.f32.mrb[28].mxu1  ;;  %v7885_v11 = vpop.f32.mrb[29].mxu0  ;;  %v8075_v41 = vld [vmem:[%s11597_s7 + $0x10] ss:$8 sps:$4 sm:$0xff] (%p2768_p13)   ;;  %v8084_v2 = vld [vmem:[%s11597_s7 + $0x34] ss:$8 sps:$4 sm:$0xff] (%p2768_p13)  }
 0x56a   : >> { %v7897_v25 = vpop.f32.mrb[29].mxu1  ;;  %v3771_v51 = vpop.f32.mrb[30].mxu0  ;;  %v8088_v11 = vld [vmem:[%s11597_s7 + $0xc4] ss:$8 sps:$4 sm:$0xff] (%p2768_p13)  }
 0x56b   : >> { %v3827_v45 = vadd.f32 %v3820_v24, %v3775_v18  ;;  %v3776_v9 = vadd.f32 %v3771_v51, %v3733_v29  ;;  %v3823_v63 = vpop.f32.mrb[30].mxu1  ;;  %v7886_v6 = vpop.f32.mrb[31].mxu0  ;;  %v8082_v29 = vld [vmem:[%s11597_s7 + $0xb4] ss:$8 sps:$4 sm:$0xff] (%p2768_p13)   ;;  %v8086_v18 = vld [vmem:[%s11597_s7 + $0xb0] ss:$8 sps:$4 sm:$0xff] (%p2768_p13)  }
 0x56c   : >> { %v7898_v12 = vpop.f32.mrb[31].mxu1  ;;  %v8087_v24 = vld [vmem:[%s11597_s7 + $0x30] ss:$8 sps:$4 sm:$0xff] (%p2768_p13)   ;;  %v8090_v25 = vld [vmem:[%s11597_s7 + $0x44] ss:$8 sps:$4 sm:$0xff] (%p2768_p13)  }
 0x56d   : >> { %v3828_v20 = vadd.f32 %v3823_v63, %v3776_v9  ;;  %v8092_v51 = vld [vmem:[%s11597_s7 + $0xc0] ss:$8 sps:$4 sm:$0xff] (%p2768_p13)   ;;  %v8094_v9 = vld [vmem:[%s11597_s7 + $0xd4] ss:$8 sps:$4 sm:$0xff] (%p2768_p13)   ;;  %v8098_v6 = vld [vmem:[%s11597_s7 + $0xd0] ss:$8 sps:$4 sm:$0xff] (%p2768_p13)  }
 0x56e   : > { %v8096_v63 = vld [vmem:[%s11597_s7 + $0x54] ss:$8 sps:$4 sm:$0xff] (%p2768_p13)   ;;  %v8099_v12 = vld [vmem:[%s11597_s7 + $0x50] ss:$8 sps:$4 sm:$0xff] (%p2768_p13)  }
 0x578   : >> { %v3872_v39 = vpop.f32.mrb[32].mxu0 }
 0x579   : >> { %v3879_v54 = vadd.f32 %v3872_v39, %v3827_v45  ;;  %v3920_v10 = vpop.f32.mrb[32].mxu1  ;;  %v7909_v44 = vpop.f32.mrb[33].mxu0  ;;  %v8093_v45 = vld [vmem:[%s11597_s7 + $0x40] ss:$8 sps:$4 sm:$0xff] (%p2768_p13)   ;;  %v8102_v39 = vld [vmem:[%s11597_s7 + $0x64] ss:$8 sps:$4 sm:$0xff] (%p2768_p13)  }
 0x57a   : >> { %v7921_v26 = vpop.f32.mrb[33].mxu1  ;;  %v3875_v40 = vpop.f32.mrb[34].mxu0  ;;  %v8104_v44 = vld [vmem:[%s11597_s7 + $0xe0] ss:$8 sps:$4 sm:$0xff] (%p2768_p13)  }
 0x57b   : >> { %v3927_v23 = vadd.f32 %v3920_v10, %v3879_v54  ;;  %v3880_v5 = vadd.f32 %v3875_v40, %v3828_v20  ;;  %v3923_v61 = vpop.f32.mrb[34].mxu1  ;;  %v7910_v21 = vpop.f32.mrb[35].mxu0  ;;  %v8100_v20 = vld [vmem:[%s11597_s7 + $0xe4] ss:$8 sps:$4 sm:$0xff] (%p2768_p13)   ;;  %v8105_v26 = vld [vmem:[%s11597_s7 + $0x60] ss:$8 sps:$4 sm:$0xff] (%p2768_p13)  }
 0x57c   : >> { %v7922_v59 = vpop.f32.mrb[35].mxu1 }
 0x57d   : >> { %v3929_v37 = vadd.f32 %v9745_v33, %v3927_v23  ;;  %v3928_v52 = vadd.f32 %v3923_v61, %v3880_v5  ;;  %v8108_v23 = vld [vmem:[%s11597_s7 + $0x74] ss:$8 sps:$4 sm:$0xff] (%p2768_p13)   ;;  %v8110_v5 = vld [vmem:[%s11597_s7 + $0xf0] ss:$8 sps:$4 sm:$0xff] (%p2768_p13)  }
 0x57e   : > { %v8111_v59 = vld [vmem:[%s11597_s7 + $0x70] ss:$8 sps:$4 sm:$0xff] (%p2768_p13)  }
 0x57f   : >> { %v3931_v43 = vmax.f32 %v3929_v37, 0.0  ;;  %v3930_v17 = vadd.f32 %v9745_v33, %v3928_v52  ;;  %v8069_v33 = vld [vmem:[%s11597_s7] ss:$8 sps:$4 sm:$0xff] (%p2768_p13)   ;;  %v8117_v37 = vld [vmem:[%s11597_s7 + $0x184] ss:$8 sps:$4 sm:$0xff] (%p2768_p13)  }
 0x581   : >> { %v3933_v4 = vmax.f32 %v3521_v30, %v3931_v43  ;;  %v3932_v14 = vmax.f32 %v3930_v17, 0.0  ;;  %v10308_v30 = vld [vmem:[%s11597_s7 + $0x100] ss:$8 sps:$4 sm:$0xff] (%p2768_p13)   ;;  %v10317_v17 = vld [vmem:[%s11597_s7 + $0x114] ss:$8 sps:$4 sm:$0xff] (%p2768_p13)  }
 0x582   : > { %v8115_v43 = vld [vmem:[%s11597_s7 + $0x180] ss:$8 sps:$4 sm:$0xff] (%p2768_p13)  }
 0x583   : >> { %v3934_v36 = vmax.f32 %v3522_v15, %v3932_v14  ;;  %v8123_v15 = vld [vmem:[%s11597_s7 + $0x194] ss:$8 sps:$4 sm:$0xff] (%p2768_p13)   ;;  %v8121_v14 = vld [vmem:[%s11597_s7 + $0x190] ss:$8 sps:$4 sm:$0xff] (%p2768_p13)  }
 0x585   : >> { %v3935_v42 = vpack.c.bf16 %v3934_v36, %v3933_v4  ;;  %v10326_v4 = vld [vmem:[%s11597_s7 + $0x110] ss:$8 sps:$4 sm:$0xff] (%p2768_p13)   ;;  %v10346_v36 = vld [vmem:[%s11597_s7 + $0x120] ss:$8 sps:$4 sm:$0xff] (%p2768_p13)  }
 0x587   : >> { %v3945_v35 = vand.u32 %v3943_v56, %v3935_v42  ;;  %v10352_v56 = vld [vmem:[%s11597_s7 + $0x1a0] ss:$8 sps:$4 sm:$0xff] (%p2768_p13)   ;;  %v10358_v42 = vld [vmem:[%s11597_s7 + $0x134] ss:$8 sps:$4 sm:$0xff] (%p2768_p13)  }
 0x589   : >> { %7924 = vmatpush3.bf16.msra.mxu0 %v3945_v35  ;;  %7930 = vmatpush3.bf16.msra.mxu1 %v3945_v35  ;;  %v10363_v35 = vld [vmem:[%s11597_s7 + $0x1b4] ss:$8 sps:$4 sm:$0xff] (%p2768_p13)  }
 0x58a   : > { %4157 = vmatprep.subr.bf16.mxu0 (%p2768_p13), %v8064_v16  ;;  %4278 = vmatprep.subr.bf16.mxu1 (%p2768_p13), %v8066_v0  ;;  %v10423_v16 = vld [vmem:[%s11597_s7 + $0x1d0] ss:$8 sps:$4 sm:$0xff] (%p2768_p13)   ;;  %v10430_v0 = vld [vmem:[%s11597_s7 + $0x164] ss:$8 sps:$4 sm:$0xff] (%p2768_p13)  }
 0x58c   : >> { %7926 = vmatmul.mubr.msk.bf16.vlgmr.msra.gmra.mrb[36].mxu0 %vm3936_vm3, %v9749_v31  ;;  %7932 = vmatmul.mubr.msk.bf16.vlgmr.msra.gmra.mrb[36].mxu1 %vm3936_vm3, %v9753_v8  ;;  %v10671_v8 = vld [vmem:[%s11597_s7 + $0x2f0] ss:$8 sps:$4 sm:$0xff] (%p2768_p13)   ;;  %v10676_v31 = vld [vmem:[%s11597_s7 + $0x304] ss:$8 sps:$4 sm:$0xff] (%p2768_p13)  }
 0x58d   : > { %4189 = vmatprep.mubr.bf16.mxu0 (%p2768_p13), %v11630_v34  ;;  %4310 = vmatprep.mubr.bf16.mxu1 (%p2768_p13), %v11630_v34  ;;  %11802 = vst [vmem:[#allocation35_spill] sm:$0xff] (%p2768_p13), %v10671_v8 }
 0x58e   : > { %4158 = vmatpush1.bf16.msra.mxu0 (%p2768_p13), %v8068_v28  ;;  %4279 = vmatpush1.bf16.msra.mxu1 (%p2768_p13), %v8069_v33  ;;  %v10435_v28 = vld [vmem:[%s11597_s7 + $0x1e4] ss:$8 sps:$4 sm:$0xff] (%p2768_p13)   ;;  %v10442_v33 = vld [vmem:[%s11597_s7 + $0x160] ss:$8 sps:$4 sm:$0xff] (%p2768_p13)  }
 0x58f   : > { %4159 = vmatprep.subr.bf16.mxu0 (%p2768_p13), %v8070_v49  ;;  %4280 = vmatprep.subr.bf16.mxu1 (%p2768_p13), %v8072_v62  ;;  %v10447_v49 = vld [vmem:[%s11597_s7 + $0x1e0] ss:$8 sps:$4 sm:$0xff] (%p2768_p13)   ;;  %v10454_v62 = vld [vmem:[%s11597_s7 + $0x174] ss:$8 sps:$4 sm:$0xff] (%p2768_p13)  }
 0x592   : > { %4160 = vmatpush1.bf16.msra.mxu0 (%p2768_p13), %v8074_v22  ;;  %4281 = vmatpush1.bf16.msra.mxu1 (%p2768_p13), %v8075_v41  ;;  %v10459_v22 = vld [vmem:[%s11597_s7 + $0x1f4] ss:$8 sps:$4 sm:$0xff] (%p2768_p13)   ;;  %v10464_v41 = vld [vmem:[%s11597_s7 + $0x170] ss:$8 sps:$4 sm:$0xff] (%p2768_p13)  }
 0x593   : > { %4161 = vmatprep.subr.bf16.mxu0 (%p2768_p13), %v8076_v32  ;;  %4282 = vmatprep.subr.bf16.mxu1 (%p2768_p13), %v8078_v19  ;;  %v10471_v32 = vld [vmem:[%s11597_s7 + $0x1f0] ss:$8 sps:$4 sm:$0xff] (%p2768_p13)  }
 0x596   : > { %4162 = vmatpush1.bf16.msra.mxu0 (%p2768_p13), %v8080_v1  ;;  %4283 = vmatpush1.bf16.msra.mxu1 (%p2768_p13), %v8081_v7  ;;  %v10478_v1 = vld [vmem:[%s11597_s7 + $0x204] ss:$8 sps:$4 sm:$0xff] (%p2768_p13)  }
 0x597   : > { %4163 = vmatprep.subr.bf16.mxu0 (%p2768_p13), %v8082_v29  ;;  %4284 = vmatprep.subr.bf16.mxu1 (%p2768_p13), %v8084_v2  ;;  %v10483_v7 = vld [vmem:[%s11597_s7 + $0x284] ss:$8 sps:$4 sm:$0xff] (%p2768_p13)  }
 0x59a   : > { %4164 = vmatpush1.bf16.msra.mxu0 (%p2768_p13), %v8086_v18  ;;  %4285 = vmatpush1.bf16.msra.mxu1 (%p2768_p13), %v8087_v24  ;;  %v10493_v18 = vld [vmem:[%s11597_s7 + $0x200] ss:$8 sps:$4 sm:$0xff] (%p2768_p13)  }
 0x59b   : > { %4165 = vmatprep.subr.bf16.mxu0 (%p2768_p13), %v8088_v11  ;;  %4286 = vmatprep.subr.bf16.mxu1 (%p2768_p13), %v8090_v25  ;;  %v10498_v24 = vld [vmem:[%s11597_s7 + $0x280] ss:$8 sps:$4 sm:$0xff] (%p2768_p13)   ;;  %v10505_v11 = vld [vmem:[%s11597_s7 + $0x214] ss:$8 sps:$4 sm:$0xff] (%p2768_p13)  }
 0x59c   : > { %v10510_v25 = vld [vmem:[%s11597_s7 + $0x294] ss:$8 sps:$4 sm:$0xff] (%p2768_p13)  }
 0x59d   : > { %11789 = vst [vmem:[#allocation12_spill] sm:$0xff] (%p2768_p13), %v10510_v25 }
 0x59e   : > { %4166 = vmatpush1.bf16.msra.mxu0 (%p2768_p13), %v8092_v51  ;;  %4287 = vmatpush1.bf16.msra.mxu1 (%p2768_p13), %v8093_v45  ;;  %v10518_v51 = vld [vmem:[%s11597_s7 + $0x210] ss:$8 sps:$4 sm:$0xff] (%p2768_p13)  }
 0x59f   : > { %4167 = vmatprep.subr.bf16.mxu0 (%p2768_p13), %v8094_v9  ;;  %4288 = vmatprep.subr.bf16.mxu1 (%p2768_p13), %v8096_v63  ;;  %v10523_v45 = vld [vmem:[%s11597_s7 + $0x290] ss:$8 sps:$4 sm:$0xff] (%p2768_p13)   ;;  %v10530_v9 = vld [vmem:[%s11597_s7 + $0x224] ss:$8 sps:$4 sm:$0xff] (%p2768_p13)  }
 0x5a0   : > { %11790 = vst [vmem:[#allocation15_spill] sm:$0xff] (%p2768_p13), %v10523_v45  ;;  %v10535_v63 = vld [vmem:[%s11597_s7 + $0x2a4] ss:$8 sps:$4 sm:$0xff] (%p2768_p13)  }
 0x5a1   : > { %11791 = vst [vmem:[#allocation10_spill] sm:$0xff] (%p2768_p13), %v10535_v63 }
 0x5a2   : > { %4168 = vmatpush1.bf16.msra.mxu0 (%p2768_p13), %v8098_v6  ;;  %4289 = vmatpush1.bf16.msra.mxu1 (%p2768_p13), %v8099_v12  ;;  %v10544_v6 = vld [vmem:[%s11597_s7 + $0x220] ss:$8 sps:$4 sm:$0xff] (%p2768_p13)  }
 0x5a3   : > { %4169 = vmatprep.subr.bf16.mxu0 (%p2768_p13), %v8100_v20  ;;  %4290 = vmatprep.subr.bf16.mxu1 (%p2768_p13), %v8102_v39  ;;  %v10549_v12 = vld [vmem:[%s11597_s7 + $0x2a0] ss:$8 sps:$4 sm:$0xff] (%p2768_p13)   ;;  %v10556_v20 = vld [vmem:[%s11597_s7 + $0x234] ss:$8 sps:$4 sm:$0xff] (%p2768_p13)  }
 0x5a4   : > { %11792 = vst [vmem:[#allocation13_spill] sm:$0xff] (%p2768_p13), %v10549_v12  ;;  %v10561_v39 = vld [vmem:[%s11597_s7 + $0x2b4] ss:$8 sps:$4 sm:$0xff] (%p2768_p13)  }
 0x5a5   : > { %11793 = vst [vmem:[#allocation26_spill] sm:$0xff] (%p2768_p13), %v10561_v39 }
 0x5a6   : > { %4170 = vmatpush1.bf16.msra.mxu0 (%p2768_p13), %v8104_v44  ;;  %4291 = vmatpush1.bf16.msra.mxu1 (%p2768_p13), %v8105_v26  ;;  %v10580_v44 = vld [vmem:[%s11597_s7 + $0x244] ss:$8 sps:$4 sm:$0xff] (%p2768_p13)  }
 0x5a7   : > { %4171 = vmatprep.subr.bf16.mxu0 (%p2768_p13), %v8106_v13  ;;  %4292 = vmatprep.subr.bf16.mxu1 (%p2768_p13), %v8108_v23  ;;  %v10585_v26 = vld [vmem:[%s11597_s7 + $0x2c4] ss:$8 sps:$4 sm:$0xff] (%p2768_p13)   ;;  %v10597_v13 = vld [vmem:[%s11597_s7 + $0x2c0] ss:$8 sps:$4 sm:$0xff] (%p2768_p13)   ;;  %v10604_v23 = vld [vmem:[%s11597_s7 + $0x254] ss:$8 sps:$4 sm:$0xff] (%p2768_p13)  }
 0x5a8   : > { %11795 = vst [vmem:[#allocation28_spill] sm:$0xff] (%p2768_p13), %v10585_v26  ;;  %11796 = vst [vmem:[#allocation29_spill] sm:$0xff] (%p2768_p13), %v10597_v13 }
 0x5aa   : > { %4172 = vmatpush1.bf16.msra.mxu0 (%p2768_p13), %v8110_v5  ;;  %4293 = vmatpush1.bf16.msra.mxu1 (%p2768_p13), %v8111_v59  ;;  %v10609_v5 = vld [vmem:[%s11597_s7 + $0x2d4] ss:$8 sps:$4 sm:$0xff] (%p2768_p13)   ;;  %v10628_v59 = vld [vmem:[%s11597_s7 + $0x264] ss:$8 sps:$4 sm:$0xff] (%p2768_p13)  }
 0x5ab   : > { %4418 = vmatprep.subr.bf16.mxu0 (%p2768_p13), %v10300_v27  ;;  %4560 = vmatprep.subr.bf16.mxu1 (%p2768_p13), %v8117_v37  ;;  %11797 = vst [vmem:[#allocation30_spill] sm:$0xff] (%p2768_p13), %v10609_v5  ;;  %v10633_v37 = vld [vmem:[%s11597_s7 + $0x2e4] ss:$8 sps:$4 sm:$0xff] (%p2768_p13)  }
 0x5ac   : > { %11799 = vst [vmem:[#allocation32_spill] sm:$0xff] (%p2768_p13), %v10633_v37 }
 0x65c   : > { %2770 = sbr.rel (!%p2768_p13) target bundleno = 1044 (0x414), region = 168 }
 0x65f   : >> { %v3981_v50 = vpop.f32.mrb[36].mxu0  ;;  %v4024_v53 = vpop.f32.mrb[36].mxu1 }
 0x660   : >> { %v4030_v46 = vmax.f32 %v3981_v50, %v4024_v53  ;;  %v7927_v57 = vpop.f32.mrb[37].mxu0  ;;  %v7933_v60 = vpop.f32.mrb[37].mxu1  ;;  %v10370_v50 = vld [vmem:[%s11597_s7 + $0x130] ss:$8 sps:$4 sm:$0xff] (%p2768_p13)  }
 0x661   : >> { %v3984_v58 = vpop.f32.mrb[38].mxu0  ;;  %v4027_v3 = vpop.f32.mrb[38].mxu1  ;;  %v10375_v53 = vld [vmem:[%s11597_s7 + $0x1b0] ss:$8 sps:$4 sm:$0xff] (%p2768_p13)   ;;  %v10387_v57 = vld [vmem:[%s11597_s7 + $0x1c4] ss:$8 sps:$4 sm:$0xff] (%p2768_p13)  }
 0x662   : >> { %4033 = vst [vmem:[%s4032_s30] sm:$0xf] %v4030_v46  ;;  %v7928_v47 = vpop.f32.mrb[39].mxu0  ;;  %v7934_v55 = vpop.f32.mrb[39].mxu1  ;;  %v10382_v46 = vld [vmem:[%s11597_s7 + $0x144] ss:$8 sps:$4 sm:$0xff] (%p2768_p13)   ;;  %s8453_s30 = sshll.u32 (%p2768_p13), %s8546_s29, 4  ;;  %s8454_s30 = int_to_ptr.vmem [resolvable:$false] %s8453_s30 }
 0x663   : > { %v10394_v60 = vld [vmem:[%s11597_s7 + $0x140] ss:$8 sps:$4 sm:$0xff]   ;;  %v10406_v3 = vld [vmem:[%s11597_s7 + $0x154] ss:$8 sps:$4 sm:$0xff]   ;;  %v10418_v55 = vld [vmem:[%s11597_s7 + $0x150] ss:$8 sps:$4 sm:$0xff]   ;;  %p8456_p3 = scmp.lt.s32.totalorder %s11546_s16, %s8454_s30 }
 0x664   : > { %v10399_v58 = vld [vmem:[%s11597_s7 + $0x1c0] ss:$8 sps:$4 sm:$0xff]   ;;  %v10411_v47 = vld [vmem:[%s11597_s7 + $0x1d4] ss:$8 sps:$4 sm:$0xff]   ;;  %s8455_s20 = scalar_lea.vmem %s8454_s30, 32 }
 0x665   : > { %p8457_p4 = scmp.lt.s32.totalorder %s8455_s20, %s8449_s0 }
 0x667   : > { %p8458_p7 = por %p8457_p4, %p8456_p3 }
 0x669   : > { %v4035_v54 = vld [vmem:[#allocation4] sm:$0xf]  ;;  %v4462_v19 = vld [vmem:[#allocation4 + $0x4] sm:$0xf]  ;;  %p8459_p8 = pnand %p8458_p7, %p8452_p2 }
 0x66a   : > { %v10275_v10 = vpack.c.bf16 %v4035_v54, %v4035_v54  ;;  %v10486_v2 = vpack.c.bf16 %v4462_v19, %v4462_v19  ;;  %v10568_v54 = vld [vmem:[%s11597_s7 + $0x230] ss:$8 sps:$4 sm:$0xff]  }
 0x66b   : > { %v10663_v19 = vld [vmem:[%s11597_s7 + $0x270] ss:$8 sps:$4 sm:$0xff]  }
 0x66c   : > { %v4072_v40 = vshll.u32 %v10275_v10, 16  ;;  %v4070_v61 = vshrl.u32 %v10275_v10, 16  ;;  %4311 = vmatmul.mubr.bf16.vlgmr.msra.gmra.mrb[0].mxu1 %v10275_v10  ;;  %v4336_v29 = vrot.slane %v10275_v10, 1  ;;  %v10573_v10 = vld [vmem:[%s11597_s7 + $0x2b0] ss:$8 sps:$4 sm:$0xff]  }
 0x66d   : > { %4561 = vmatpush1.bf16.msra.mxu1 %v8115_v43  ;;  %4592 = vmatprep.mubr.bf16.mxu1 %v11630_v34  ;;  %11794 = vst [vmem:[#allocation27_spill] sm:$0xff] %v10573_v10  ;;  %v4622_v43 = vshll.u32 %v10486_v2, 16 }
 0x66e   : > { %v4074_v21 = vrot.slane %v4072_v40, 1  ;;  %4562 = vmatprep.subr.bf16.mxu1 %v8123_v15  ;;  %v10592_v40 = vld [vmem:[%s11597_s7 + $0x240] ss:$8 sps:$4 sm:$0xff]  }
 0x66f   : > { %v10646_v15 = vld [vmem:[%s11597_s7 + $0x2e0] ss:$8 sps:$4 sm:$0xff]  }
 0x670   : > { %v4075_v52 = vor.u32 %v4074_v21, %v4070_v61  ;;  %v10616_v61 = vld [vmem:[%s11597_s7 + $0x250] ss:$8 sps:$4 sm:$0xff]   ;;  %11800 = vst [vmem:[#allocation33_spill] sm:$0xff] %v10646_v15 }
 0x671   : > { %4563 = vmatpush1.bf16.msra.mxu1 %v8121_v14  ;;  %v10621_v21 = vld [vmem:[%s11597_s7 + $0x2d0] ss:$8 sps:$4 sm:$0xff]   ;;  %v10651_v14 = vld [vmem:[%s11597_s7 + $0x274] ss:$8 sps:$4 sm:$0xff]  }
 0x672   : > { %4190 = vmatmul.mubr.bf16.vlgmr.msra.gmra.mrb[0].mxu0 %v4075_v52  ;;  %4564 = vmatprep.subr.bf16.mxu1 %v8129_v38  ;;  %11798 = vst [vmem:[#allocation31_spill] sm:$0xff] %v10621_v21  ;;  %v10638_v52 = vld [vmem:[%s11597_s7 + $0x260] ss:$8 sps:$4 sm:$0xff]   ;;  %v10658_v38 = vld [vmem:[%s11597_s7 + $0x2f4] ss:$8 sps:$4 sm:$0xff]  }
 0x673   : > { %4419 = vmatpush1.bf16.msra.mxu0 %v10308_v30  ;;  %4450 = vmatprep.mubr.bf16.mxu0 %v11630_v34  ;;  %11801 = vst [vmem:[#allocation34_spill] sm:$0xff] %v10658_v38 }
 0x674   : > { %4420 = vmatprep.subr.bf16.mxu0 %v10317_v17 }
 0x675   : > { %4565 = vmatpush1.bf16.msra.mxu1 %v10352_v56 }
 0x676   : > { %4566 = vmatprep.subr.bf16.mxu1 %v10363_v35 }
 0x677   : > { %4421 = vmatpush1.bf16.msra.mxu0 %v10326_v4 }
 0x678   : > { %4422 = vmatprep.subr.bf16.mxu0 %v10336_v48 }
 0x679   : > { %4567 = vmatpush1.bf16.msra.mxu1 %v10375_v53 }
 0x67a   : > { %4568 = vmatprep.subr.bf16.mxu1 %v10387_v57 }
 0x67b   : > { %4423 = vmatpush1.bf16.msra.mxu0 %v10346_v36 }
 0x67c   : > { %4424 = vmatprep.subr.bf16.mxu0 %v10358_v42 }
 0x67d   : > { %4569 = vmatpush1.bf16.msra.mxu1 %v10399_v58 }
 0x67e   : > { %4570 = vmatprep.subr.bf16.mxu1 %v10411_v47 }
 0x67f   : > { %4425 = vmatpush1.bf16.msra.mxu0 %v10370_v50 }
 0x680   : > { %4426 = vmatprep.subr.bf16.mxu0 %v10382_v46 }
 0x681   : > { %4571 = vmatpush1.bf16.msra.mxu1 %v10423_v16 }
 0x682   : > { %4572 = vmatprep.subr.bf16.mxu1 %v10435_v28 }
 0x683   : > { %4427 = vmatpush1.bf16.msra.mxu0 %v10394_v60 }
 0x684   : > { %4428 = vmatprep.subr.bf16.mxu0 %v10406_v3 }
 0x685   : > { %4573 = vmatpush1.bf16.msra.mxu1 %v10447_v49 }
 0x686   : > { %4574 = vmatprep.subr.bf16.mxu1 %v10459_v22 }
 0x687   : > { %4429 = vmatpush1.bf16.msra.mxu0 %v10418_v55 }
 0x688   : > { %4430 = vmatprep.subr.bf16.mxu0 %v10430_v0 }
 0x689   : > { %4575 = vmatpush1.bf16.msra.mxu1 %v10471_v32 }
 0x68a   : > { %4849 = vmatprep.subr.bf16.mxu1 %v10483_v7 }
 0x68b   : > { %4431 = vmatpush1.bf16.msra.mxu0 %v10442_v33 }
 0x68c   : > { %4432 = vmatprep.subr.bf16.mxu0 %v10454_v62  ;;  %4593 = vmatmul.mubr.bf16.vlgmr.msra.gmra.mrb[4].mxu1 %v10486_v2 }
 0x68d   : > { %4850 = vmatpush1.bf16.msra.mxu1 %v10498_v24  ;;  %4881 = vmatprep.mubr.bf16.mxu1 %v11630_v34 }
 0x68e   : > { %4851 = vmatprep.subr.bf16.mxu1 %v10510_v25 }
 0x68f   : > { %4433 = vmatpush1.bf16.msra.mxu0 %v10464_v41 }
 0x690   : > { %4707 = vmatprep.subr.bf16.mxu0 %v10478_v1 }
 0x691   : > { %4852 = vmatpush1.bf16.msra.mxu1 %v10523_v45 }
 0x692   : > { %4451 = vmatmul.mubr.bf16.vlgmr.msra.gmra.mrb[4].mxu0 %v4336_v29  ;;  %4853 = vmatprep.subr.bf16.mxu1 %v10535_v63  ;;  %v4620_v29 = vshrl.u32 %v10486_v2, 16  ;;  %v10773_v63 = vld [vmem:[%s11597_s7 + $0x3b0] ss:$8 sps:$4 sm:$0xff]  }
 0x693   : > { %4708 = vmatpush1.bf16.msra.mxu0 %v10493_v18  ;;  %4739 = vmatprep.mubr.bf16.mxu0 %v11630_v34  ;;  %v4624_v34 = vrot.slane %v4622_v43, 1  ;;  %v10683_v43 = vld [vmem:[%s11597_s7 + $0x384] ss:$8 sps:$4 sm:$0xff]   ;;  %11818 = vst [vmem:[#allocation49_spill] sm:$0xff] %v10773_v63 }
 0x694   : > { %4709 = vmatprep.subr.bf16.mxu0 %v10505_v11  ;;  %11803 = vst [vmem:[#allocation36_spill] sm:$0xff] %v10683_v43 }
 0x695   : > { %4854 = vmatpush1.bf16.msra.mxu1 %v10549_v12  ;;  %v10768_v12 = vld [vmem:[%s11597_s7 + $0x330] ss:$8 sps:$4 sm:$0xff]  }
 0x696   : > { %4855 = vmatprep.subr.bf16.mxu1 %v10561_v39  ;;  %v4893_v39 = vld [vmem:[#allocation4 + $0x8] sm:$0xf]  ;;  %11817 = vst [vmem:[#allocation48_spill] sm:$0xff] %v10768_v12 }
 0x697   : > { %4710 = vmatpush1.bf16.msra.mxu0 %v10518_v51  ;;  %v10799_v45 = vpack.c.bf16 %v4893_v39, %v4893_v39  ;;  %v10818_v39 = vld [vmem:[%s11597_s7 + $0x350] ss:$8 sps:$4 sm:$0xff]  }
 0x698   : > { %4711 = vmatprep.subr.bf16.mxu0 %v10530_v9  ;;  %11824 = vst [vmem:[#allocation55_spill] sm:$0xff] %v10818_v39 }
 0x699   : > { %4856 = vmatpush1.bf16.msra.mxu1 %v10573_v10  ;;  %v11814_v10 = vmov 0  }
 0x69a   : > { %4857 = vmatprep.subr.bf16.mxu1 %v10585_v26  ;;  %v10747_v26 = vld [vmem:[%s11597_s7 + $0x3a0] ss:$8 sps:$4 sm:$0xff]  }
 0x69b   : > { %4712 = vmatpush1.bf16.msra.mxu0 %v10544_v6  ;;  %11813 = vst [vmem:[#allocation45_spill] sm:$0xff] %v10747_v26 }
 0x69c   : > { %4713 = vmatprep.subr.bf16.mxu0 %v10556_v20 }
 0x69d   : > { %4858 = vmatpush1.bf16.msra.mxu1 %v10597_v13  ;;  %v10728_v13 = vld [vmem:[%s11597_s7 + $0x324] ss:$8 sps:$4 sm:$0xff]  }
 0x69e   : > { %4859 = vmatprep.subr.bf16.mxu1 %v10609_v5  ;;  %v10696_v5 = vld [vmem:[%s11597_s7 + $0x380] ss:$8 sps:$4 sm:$0xff]   ;;  %11810 = vst [vmem:[#allocation42_spill] sm:$0xff] %v10728_v13 }
 0x69f   : > { %4714 = vmatpush1.bf16.msra.mxu0 %v10568_v54  ;;  %11804 = vst [vmem:[#allocation37_spill] sm:$0xff] %v10696_v5 }
 0x6a0   : > { %4715 = vmatprep.subr.bf16.mxu0 %v10580_v44 }
 0x6a1   : > { %4860 = vmatpush1.bf16.msra.mxu1 %v10621_v21  ;;  %v10691_v21 = vld [vmem:[%s11597_s7 + $0x300] ss:$8 sps:$4 sm:$0xff]  }
 0x6a2   : > { %4861 = vmatprep.subr.bf16.mxu1 %v10633_v37  ;;  %v10715_v37 = vld [vmem:[%s11597_s7 + $0x310] ss:$8 sps:$4 sm:$0xff]  }
 0x6a3   : > { %4716 = vmatpush1.bf16.msra.mxu0 %v10592_v40  ;;  %11807 = vst [vmem:[#allocation40_spill] sm:$0xff] %v10715_v37 }
 0x6a4   : > { %4717 = vmatprep.subr.bf16.mxu0 %v10604_v23 }
 0x6a5   : > { %4862 = vmatpush1.bf16.msra.mxu1 %v10646_v15  ;;  %v10685_v15 = vor.u32 %v4624_v34, %v4620_v29  ;;  %v10703_v34 = vld [vmem:[%s11597_s7 + $0x314] ss:$8 sps:$4 sm:$0xff]  }
 0x6a6   : > { %4863 = vmatprep.subr.bf16.mxu1 %v10658_v38  ;;  %11805 = vst [vmem:[#allocation38_spill] sm:$0xff] %v10703_v34  ;;  %v10708_v29 = vld [vmem:[%s11597_s7 + $0x394] ss:$8 sps:$4 sm:$0xff]   ;;  %v11809_v38 = vrot.slane %v10486_v2, 1 }
 0x6a7   : > { %4718 = vmatpush1.bf16.msra.mxu0 %v10616_v61  ;;  %11806 = vst [vmem:[#allocation39_spill] sm:$0xff] %v10708_v29 }
 0x6a8   : > { %4719 = vmatprep.subr.bf16.mxu0 %v10628_v59 }
 0x6a9   : > { %4864 = vmatpush1.bf16.msra.mxu1 %v10671_v8  ;;  %v10720_v8 = vld [vmem:[%s11597_s7 + $0x390] ss:$8 sps:$4 sm:$0xff]  }
 0x6aa   : > { %5138 = vmatprep.subr.bf16.mxu1 %v10683_v43  ;;  %11808 = vst [vmem:[#allocation41_spill] sm:$0xff] %v10720_v8  ;;  %v10733_v43 = vld [vmem:[%s11597_s7 + $0x3a4] ss:$8 sps:$4 sm:$0xff]  }
 0x6ab   : > { %4720 = vmatpush1.bf16.msra.mxu0 %v10638_v52  ;;  %11811 = vst [vmem:[#allocation43_spill] sm:$0xff] %v10733_v43 }
 0x6ac   : > { %4721 = vmatprep.subr.bf16.mxu0 %v10651_v14  ;;  %4882 = vmatmul.mubr.bf16.vlgmr.msra.gmra.mrb[8].mxu1 %v11809_v38  ;;  %v10742_v38 = vld [vmem:[%s11597_s7 + $0x320] ss:$8 sps:$4 sm:$0xff]  }
 0x6ad   : > { %5139 = vmatpush1.bf16.msra.mxu1 %v10696_v5  ;;  %11812 = vst [vmem:[#allocation44_spill] sm:$0xff] %v10742_v38  ;;  %5170 = vmatprep.mubr.bf16.mxu1 %v11814_v10  ;;  %v10754_v5 = vld [vmem:[%s11597_s7 + $0x334] ss:$8 sps:$4 sm:$0xff]  }
 0x6ae   : > { %5140 = vmatprep.subr.bf16.mxu1 %v10708_v29  ;;  %11815 = vst [vmem:[#allocation46_spill] sm:$0xff] %v10754_v5  ;;  %v10759_v29 = vld [vmem:[%s11597_s7 + $0x3b4] ss:$8 sps:$4 sm:$0xff]  }
 0x6af   : > { %4722 = vmatpush1.bf16.msra.mxu0 %v10663_v19  ;;  %11816 = vst [vmem:[#allocation47_spill] sm:$0xff] %v10759_v29 }
 0x6b0   : > { %4991 = vmatprep.subr.bf16.mxu0 %v10676_v31 }
 0x6b1   : > { %5141 = vmatpush1.bf16.msra.mxu1 %v10720_v8  ;;  %v10792_v8 = vld [vmem:[%s11597_s7 + $0x340] ss:$8 sps:$4 sm:$0xff]  }
 0x6b2   : > { %4740 = vmatmul.mubr.bf16.vlgmr.msra.gmra.mrb[8].mxu0 %v10685_v15  ;;  %5142 = vmatprep.subr.bf16.mxu1 %v10733_v43  ;;  %v10783_v43 = vld [vmem:[%s11597_s7 + $0x3c4] ss:$8 sps:$4 sm:$0xff]  }
 0x6b3   : > { %4992 = vmatpush1.bf16.msra.mxu0 %v10691_v21  ;;  %5023 = vmatprep.mubr.bf16.mxu0 %v11814_v10  ;;  %11820 = vst [vmem:[#allocation51_spill] sm:$0xff] %v10783_v43 }
 0x6b4   : > { %4993 = vmatprep.subr.bf16.mxu0 %v10703_v34  ;;  %v10849_v34 = vld [vmem:[%s11597_s7 + $0x3e0] ss:$8 sps:$4 sm:$0xff]  }
 0x6b5   : > { %5143 = vmatpush1.bf16.msra.mxu1 %v10747_v26  ;;  %v10804_v26 = vld [vmem:[%s11597_s7 + $0x354] ss:$8 sps:$4 sm:$0xff]   ;;  %11828 = vst [vmem:[#allocation59_spill] sm:$0xff] %v10849_v34 }
 0x6b6   : > { %5144 = vmatprep.subr.bf16.mxu1 %v10759_v29  ;;  %11822 = vst [vmem:[#allocation53_spill] sm:$0xff] %v10804_v26  ;;  %v10809_v29 = vld [vmem:[%s11597_s7 + $0x3d4] ss:$8 sps:$4 sm:$0xff]  }
 0x6b7   : > { %4994 = vmatpush1.bf16.msra.mxu0 %v10715_v37  ;;  %v10778_v37 = vld [vmem:[%s11597_s7 + $0x344] ss:$8 sps:$4 sm:$0xff]   ;;  %11823 = vst [vmem:[#allocation54_spill] sm:$0xff] %v10809_v29 }
 0x6b8   : > { %4995 = vmatprep.subr.bf16.mxu0 %v10728_v13  ;;  %11819 = vst [vmem:[#allocation50_spill] sm:$0xff] %v10778_v37  ;;  %v10797_v13 = vld [vmem:[%s11597_s7 + $0x3c0] ss:$8 sps:$4 sm:$0xff]  }
 0x6b9   : > { %11821 = vst [vmem:[#allocation52_spill] sm:$0xff] %v10797_v13  ;;  %5145 = vmatpush1.bf16.msra.mxu1 %v10773_v63  ;;  %v10829_v63 = vld [vmem:[%s11597_s7 + $0x364] ss:$8 sps:$4 sm:$0xff]  }
 0x6ba   : > { %5146 = vmatprep.subr.bf16.mxu1 %v10783_v43  ;;  %v10834_v43 = vld [vmem:[%s11597_s7 + $0x3e4] ss:$8 sps:$4 sm:$0xff]  }
 0x6bb   : > { %4996 = vmatpush1.bf16.msra.mxu0 %v10742_v38  ;;  %v5053_v38 = vshll.u32 %v10799_v45, 16  ;;  %11826 = vst [vmem:[#allocation57_spill] sm:$0xff] %v10834_v43 }
 0x6bc   : > { %4997 = vmatprep.subr.bf16.mxu0 %v10754_v5  ;;  %v10823_v5 = vld [vmem:[%s11597_s7 + $0x3d0] ss:$8 sps:$4 sm:$0xff]  }
 0x6bd   : > { %11825 = vst [vmem:[#allocation56_spill] sm:$0xff] %v10823_v5  ;;  %5147 = vmatpush1.bf16.msra.mxu1 %v10797_v13  ;;  %v5055_v25 = vrot.slane %v5053_v38, 1  ;;  %v10854_v13 = vld [vmem:[%s11597_s7 + $0x374] ss:$8 sps:$4 sm:$0xff]   ;;  %v10868_v38 = vld [vmem:[%s11597_s7 + $0x370] ss:$8 sps:$4 sm:$0xff]  }
 0x6be   : > { %5148 = vmatprep.subr.bf16.mxu1 %v10809_v29  ;;  %v10859_v29 = vld [vmem:[%s11597_s7 + $0x3f4] ss:$8 sps:$4 sm:$0xff]  }
 0x6bf   : > { %4998 = vmatpush1.bf16.msra.mxu0 %v10768_v12  ;;  %v10844_v12 = vld [vmem:[%s11597_s7 + $0x360] ss:$8 sps:$4 sm:$0xff]   ;;  %11829 = vst [vmem:[#allocation60_spill] sm:$0xff] %v10859_v29 }
 0x6c0   : > { %4999 = vmatprep.subr.bf16.mxu0 %v10778_v37  ;;  %v5051_v37 = vshrl.u32 %v10799_v45, 16  ;;  %11827 = vst [vmem:[#allocation58_spill] sm:$0xff] %v10844_v12 }
 0x6c1   : > { %5149 = vmatpush1.bf16.msra.mxu1 %v10823_v5 }
 0x6c2   : > { %5150 = vmatprep.subr.bf16.mxu1 %v10834_v43  ;;  %v10887_v43 = vld [vmem:[%s11597_s7 + $0x400] ss:$8 sps:$4 sm:$0xff]   ;;  %v10889_v5 = vor.u32 %v5055_v25, %v5051_v37  ;;  %v10905_v25 = vld [vmem:[%s11597_s7 + $0x410] ss:$8 sps:$4 sm:$0xff]   ;;  %v10912_v37 = vld [vmem:[%s11597_s7 + $0x424] ss:$8 sps:$4 sm:$0xff]  }
 0x6c3   : > { %5000 = vmatpush1.bf16.msra.mxu0 %v10792_v8  ;;  %11831 = vst [vmem:[#allocation62_spill] sm:$0xff] %v10887_v43  ;;  %11833 = vst [vmem:[#allocation64_spill] sm:$0xff] %v10905_v25 }
 0x6c4   : > { %5001 = vmatprep.subr.bf16.mxu0 %v10804_v26  ;;  %v10873_v26 = vld [vmem:[%s11597_s7 + $0x3f0] ss:$8 sps:$4 sm:$0xff]  }
 0x6c5   : > { %11830 = vst [vmem:[#allocation61_spill] sm:$0xff] %v10873_v26  ;;  %5151 = vmatpush1.bf16.msra.mxu1 %v10849_v34  ;;  %v10925_v34 = vld [vmem:[%s11597_s7 + $0x420] ss:$8 sps:$4 sm:$0xff]  }
 0x6c6   : > { %5152 = vmatprep.subr.bf16.mxu1 %v10859_v29  ;;  %v8412_v29 = vld [vmem:[%s11597_s7 + $0x84] ss:$8 sps:$4 sm:$0xff]   ;;  %11834 = vst [vmem:[#allocation65_spill] sm:$0xff] %v10925_v34 }
 0x6c7   : > { %5002 = vmatpush1.bf16.msra.mxu0 %v10818_v39  ;;  %v10878_v39 = vld [vmem:[%s11597_s7 + $0x404] ss:$8 sps:$4 sm:$0xff]  }
 0x6c8   : > { %5003 = vmatprep.subr.bf16.mxu0 %v10829_v63 }
 0x6c9   : > { %5153 = vmatpush1.bf16.msra.mxu1 %v10873_v26  ;;  %v8414_v26 = vld [vmem:[%s11597_s7 + $0x94] ss:$8 sps:$4 sm:$0xff]  }
 0x6ca   : > { %5338 = vmatprep.subr.bf16.mxu1 %v8412_v29  ;;  %v8413_v29 = vld [vmem:[%s11597_s7 + $0x80] ss:$8 sps:$4 sm:$0xff]  }
 0x6cb   : > { %5004 = vmatpush1.bf16.msra.mxu0 %v10844_v12  ;;  %v10896_v12 = vld [vmem:[%s11597_s7 + $0x414] ss:$8 sps:$4 sm:$0xff]  }
 0x6cc   : > { %5005 = vmatprep.subr.bf16.mxu0 %v10854_v13  ;;  %11832 = vst [vmem:[#allocation63_spill] sm:$0xff] %v10896_v12  ;;  %5171 = vmatmul.mubr.bf16.vlgmr.msra.gmra.mrb[12].mxu1 %v10889_v5 }
 0x6cd   : > { %5339 = vmatpush1.bf16.msra.mxu1 %v8413_v29  ;;  %5370 = vmatprep.mubr.bf16.mxu1 %v11814_v10  ;;  %v10932_v29 = vld [vmem:[%s11597_s7 + $0x434] ss:$8 sps:$4 sm:$0xff]  }
 0x6ce   : > { %5340 = vmatprep.subr.bf16.mxu1 %v8414_v26  ;;  %11835 = vst [vmem:[#allocation66_spill] sm:$0xff] %v10932_v29  ;;  %v8415_v26 = vld [vmem:[%s11597_s7 + $0x90] ss:$8 sps:$4 sm:$0xff]  }
 0x6cf   : > { %5006 = vmatpush1.bf16.msra.mxu0 %v10868_v38 }
 0x6d0   : > { %5280 = vmatprep.subr.bf16.mxu0 %v10878_v39 }
 0x6d1   : > { %5341 = vmatpush1.bf16.msra.mxu1 %v8415_v26  ;;  %v8418_v26 = vld [vmem:[%s11597_s7 + $0xb4] ss:$8 sps:$4 sm:$0xff]  }
 0x6d2   : > { %5024 = vmatmul.mubr.bf16.vlgmr.msra.gmra.mrb[12].mxu0 %v10799_v45 }
 0x6d3   : > { %5281 = vmatpush1.bf16.msra.mxu0 %v10887_v43  ;;  %5312 = vmatprep.mubr.bf16.mxu0 %v11814_v10  ;;  %v8417_v43 = vld [vmem:[%s11597_s7 + $0xa0] ss:$8 sps:$4 sm:$0xff]  }
 0x6d4   : > { %5282 = vmatprep.subr.bf16.mxu0 %v10896_v12  ;;  %v8416_v12 = vld [vmem:[%s11597_s7 + $0xa4] ss:$8 sps:$4 sm:$0xff]  }
 0x6d5   : > { %5342 = vmatprep.subr.bf16.mxu1 %v8416_v12  ;;  %v10958_v12 = vld [vmem:[%s11597_s7 + $0x444] ss:$8 sps:$4 sm:$0xff]  }
 0x6d6   : > { %5343 = vmatpush1.bf16.msra.mxu1 %v8417_v43  ;;  %11837 = vst [vmem:[#allocation68_spill] sm:$0xff] %v10958_v12  ;;  %v8419_v43 = vld [vmem:[%s11597_s7 + $0xb0] ss:$8 sps:$4 sm:$0xff]  }
 0x6d7   : > { %5283 = vmatpush1.bf16.msra.mxu0 %v10905_v25  ;;  %v10949_v25 = vld [vmem:[%s11597_s7 + $0x430] ss:$8 sps:$4 sm:$0xff]   ;;  %5344 = vmatprep.subr.bf16.mxu1 %v8418_v26  ;;  %v8420_v26 = vld [vmem:[%s11597_s7 + $0xc4] ss:$8 sps:$4 sm:$0xff]  }
 0x6d8   : > { %5284 = vmatprep.subr.bf16.mxu0 %v10912_v37  ;;  %11836 = vst [vmem:[#allocation67_spill] sm:$0xff] %v10949_v25 }
 0x6da   : > { %5345 = vmatpush1.bf16.msra.mxu1 %v8419_v43  ;;  %v8421_v43 = vld [vmem:[%s11597_s7 + $0xc0] ss:$8 sps:$4 sm:$0xff]  }
 0x6db   : > { %5285 = vmatpush1.bf16.msra.mxu0 %v10925_v34  ;;  %5346 = vmatprep.subr.bf16.mxu1 %v8420_v26  ;;  %v8422_v26 = vld [vmem:[%s11597_s7 + $0xd4] ss:$8 sps:$4 sm:$0xff]   ;;  %v5198_v34 = vrot.slane %v10799_v45, 1 }
 0x6dc   : > { %5286 = vmatprep.subr.bf16.mxu0 %v10932_v29  ;;  %v10967_v29 = vld [vmem:[%s11597_s7 + $0x440] ss:$8 sps:$4 sm:$0xff]  }
 0x6dd   : > { %11838 = vst [vmem:[#allocation69_spill] sm:$0xff] %v10967_v29 }
 0x6de   : > { %5347 = vmatpush1.bf16.msra.mxu1 %v8421_v43  ;;  %v8423_v43 = vld [vmem:[%s11597_s7 + $0xd0] ss:$8 sps:$4 sm:$0xff]  }
 0x6df   : > { %5287 = vmatpush1.bf16.msra.mxu0 %v10949_v25  ;;  %v10976_v25 = vld [vmem:[%s11597_s7 + $0x454] ss:$8 sps:$4 sm:$0xff]   ;;  %5348 = vmatprep.subr.bf16.mxu1 %v8422_v26  ;;  %v8424_v26 = vld [vmem:[%s11597_s7 + $0xe4] ss:$8 sps:$4 sm:$0xff]  }
 0x6e0   : > { %5288 = vmatprep.subr.bf16.mxu0 %v10958_v12  ;;  %11839 = vst [vmem:[#allocation70_spill] sm:$0xff] %v10976_v25  ;;  %v10985_v12 = vld [vmem:[%s11597_s7 + $0x450] ss:$8 sps:$4 sm:$0xff]  }
 0x6e1   : > { %11840 = vst [vmem:[#allocation71_spill] sm:$0xff] %v10985_v12 }
 0x6e2   : > { %5349 = vmatpush1.bf16.msra.mxu1 %v8423_v43  ;;  %v8425_v43 = vld [vmem:[%s11597_s7 + $0xe0] ss:$8 sps:$4 sm:$0xff]  }
 0x6e3   : > { %5289 = vmatpush1.bf16.msra.mxu0 %v10967_v29  ;;  %v10994_v29 = vld [vmem:[%s11597_s7 + $0x464] ss:$8 sps:$4 sm:$0xff]   ;;  %5350 = vmatprep.subr.bf16.mxu1 %v8424_v26  ;;  %v8426_v26 = vld [vmem:[%s11597_s7 + $0xf4] ss:$8 sps:$4 sm:$0xff]  }
 0x6e4   : > { %5290 = vmatprep.subr.bf16.mxu0 %v10976_v25  ;;  %11841 = vst [vmem:[#allocation72_spill] sm:$0xff] %v10994_v29  ;;  %v11003_v25 = vld [vmem:[%s11597_s7 + $0x460] ss:$8 sps:$4 sm:$0xff]  }
 0x6e5   : > { %11842 = vst [vmem:[#allocation73_spill] sm:$0xff] %v11003_v25 }
 0x6e6   : > { %5351 = vmatpush1.bf16.msra.mxu1 %v8425_v43  ;;  %v8427_v43 = vld [vmem:[%s11597_s7 + $0xf0] ss:$8 sps:$4 sm:$0xff]  }
 0x6e7   : > { %5291 = vmatpush1.bf16.msra.mxu0 %v10985_v12  ;;  %v11012_v12 = vld [vmem:[%s11597_s7 + $0x474] ss:$8 sps:$4 sm:$0xff]   ;;  %5352 = vmatprep.subr.bf16.mxu1 %v8426_v26  ;;  %v8429_v26 = vld [vmem:[%s11597_s7] ss:$8 sps:$4 sm:$0xff]  }
 0x6e8   : > { %5292 = vmatprep.subr.bf16.mxu0 %v10994_v29  ;;  %v11021_v29 = vld [vmem:[%s11597_s7 + $0x470] ss:$8 sps:$4 sm:$0xff]  }
 0x6ea   : > { %5353 = vmatpush1.bf16.msra.mxu1 %v8427_v43  ;;  %v8430_v43 = vld [vmem:[%s11597_s7 + $0x14] ss:$8 sps:$4 sm:$0xff]  }
 0x6eb   : > { %5293 = vmatpush1.bf16.msra.mxu0 %v11003_v25  ;;  %v8428_v25 = vld [vmem:[%s11597_s7 + $0x4] ss:$8 sps:$4 sm:$0xff]   ;;  %5420 = vmatprep.subr.bf16.mxu1 %v10300_v27  ;;  %v8431_v27 = vld [vmem:[%s11597_s7 + $0x10] ss:$8 sps:$4 sm:$0xff]  }
 0x6ec   : > { %5294 = vmatprep.subr.bf16.mxu0 %v11012_v12 }
 0x6ed   : > { %5371 = vmatmul.mubr.bf16.vlgmr.msra.gmra.mrb[16].mxu1 %v10685_v15  ;;  %v8434_v15 = vld [vmem:[%s11597_s7 + $0x34] ss:$8 sps:$4 sm:$0xff]  }
 0x6ee   : > { %5421 = vmatpush1.bf16.msra.mxu1 %v10308_v30  ;;  %5452 = vmatprep.mubr.bf16.mxu1 %v11814_v10  ;;  %v8432_v30 = vld [vmem:[%s11597_s7 + $0x24] ss:$8 sps:$4 sm:$0xff]  }
 0x6ef   : > { %5295 = vmatpush1.bf16.msra.mxu0 %v11021_v29  ;;  %5422 = vmatprep.subr.bf16.mxu1 %v10317_v17  ;;  %v8433_v17 = vld [vmem:[%s11597_s7 + $0x20] ss:$8 sps:$4 sm:$0xff]  }
 0x6f0   : > { %5379 = vmatprep.subr.bf16.mxu0 %v8428_v25  ;;  %v5593_v25 = vld [vmem:[#allocation4 + $0xc] sm:$0xf] }
 0x6f2   : > { %5313 = vmatmul.mubr.bf16.vlgmr.msra.gmra.mrb[16].mxu0 %v5198_v34  ;;  %5423 = vmatpush1.bf16.msra.mxu1 %v10326_v4  ;;  %v8435_v4 = vld [vmem:[%s11597_s7 + $0x30] ss:$8 sps:$4 sm:$0xff]  }
 0x6f3   : > { %5380 = vmatpush1.bf16.msra.mxu0 %v8429_v26  ;;  %5411 = vmatprep.mubr.bf16.mxu0 %v11814_v10  ;;  %v11866_v26 = vld [vmem:[#allocation34_spill] sm:$0xff] }
 0x6f4   : > { %5381 = vmatprep.subr.bf16.mxu0 %v8430_v43  ;;  %5424 = vmatprep.subr.bf16.mxu1 %v10336_v48  ;;  %v8436_v48 = vld [vmem:[%s11597_s7 + $0x44] ss:$8 sps:$4 sm:$0xff]   ;;  %v5594_v43 = vpack.c.bf16 %v5593_v25, %v5593_v25 }
 0x6f6   : > { %5425 = vmatpush1.bf16.msra.mxu1 %v10346_v36  ;;  %v8437_v36 = vld [vmem:[%s11597_s7 + $0x40] ss:$8 sps:$4 sm:$0xff]  }
 0x6f7   : > { %5382 = vmatpush1.bf16.msra.mxu0 %v8431_v27  ;;  %5426 = vmatprep.subr.bf16.mxu1 %v10358_v42  ;;  %v8438_v42 = vld [vmem:[%s11597_s7 + $0x54] ss:$8 sps:$4 sm:$0xff]   ;;  %v11867_v27 = vld [vmem:[#allocation35_spill] sm:$0xff] }
 0x6f8   : > { %5383 = vmatprep.subr.bf16.mxu0 %v8432_v30  ;;  %v11868_v30 = vld [vmem:[#allocation36_spill] sm:$0xff] }
 0x6fa   : > { %5427 = vmatpush1.bf16.msra.mxu1 %v10370_v50  ;;  %v8439_v50 = vld [vmem:[%s11597_s7 + $0x50] ss:$8 sps:$4 sm:$0xff]  }
 0x6fb   : > { %5384 = vmatpush1.bf16.msra.mxu0 %v8433_v17  ;;  %5428 = vmatprep.subr.bf16.mxu1 %v10382_v46  ;;  %v8440_v46 = vld [vmem:[%s11597_s7 + $0x64] ss:$8 sps:$4 sm:$0xff]   ;;  %v11870_v17 = vld [vmem:[#allocation62_spill] sm:$0xff] }
 0x6fc   : > { %5385 = vmatprep.subr.bf16.mxu0 %v8434_v15  ;;  %v11871_v15 = vld [vmem:[#allocation39_spill] sm:$0xff] }
 0x6fe   : > { %5429 = vmatpush1.bf16.msra.mxu1 %v10394_v60  ;;  %v8441_v60 = vld [vmem:[%s11597_s7 + $0x60] ss:$8 sps:$4 sm:$0xff]  }
 0x6ff   : > { %5386 = vmatpush1.bf16.msra.mxu0 %v8435_v4  ;;  %5430 = vmatprep.subr.bf16.mxu1 %v10406_v3  ;;  %v8442_v3 = vld [vmem:[%s11597_s7 + $0x74] ss:$8 sps:$4 sm:$0xff]   ;;  %v11874_v4 = vld [vmem:[#allocation64_spill] sm:$0xff] }
 0x700   : > { %5387 = vmatprep.subr.bf16.mxu0 %v8436_v48  ;;  %v11878_v48 = vld [vmem:[#allocation47_spill] sm:$0xff] }
 0x702   : > { %5431 = vmatpush1.bf16.msra.mxu1 %v10418_v55  ;;  %v8443_v55 = vld [vmem:[%s11597_s7 + $0x70] ss:$8 sps:$4 sm:$0xff]  }
 0x703   : > { %5388 = vmatpush1.bf16.msra.mxu0 %v8437_v36  ;;  %5432 = vmatprep.subr.bf16.mxu1 %v10430_v0  ;;  %v8444_v0 = vld [vmem:[%s11597_s7 + $0x184] ss:$8 sps:$4 sm:$0xff]   ;;  %v11879_v36 = vld [vmem:[#allocation66_spill] sm:$0xff] }
 0x704   : > { %5389 = vmatprep.subr.bf16.mxu0 %v8438_v42  ;;  %v11880_v42 = vld [vmem:[#allocation49_spill] sm:$0xff] }
 0x706   : > { %5433 = vmatpush1.bf16.msra.mxu1 %v10442_v33  ;;  %v11843_v33 = vrot.slane %v10486_v2, 1 }
 0x707   : > { %5390 = vmatpush1.bf16.msra.mxu0 %v8439_v50  ;;  %5434 = vmatprep.subr.bf16.mxu1 %v10454_v62  ;;  %v8445_v62 = vld [vmem:[%s11597_s7 + $0x180] ss:$8 sps:$4 sm:$0xff]  }
 0x708   : > { %5391 = vmatprep.subr.bf16.mxu0 %v8440_v46  ;;  %v11881_v50 = vld [vmem:[#allocation67_spill] sm:$0xff] }
 0x709   : > { %v11882_v46 = vld [vmem:[#allocation51_spill] sm:$0xff] }
 0x70a   : > { %5435 = vmatpush1.bf16.msra.mxu1 %v10464_v41  ;;  %v8446_v41 = vld [vmem:[%s11597_s7 + $0x194] ss:$8 sps:$4 sm:$0xff]  }
 0x70b   : > { %5392 = vmatpush1.bf16.msra.mxu0 %v8441_v60  ;;  %5506 = vmatprep.subr.bf16.mxu1 %v10478_v1  ;;  %v8447_v1 = vld [vmem:[%s11597_s7 + $0x190] ss:$8 sps:$4 sm:$0xff]  }
 0x70c   : > { %5393 = vmatprep.subr.bf16.mxu0 %v8442_v3  ;;  %v11883_v60 = vld [vmem:[#allocation68_spill] sm:$0xff] }
 0x70d   : > { %5453 = vmatmul.mubr.bf16.vlgmr.msra.gmra.mrb[20].mxu1 %v11843_v33  ;;  %v11884_v3 = vld [vmem:[#allocation52_spill] sm:$0xff] }
 0x70e   : > { %5507 = vmatpush1.bf16.msra.mxu1 %v10493_v18  ;;  %5538 = vmatprep.mubr.bf16.mxu1 %v11814_v10  ;;  %v11857_v18 = vld [vmem:[#allocation50_spill] sm:$0xff] }
 0x70f   : > { %5394 = vmatpush1.bf16.msra.mxu0 %v8443_v55  ;;  %5508 = vmatprep.subr.bf16.mxu1 %v10505_v11  ;;  %v11859_v11 = vld [vmem:[#allocation30_spill] sm:$0xff]  ;;  %v11885_v55 = vld [vmem:[#allocation69_spill] sm:$0xff] }
 0x710   : > { %5463 = vmatprep.subr.bf16.mxu0 %v8444_v0  ;;  %v11887_v0 = vld [vmem:[#allocation70_spill] sm:$0xff] }
 0x712   : > { %5412 = vmatmul.mubr.bf16.vlgmr.msra.gmra.mrb[20].mxu0 %v10486_v2  ;;  %5509 = vmatpush1.bf16.msra.mxu1 %v10518_v51  ;;  %v8448_v2 = vld [vmem:[%s11597_s7 + $0x1a4] ss:$8 sps:$4 sm:$0xff]   ;;  %v11860_v51 = vld [vmem:[#allocation53_spill] sm:$0xff] }
 0x713   : > { %5464 = vmatpush1.bf16.msra.mxu0 %v8445_v62  ;;  %5495 = vmatprep.mubr.bf16.mxu0 %v11814_v10 }
 0x714   : > { %5465 = vmatprep.subr.bf16.mxu0 %v8446_v41  ;;  %5510 = vmatprep.subr.bf16.mxu1 %v10530_v9 }
 0x716   : > { %5511 = vmatpush1.bf16.msra.mxu1 %v10544_v6 }
 0x717   : > { %5466 = vmatpush1.bf16.msra.mxu0 %v8447_v1  ;;  %5512 = vmatprep.subr.bf16.mxu1 %v10556_v20 }
 0x718   : > { %5467 = vmatprep.subr.bf16.mxu0 %v8448_v2 }
 0x71a   : > { %5513 = vmatpush1.bf16.msra.mxu1 %v10568_v54 }
 0x71b   : > { %5468 = vmatpush1.bf16.msra.mxu0 %v10352_v56  ;;  %5514 = vmatprep.subr.bf16.mxu1 %v10580_v44  ;;  %v11844_v56 = vld [vmem:[#allocation12_spill] sm:$0xff] }
 0x71c   : > { %5469 = vmatprep.subr.bf16.mxu0 %v10363_v35  ;;  %v11845_v35 = vld [vmem:[#allocation38_spill] sm:$0xff] }
 0x71e   : > { %5515 = vmatpush1.bf16.msra.mxu1 %v10592_v40 }
 0x71f   : > { %5470 = vmatpush1.bf16.msra.mxu0 %v10375_v53  ;;  %5516 = vmatprep.subr.bf16.mxu1 %v10604_v23  ;;  %v11846_v53 = vld [vmem:[#allocation15_spill] sm:$0xff] }
 0x720   : > { %5471 = vmatprep.subr.bf16.mxu0 %v10387_v57  ;;  %v11847_v57 = vld [vmem:[#allocation40_spill] sm:$0xff] }
 0x722   : > { %5517 = vmatpush1.bf16.msra.mxu1 %v10616_v61  ;;  %v11861_v61 = vld [vmem:[#allocation31_spill] sm:$0xff] }
 0x723   : > { %5472 = vmatpush1.bf16.msra.mxu0 %v10399_v58  ;;  %5518 = vmatprep.subr.bf16.mxu1 %v10628_v59  ;;  %v11849_v58 = vld [vmem:[#allocation42_spill] sm:$0xff] }
 0x724   : > { %5473 = vmatprep.subr.bf16.mxu0 %v10411_v47  ;;  %v11850_v47 = vld [vmem:[#allocation13_spill] sm:$0xff] }
 0x726   : > { %5519 = vmatpush1.bf16.msra.mxu1 %v10638_v52 }
 0x727   : > { %5474 = vmatpush1.bf16.msra.mxu0 %v10423_v16  ;;  %5520 = vmatprep.subr.bf16.mxu1 %v10651_v14  ;;  %v11851_v16 = vld [vmem:[#allocation44_spill] sm:$0xff] }
 0x728   : > { %5475 = vmatprep.subr.bf16.mxu0 %v10435_v28  ;;  %v11852_v28 = vld [vmem:[#allocation26_spill] sm:$0xff]  ;;  %v11863_v14 = vld [vmem:[#allocation32_spill] sm:$0xff] }
 0x72a   : > { %5521 = vmatpush1.bf16.msra.mxu1 %v10663_v19  ;;  %v11865_v19 = vld [vmem:[#allocation58_spill] sm:$0xff] }
 0x72b   : > { %5476 = vmatpush1.bf16.msra.mxu0 %v10447_v49  ;;  %5595 = vmatprep.subr.bf16.mxu1 %v10676_v31  ;;  %v11848_v31 = vld [vmem:[#allocation10_spill] sm:$0xff]  ;;  %v11853_v49 = vld [vmem:[#allocation46_spill] sm:$0xff] }
 0x72c   : > { %5477 = vmatprep.subr.bf16.mxu0 %v10459_v22  ;;  %v11854_v22 = vld [vmem:[#allocation27_spill] sm:$0xff] }
 0x72d   : > { %5539 = vmatmul.mubr.bf16.vlgmr.msra.gmra.mrb[24].mxu1 %v10889_v5 }
 0x72e   : > { %5596 = vmatpush1.bf16.msra.mxu1 %v10691_v21  ;;  %5627 = vmatprep.mubr.bf16.mxu1 %v11814_v10  ;;  %v11862_v21 = vld [vmem:[#allocation55_spill] sm:$0xff] }
 0x72f   : > { %5478 = vmatpush1.bf16.msra.mxu0 %v10471_v32  ;;  %5597 = vmatprep.subr.bf16.mxu1 %v11845_v35  ;;  %v11855_v32 = vld [vmem:[#allocation48_spill] sm:$0xff] }
 0x730   : > { %5549 = vmatprep.subr.bf16.mxu0 %v10483_v7  ;;  %v11856_v7 = vld [vmem:[#allocation28_spill] sm:$0xff] }
 0x732   : > { %5496 = vmatmul.mubr.bf16.vlgmr.msra.gmra.mrb[24].mxu0 %v10799_v45  ;;  %5598 = vmatpush1.bf16.msra.mxu1 %v11847_v57  ;;  %v11876_v45 = vld [vmem:[#allocation45_spill] sm:$0xff] }
 0x733   : > { %5550 = vmatpush1.bf16.msra.mxu0 %v10498_v24  ;;  %5581 = vmatprep.mubr.bf16.mxu0 %v11814_v10  ;;  %v11858_v24 = vld [vmem:[#allocation29_spill] sm:$0xff] }
 0x734   : > { %5551 = vmatprep.subr.bf16.mxu0 %v11844_v56  ;;  %5599 = vmatprep.subr.bf16.mxu1 %v11849_v58  ;;  %v5641_v56 = vshll.u32 %v5594_v43, 16  ;;  %v11889_v58 = vld [vmem:[#allocation71_spill] sm:$0xff] }
 0x736   : > { %5600 = vmatpush1.bf16.msra.mxu1 %v11851_v16 }
 0x737   : > { %5552 = vmatpush1.bf16.msra.mxu0 %v11846_v53  ;;  %5601 = vmatprep.subr.bf16.mxu1 %v11853_v49  ;;  %v11890_v49 = vld [vmem:[#allocation57_spill] sm:$0xff] }
 0x738   : > { %5553 = vmatprep.subr.bf16.mxu0 %v11848_v31  ;;  %v11888_v31 = vld [vmem:[#allocation56_spill] sm:$0xff] }
 0x73a   : > { %5602 = vmatpush1.bf16.msra.mxu1 %v11855_v32 }
 0x73b   : > { %5554 = vmatpush1.bf16.msra.mxu0 %v11850_v47  ;;  %5603 = vmatprep.subr.bf16.mxu1 %v11857_v18  ;;  %v5643_v18 = vrot.slane %v5641_v56, 1 }
 0x73c   : > { %5555 = vmatprep.subr.bf16.mxu0 %v11852_v28 }
 0x73e   : > { %5604 = vmatpush1.bf16.msra.mxu1 %v10792_v8  ;;  %v11864_v8 = vld [vmem:[#allocation33_spill] sm:$0xff] }
 0x73f   : > { %5556 = vmatpush1.bf16.msra.mxu0 %v11854_v22  ;;  %5605 = vmatprep.subr.bf16.mxu1 %v11860_v51  ;;  %v4312_v6 = vpop.f32.mrb[0].mxu1  ;;  %v11891_v22 = vld [vmem:[#allocation72_spill] sm:$0xff] }
 0x740   : > { %5557 = vmatprep.subr.bf16.mxu0 %v11856_v7  ;;  %v4314_v44 = vpop.f32.mrb[1].mxu1  ;;  %v5639_v7 = vshrl.u32 %v5594_v43, 16  ;;  %v11894_v51 = vld [vmem:[#allocation60_spill] sm:$0xff] }
 0x741   : > { %v4316_v5 = vpop.f32.mrb[2].mxu1 }
 0x742   : > { %5606 = vmatpush1.bf16.msra.mxu1 %v11862_v21  ;;  %v4317_v52 = vpop.f32.mrb[3].mxu1 }
 0x743   : > { %5558 = vmatpush1.bf16.msra.mxu0 %v11858_v24  ;;  %5607 = vmatprep.subr.bf16.mxu1 %v10829_v63  ;;  %v11869_v63 = vld [vmem:[#allocation37_spill] sm:$0xff]  ;;  %v11892_v24 = vld [vmem:[#allocation59_spill] sm:$0xff] }
 0x744   : > { %5559 = vmatprep.subr.bf16.mxu0 %v11859_v11  ;;  %v11893_v11 = vld [vmem:[#allocation73_spill] sm:$0xff] }
 0x745   : > { %v4191_v9 = vpop.f32.mrb[0].mxu0 }
 0x746   : > { %v4313_v20 = vadd.f32 %v4312_v6, %v4191_v9  ;;  %v4193_v54 = vpop.f32.mrb[1].mxu0  ;;  %5608 = vmatpush1.bf16.msra.mxu1 %v11865_v19  ;;  %v5644_v9 = vor.u32 %v5643_v18, %v5639_v7  ;;  %v5690_v6 = vrot.slane %v5594_v43, 1 }
 0x747   : > { %v4315_v40 = vadd.f32 %v4314_v44, %v4193_v54  ;;  %v4195_v23 = vpop.f32.mrb[2].mxu0  ;;  %5560 = vmatpush1.bf16.msra.mxu0 %v11861_v61  ;;  %5609 = vmatprep.subr.bf16.mxu1 %v10854_v13  ;;  %v11872_v13 = vld [vmem:[#allocation63_spill] sm:$0xff] }
 0x748   : > { %v4196_v59 = vpop.f32.mrb[3].mxu0  ;;  %5561 = vmatprep.subr.bf16.mxu0 %v11863_v14 }
 0x74a   : > { %5610 = vmatpush1.bf16.msra.mxu1 %v10868_v38  ;;  %v11873_v38 = vld [vmem:[#allocation41_spill] sm:$0xff] }
 0x74b   : > { %5562 = vmatpush1.bf16.msra.mxu0 %v11864_v8  ;;  %5692 = vmatprep.subr.bf16.mxu1 %v10878_v39  ;;  %v11875_v39 = vld [vmem:[#allocation43_spill] sm:$0xff] }
 0x74c   : > { %5563 = vmatprep.subr.bf16.mxu0 %v11866_v26 }
 0x74d   : > { %5628 = vmatmul.mubr.bf16.vlgmr.msra.gmra.mrb[28].mxu1 %v5594_v43 }
 0x74e   : > { %5693 = vmatpush1.bf16.msra.mxu1 %v11870_v17  ;;  %5724 = vmatprep.mubr.bf16.mxu1 %v11814_v10 }
 0x74f   : > { %5564 = vmatpush1.bf16.msra.mxu0 %v11867_v27  ;;  %5694 = vmatprep.subr.bf16.mxu1 %v11872_v13 }
 0x750   : > { %5646 = vmatprep.subr.bf16.mxu0 %v11868_v30 }
 0x752   : > { %5582 = vmatmul.mubr.bf16.vlgmr.msra.gmra.mrb[28].mxu0 %v5198_v34  ;;  %5695 = vmatpush1.bf16.msra.mxu1 %v11874_v4  ;;  %v11877_v34 = vld [vmem:[#allocation65_spill] sm:$0xff] }
 0x753   : > { %5647 = vmatpush1.bf16.msra.mxu0 %v11869_v63  ;;  %5678 = vmatprep.mubr.bf16.mxu0 %v11814_v10 }
 0x754   : > { %5648 = vmatprep.subr.bf16.mxu0 %v11871_v15  ;;  %5696 = vmatprep.subr.bf16.mxu1 %v10912_v37  ;;  %v11886_v37 = vld [vmem:[#allocation54_spill] sm:$0xff] }
 0x756   : > { %5697 = vmatpush1.bf16.msra.mxu1 %v11877_v34 }
 0x757   : > { %5649 = vmatpush1.bf16.msra.mxu0 %v11873_v38  ;;  %5698 = vmatprep.subr.bf16.mxu1 %v11879_v36 }
 0x758   : > { %5650 = vmatprep.subr.bf16.mxu0 %v11875_v39 }
 0x75a   : > { %5699 = vmatpush1.bf16.msra.mxu1 %v11881_v50 }
 0x75b   : > { %5651 = vmatpush1.bf16.msra.mxu0 %v11876_v45  ;;  %5700 = vmatprep.subr.bf16.mxu1 %v11883_v60 }
 0x75c   : > { %5652 = vmatprep.subr.bf16.mxu0 %v11878_v48 }
 0x75e   : > { %5701 = vmatpush1.bf16.msra.mxu1 %v11885_v55 }
 0x75f   : > { %5653 = vmatpush1.bf16.msra.mxu0 %v11880_v42  ;;  %5702 = vmatprep.subr.bf16.mxu1 %v11887_v0  ;;  %v4594_v62 = vpop.f32.mrb[4].mxu1 }
 0x760   : > { %5654 = vmatprep.subr.bf16.mxu0 %v11882_v46  ;;  %v4596_v2 = vpop.f32.mrb[5].mxu1 }
 0x761   : > { %v4598_v57 = vpop.f32.mrb[6].mxu1 }
 0x762   : > { %5703 = vmatpush1.bf16.msra.mxu1 %v11889_v58  ;;  %v4599_v28 = vpop.f32.mrb[7].mxu1 }
 0x763   : > { %5655 = vmatpush1.bf16.msra.mxu0 %v11884_v3  ;;  %5704 = vmatprep.subr.bf16.mxu1 %v11891_v22 }
 0x764   : > { %5656 = vmatprep.subr.bf16.mxu0 %v11886_v37 }
 0x765   : > { %v4452_v33 = vpop.f32.mrb[4].mxu0 }
 0x766   : > { %v4459_v41 = vadd.f32 %v4452_v33, %v4313_v20  ;;  %v4454_v1 = vpop.f32.mrb[5].mxu0  ;;  %5705 = vmatpush1.bf16.msra.mxu1 %v11893_v11  ;;  %v11895_v20 = vld [vmem:[#allocation61_spill] sm:$0xff] }
 0x767   : > { %v4460_v35 = vadd.f32 %v4454_v1, %v4315_v40  ;;  %v4456_v53 = vpop.f32.mrb[6].mxu0  ;;  %5657 = vmatpush1.bf16.msra.mxu0 %v11888_v31  ;;  %5706 = vmatprep.subr.bf16.mxu1 %v11012_v12 }
 0x768   : > { %v4601_v47 = vadd.f32 %v4594_v62, %v4459_v41  ;;  %v4457_v16 = vpop.f32.mrb[7].mxu0  ;;  %5658 = vmatprep.subr.bf16.mxu0 %v11890_v49 }
 0x769   : > { %v4602_v32 = vadd.f32 %v4596_v2, %v4460_v35 }
 0x76a   : > { %5707 = vmatpush1.bf16.msra.mxu1 %v11021_v29 }
 0x76b   : > { %5659 = vmatpush1.bf16.msra.mxu0 %v11892_v24 }
 0x76c   : > { %5660 = vmatprep.subr.bf16.mxu0 %v11894_v51 }
 0x76d   : > { %5725 = vmatmul.mubr.bf16.vlgmr.msra.gmra.mrb[32].mxu1 %v5690_v6 }
 0x76e   : > { %5830 = vmatprep.mubr.bf16.mxu1 %v11814_v10 }
 0x76f   : > { %5661 = vmatpush1.bf16.msra.mxu0 %v11895_v20 }
 0x772   : > { %5679 = vmatmul.mubr.bf16.vlgmr.msra.gmra.mrb[32].mxu0 %v5644_v9 }
 0x773   : > { %5786 = vmatprep.mubr.bf16.mxu0 %v11814_v10 }
 0x77f   : > { %v4883_v44 = vpop.f32.mrb[8].mxu1 }
 0x780   : > { %v4885_v5 = vpop.f32.mrb[9].mxu1 }
 0x781   : > { %v4887_v12 = vpop.f32.mrb[10].mxu1 }
 0x782   : > { %v4888_v14 = vpop.f32.mrb[11].mxu1 }
 0x785   : > { %v4741_v54 = vpop.f32.mrb[8].mxu0 }
 0x786   : > { %v4748_v40 = vadd.f32 %v4741_v54, %v4601_v47  ;;  %v4743_v23 = vpop.f32.mrb[9].mxu0 }
 0x787   : > { %v4749_v61 = vadd.f32 %v4743_v23, %v4602_v32  ;;  %v4745_v21 = vpop.f32.mrb[10].mxu0 }
 0x788   : > { %v4890_v59 = vadd.f32 %v4883_v44, %v4748_v40  ;;  %v4746_v52 = vpop.f32.mrb[11].mxu0  ;;  %v11896_v21 = vld [vmem:[#allocation9_spill] sm:$0xff] }
 0x789   : > { %v4891_v8 = vadd.f32 %v4885_v5, %v4749_v61  ;;  %v11223_v12 = vsub.s32 0, %v11896_v21  ;;  %v11229_v52 = vsub.s32 1, %v11896_v21 }
 0x79f   : > { %v5172_v29 = vpop.f32.mrb[12].mxu1 }
 0x7a0   : > { %v5174_v43 = vpop.f32.mrb[13].mxu1 }
 0x7a1   : > { %v5176_v10 = vpop.f32.mrb[14].mxu1 }
 0x7a2   : > { %v5177_v15 = vpop.f32.mrb[15].mxu1 }
 0x7a5   : > { %v5025_v19 = vpop.f32.mrb[12].mxu0 }
 0x7a6   : > { %v5032_v25 = vadd.f32 %v5025_v19, %v4890_v59  ;;  %v5027_v26 = vpop.f32.mrb[13].mxu0  ;;  %v4034_v59 = vld [vmem:[%s11598_s8] sm:$0x3] }
 0x7a7   : > { %v5033_v27 = vadd.f32 %v5027_v26, %v4891_v8  ;;  %v5029_v30 = vpop.f32.mrb[14].mxu0  ;;  %v5327_v14 = vrot.slane %v4034_v59, %v11223_v12  ;;  %v5331_v8 = vrot.slane %v4034_v59, %v11229_v52  ;;  %v8325_v59 = vld [vmem:[%s11599_s9 + $0xe8] ss:$16 sps:$4 sm:$0xff]  }
 0x7a8   : > { %v5179_v63 = vadd.f32 %v5172_v29, %v5032_v25  ;;  %v5030_v17 = vpop.f32.mrb[15].mxu0 }
 0x7a9   : > { %v5180_v13 = vadd.f32 %v5174_v43, %v5033_v27 }
 0x7c0   : > { %v5372_v4 = vpop.f32.mrb[16].mxu1 }
 0x7c1   : > { %v5374_v34 = vpop.f32.mrb[17].mxu1 }
 0x7c2   : > { %v5376_v42 = vpop.f32.mrb[18].mxu1 }
 0x7c3   : > { %v5377_v46 = vpop.f32.mrb[19].mxu1 }
 0x7c5   : > { %v5314_v38 = vpop.f32.mrb[16].mxu0 }
 0x7c6   : > { %v5321_v39 = vadd.f32 %v5314_v38, %v5179_v63  ;;  %v5316_v45 = vpop.f32.mrb[17].mxu0 }
 0x7c7   : > { %v5322_v48 = vadd.f32 %v5316_v45, %v5180_v13  ;;  %v5318_v36 = vpop.f32.mrb[18].mxu0 }
 0x7c8   : > { %v5319_v50 = vpop.f32.mrb[19].mxu0  ;;  %v5334_v63 = vadd.f32 %v5327_v14, %v5321_v39  ;;  %v8282_v39 = vld [vmem:[%s11599_s9 + $0x4] ss:$16 sps:$4 sm:$0xff]  }
 0x7c9   : > { %v5335_v38 = vadd.f32 %v5331_v8, %v5322_v48  ;;  %v8285_v48 = vld [vmem:[%s11599_s9 + $0xc] ss:$16 sps:$4 sm:$0xff]  }
 0x7ca   : > { %v5336_v36 = vmax.f32 %v5334_v63, 0.0  ;;  %v8340_v63 = vld [vmem:[%s11599_s9 + $0x140] ss:$16 sps:$4 sm:$0xff]  }
 0x7cb   : > { %v5337_v50 = vmax.f32 %v5335_v38, 0.0  ;;  %v8346_v38 = vld [vmem:[%s11599_s9 + $0x160] ss:$16 sps:$4 sm:$0xff]  }
 0x7e0   : > { %v5454_v3 = vpop.f32.mrb[20].mxu1 }
 0x7e1   : > { %v5456_v0 = vpop.f32.mrb[21].mxu1 }
 0x7e2   : > { %v5458_v41 = vpop.f32.mrb[22].mxu1 }
 0x7e3   : > { %v5459_v56 = vpop.f32.mrb[23].mxu1  ;;  %v8288_v41 = vld [vmem:[%s11599_s9 + $0x24] ss:$16 sps:$4 sm:$0xff]  }
 0x7e4   : > { %v11898_v56 = vld [vmem:[#allocation14_spill] sm:$0xff] }
 0x7e5   : > { %v5413_v60 = vpop.f32.mrb[20].mxu0 }
 0x7e6   : > { %v5414_v55 = vadd.f32 %v5413_v60, %v5372_v4  ;;  %v5415_v37 = vpop.f32.mrb[21].mxu0 }
 0x7e7   : > { %v5416_v33 = vadd.f32 %v5415_v37, %v5374_v34  ;;  %v5417_v62 = vpop.f32.mrb[22].mxu0 }
 0x7e8   : > { %v5461_v1 = vadd.f32 %v5454_v3, %v5414_v55  ;;  %v5418_v2 = vpop.f32.mrb[23].mxu0  ;;  %v8283_v62 = vld [vmem:[%s11599_s9 + $0x8] ss:$16 sps:$4 sm:$0xff]  }
 0x7e9   : > { %v5462_v35 = vadd.f32 %v5456_v0, %v5416_v33  ;;  %v8280_v33 = vld [vmem:[%s11599_s9] ss:$16 sps:$4 sm:$0xff]   ;;  %v11897_v2 = vld [vmem:[#allocation11_spill] sm:$0xff] }
 0x800   : > { %v5540_v57 = vpop.f32.mrb[24].mxu1 }
 0x801   : > { %v5542_v47 = vpop.f32.mrb[25].mxu1 }
 0x802   : > { %v5544_v49 = vpop.f32.mrb[26].mxu1 }
 0x803   : > { %v5545_v7 = vpop.f32.mrb[27].mxu1  ;;  %v8298_v49 = vld [vmem:[%s11599_s9 + $0x60] ss:$16 sps:$4 sm:$0xff]  }
 0x804   : > { %v8309_v7 = vld [vmem:[%s11599_s9 + $0x8c] ss:$16 sps:$4 sm:$0xff]  }
 0x805   : > { %v5497_v53 = vpop.f32.mrb[24].mxu0 }
 0x806   : > { %v5504_v31 = vadd.f32 %v5497_v53, %v5461_v1  ;;  %v5499_v58 = vpop.f32.mrb[25].mxu0  ;;  %v8291_v1 = vld [vmem:[%s11599_s9 + $0x2c] ss:$16 sps:$4 sm:$0xff]   ;;  %v8289_v53 = vld [vmem:[%s11599_s9 + $0x28] ss:$16 sps:$4 sm:$0xff]  }
 0x807   : > { %v5505_v16 = vadd.f32 %v5499_v58, %v5462_v35  ;;  %v5501_v28 = vpop.f32.mrb[26].mxu0  ;;  %v8286_v35 = vld [vmem:[%s11599_s9 + $0x20] ss:$16 sps:$4 sm:$0xff]  }
 0x808   : > { %v5547_v22 = vadd.f32 %v5540_v57, %v5504_v31  ;;  %v5502_v32 = vpop.f32.mrb[27].mxu0  ;;  %v8294_v57 = vld [vmem:[%s11599_s9 + $0x44] ss:$16 sps:$4 sm:$0xff]   ;;  %v8297_v31 = vld [vmem:[%s11599_s9 + $0x4c] ss:$16 sps:$4 sm:$0xff]  }
 0x809   : > { %v5548_v18 = vadd.f32 %v5542_v47, %v5505_v16  ;;  %v8292_v58 = vld [vmem:[%s11599_s9 + $0x40] ss:$16 sps:$4 sm:$0xff]   ;;  %v8295_v47 = vld [vmem:[%s11599_s9 + $0x48] ss:$16 sps:$4 sm:$0xff]   ;;  %v8300_v16 = vld [vmem:[%s11599_s9 + $0x64] ss:$16 sps:$4 sm:$0xff]  }
 0x80a   : > { %v8303_v28 = vld [vmem:[%s11599_s9 + $0x6c] ss:$16 sps:$4 sm:$0xff]   ;;  %v8306_v32 = vld [vmem:[%s11599_s9 + $0x84] ss:$16 sps:$4 sm:$0xff]  }
 0x820   : > { %v5629_v11 = vpop.f32.mrb[28].mxu1 }
 0x821   : > { %v5631_v6 = vpop.f32.mrb[29].mxu1 }
 0x822   : > { %v5633_v44 = vpop.f32.mrb[30].mxu1 }
 0x823   : > { %v5634_v5 = vpop.f32.mrb[31].mxu1  ;;  %v8316_v44 = vld [vmem:[%s11599_s9 + $0xc0] ss:$16 sps:$4 sm:$0xff]  }
 0x824   : > { %v8327_v5 = vld [vmem:[%s11599_s9 + $0xec] ss:$16 sps:$4 sm:$0xff]  }
 0x825   : > { %v5583_v24 = vpop.f32.mrb[28].mxu0 }
 0x826   : > { %v5590_v51 = vadd.f32 %v5583_v24, %v5547_v22  ;;  %v5585_v9 = vpop.f32.mrb[29].mxu0  ;;  %v8301_v22 = vld [vmem:[%s11599_s9 + $0x68] ss:$16 sps:$4 sm:$0xff]  }
 0x827   : > { %v5591_v20 = vadd.f32 %v5585_v9, %v5548_v18  ;;  %v5587_v54 = vpop.f32.mrb[30].mxu0  ;;  %v8304_v18 = vld [vmem:[%s11599_s9 + $0x80] ss:$16 sps:$4 sm:$0xff]   ;;  %v8307_v24 = vld [vmem:[%s11599_s9 + $0x88] ss:$16 sps:$4 sm:$0xff]  }
 0x828   : > { %v5636_v40 = vadd.f32 %v5629_v11, %v5590_v51  ;;  %v5588_v23 = vpop.f32.mrb[31].mxu0  ;;  %v8312_v11 = vld [vmem:[%s11599_s9 + $0xa4] ss:$16 sps:$4 sm:$0xff]   ;;  %v8315_v51 = vld [vmem:[%s11599_s9 + $0xac] ss:$16 sps:$4 sm:$0xff]  }
 0x829   : > { %v5637_v61 = vadd.f32 %v5631_v6, %v5591_v20  ;;  %v8310_v9 = vld [vmem:[%s11599_s9 + $0xa0] ss:$16 sps:$4 sm:$0xff]   ;;  %v8313_v6 = vld [vmem:[%s11599_s9 + $0xa8] ss:$16 sps:$4 sm:$0xff]   ;;  %v8318_v20 = vld [vmem:[%s11599_s9 + $0xc4] ss:$16 sps:$4 sm:$0xff]  }
 0x82a   : > { %v8321_v54 = vld [vmem:[%s11599_s9 + $0xcc] ss:$16 sps:$4 sm:$0xff]   ;;  %v8324_v23 = vld [vmem:[%s11599_s9 + $0xe4] ss:$16 sps:$4 sm:$0xff]  }
 0x840   : > { %v5726_v29 = vpop.f32.mrb[32].mxu1 }
 0x841   : > { %v5728_v43 = vpop.f32.mrb[33].mxu1 }
 0x842   : > { %v5730_v10 = vpop.f32.mrb[34].mxu1 }
 0x843   : > { %v5731_v13 = vpop.f32.mrb[35].mxu1  ;;  %v8345_v10 = vld [vmem:[%s11599_s9 + $0x14c] ss:$16 sps:$4 sm:$0xff]  }
 0x844   : > { %v8351_v13 = vld [vmem:[%s11599_s9 + $0x16c] ss:$16 sps:$4 sm:$0xff]  }
 0x845   : > { %v5680_v19 = vpop.f32.mrb[32].mxu0 }
 0x846   : > { %v5687_v25 = vadd.f32 %v5680_v19, %v5636_v40  ;;  %v5682_v26 = vpop.f32.mrb[33].mxu0  ;;  %v8319_v40 = vld [vmem:[%s11599_s9 + $0xc8] ss:$16 sps:$4 sm:$0xff]   ;;  %v8328_v19 = vld [vmem:[%s11599_s9 + $0x100] ss:$16 sps:$4 sm:$0xff]  }
 0x847   : > { %v5688_v27 = vadd.f32 %v5682_v26, %v5637_v61  ;;  %v5684_v30 = vpop.f32.mrb[34].mxu0  ;;  %v8322_v61 = vld [vmem:[%s11599_s9 + $0xe0] ss:$16 sps:$4 sm:$0xff]   ;;  %v8339_v26 = vld [vmem:[%s11599_s9 + $0x12c] ss:$16 sps:$4 sm:$0xff]  }
 0x848   : > { %v5733_v17 = vadd.f32 %v5726_v29, %v5687_v25  ;;  %v5685_v15 = vpop.f32.mrb[35].mxu0  ;;  %v8331_v29 = vld [vmem:[%s11599_s9 + $0x108] ss:$16 sps:$4 sm:$0xff]   ;;  %v8336_v25 = vld [vmem:[%s11599_s9 + $0x124] ss:$16 sps:$4 sm:$0xff]  }
 0x849   : > { %v5734_v4 = vadd.f32 %v5728_v43, %v5688_v27  ;;  %v8334_v43 = vld [vmem:[%s11599_s9 + $0x120] ss:$16 sps:$4 sm:$0xff]   ;;  %v8337_v27 = vld [vmem:[%s11599_s9 + $0x128] ss:$16 sps:$4 sm:$0xff]   ;;  %v8342_v30 = vld [vmem:[%s11599_s9 + $0x144] ss:$16 sps:$4 sm:$0xff]  }
 0x84a   : > { %v5735_v45 = vadd.f32 %v5733_v17, %v5327_v14  ;;  %v8330_v14 = vld [vmem:[%s11599_s9 + $0x104] ss:$16 sps:$4 sm:$0xff]   ;;  %v8343_v17 = vld [vmem:[%s11599_s9 + $0x148] ss:$16 sps:$4 sm:$0xff]  }
 0x84b   : > { %v5736_v34 = vadd.f32 %v5734_v4, %v5331_v8  ;;  %v8333_v8 = vld [vmem:[%s11599_s9 + $0x10c] ss:$16 sps:$4 sm:$0xff]   ;;  %v8348_v15 = vld [vmem:[%s11599_s9 + $0x164] ss:$16 sps:$4 sm:$0xff]   ;;  %v8349_v4 = vld [vmem:[%s11599_s9 + $0x168] ss:$16 sps:$4 sm:$0xff]  }
 0x84c   : > { %v5737_v42 = vmax.f32 %v5735_v45, 0.0  ;;  %v8354_v45 = vld [vmem:[%s11599_s9 + $0x184] ss:$16 sps:$4 sm:$0xff]  }
 0x84d   : > { %v5738_v46 = vmax.f32 %v5736_v34, 0.0  ;;  %v8357_v34 = vld [vmem:[%s11599_s9 + $0x18c] ss:$16 sps:$4 sm:$0xff]  }
 0x84e   : > { %v5739_v60 = vmax.f32 %v5336_v36, %v5737_v42  ;;  %v8352_v36 = vld [vmem:[%s11599_s9 + $0x180] ss:$16 sps:$4 sm:$0xff]   ;;  %v8355_v42 = vld [vmem:[%s11599_s9 + $0x188] ss:$16 sps:$4 sm:$0xff]  }
 0x84f   : > { %v5740_v3 = vmax.f32 %v5337_v50, %v5738_v46  ;;  %v8360_v50 = vld [vmem:[%s11599_s9 + $0x1a4] ss:$16 sps:$4 sm:$0xff]   ;;  %v8363_v46 = vld [vmem:[%s11599_s9 + $0x1ac] ss:$16 sps:$4 sm:$0xff]  }
 0x850   : > { %v5741_v55 = vpack.c.bf16 %v5739_v60, %v5739_v60  ;;  %v8358_v60 = vld [vmem:[%s11599_s9 + $0x1a0] ss:$16 sps:$4 sm:$0xff]  }
 0x851   : > { %v5742_v37 = vpack.c.bf16 %v5740_v3, %v5740_v3  ;;  %v8361_v3 = vld [vmem:[%s11599_s9 + $0x1a8] ss:$16 sps:$4 sm:$0xff]  }
 0x852   : > { %v5749_v0 = vsel %vm5747_vm4, %v5741_v55, 0  ;;  %v8366_v55 = vld [vmem:[%s11599_s9 + $0x1c4] ss:$16 sps:$4 sm:$0xff]  }
 0x853   : > { %7194 = vmatprep.subr.msk.bf16.mxu0 %vm5747_vm4, %v5742_v37  ;;  %7196 = vmatprep.subr.msk.bf16.mxu1 %vm5747_vm4, %v5742_v37  ;;  %v8369_v37 = vld [vmem:[%s11599_s9 + $0x1cc] ss:$16 sps:$4 sm:$0xff]  }
 0x854   : > { %5755 = vmatpush1.bf16.msra.mxu0 %v5749_v0  ;;  %5799 = vmatpush1.bf16.msra.mxu1 %v5749_v0  ;;  %v8372_v0 = vld [vmem:[%s11599_s9 + $0x1e4] ss:$16 sps:$4 sm:$0xff]  }
 0x855   : > { %6284 = vmatprep.subr.bf16.mxu0 %v8282_v39  ;;  %6325 = vmatprep.subr.bf16.mxu1 %v8285_v48  ;;  %v8364_v39 = vld [vmem:[%s11599_s9 + $0x1c0] ss:$16 sps:$4 sm:$0xff]   ;;  %v8367_v48 = vld [vmem:[%s11599_s9 + $0x1c8] ss:$16 sps:$4 sm:$0xff]  }
 0x857   : > { %7195 = vmatmul.mubr.msk.bf16.vlgmr.msra.gmra.mrb[36].mxu0 %vm5743_vm5, %v11897_v2  ;;  %7197 = vmatmul.mubr.msk.bf16.vlgmr.msra.gmra.mrb[36].mxu1 %vm5743_vm5, %v11898_v56  ;;  %v8377_v2 = vld [vmem:[%s11601_s11 + $0xc0] sm:$0xff]   ;;  %v8545_v56 = vmov 1966171168  }
 0x858   : > { %6285 = vmatpush1.bf16.msra.mxu0 %v8280_v33  ;;  %6326 = vmatpush1.bf16.msra.mxu1 %v8283_v62  ;;  %v8375_v33 = vld [vmem:[%s11599_s9 + $0x1ec] ss:$16 sps:$4 sm:$0xff]   ;;  %v8370_v62 = vld [vmem:[%s11599_s9 + $0x1e0] ss:$16 sps:$4 sm:$0xff]  }
 0x859   : > { %6286 = vmatprep.subr.bf16.mxu0 %v8288_v41  ;;  %6327 = vmatprep.subr.bf16.mxu1 %v8291_v1  ;;  %v8373_v41 = vld [vmem:[%s11599_s9 + $0x1e8] ss:$16 sps:$4 sm:$0xff]   ;;  %v8376_v1 = vld [vmem:[%s11601_s11 + $0x40] sm:$0xff]  }
 0x85c   : > { %6287 = vmatpush1.bf16.msra.mxu0 %v8286_v35  ;;  %6328 = vmatpush1.bf16.msra.mxu1 %v8289_v53  ;;  %v5845_v35 = vunpack.c.l.s4 %v8545_v56 }
 0x85d   : > { %6288 = vmatprep.subr.bf16.mxu0 %v8294_v57  ;;  %6329 = vmatprep.subr.bf16.mxu1 %v8297_v31 }
 0x85e   : > { %v5846_v53 = vunpack.c.0.s8 %v5845_v35 }
 0x860   : > { %6289 = vmatpush1.bf16.msra.mxu0 %v8292_v58  ;;  %6330 = vmatpush1.bf16.msra.mxu1 %v8295_v47 }
 0x861   : > { %6290 = vmatprep.subr.bf16.mxu0 %v8300_v16  ;;  %6331 = vmatprep.subr.bf16.mxu1 %v8303_v28 }
 0x864   : > { %6291 = vmatpush1.bf16.msra.mxu0 %v8298_v49  ;;  %6332 = vmatpush1.bf16.msra.mxu1 %v8301_v22  ;;  %v5849_v49 = vsub.s32 %v5846_v53, %v11896_v21 }
 0x865   : > { %6292 = vmatprep.subr.bf16.mxu0 %v8306_v32  ;;  %6333 = vmatprep.subr.bf16.mxu1 %v8309_v7 }
 0x868   : > { %6293 = vmatpush1.bf16.msra.mxu0 %v8304_v18  ;;  %6334 = vmatpush1.bf16.msra.mxu1 %v8307_v24 }
 0x869   : > { %6294 = vmatprep.subr.bf16.mxu0 %v8312_v11  ;;  %6335 = vmatprep.subr.bf16.mxu1 %v8315_v51  ;;  %v11899_v51 = vlaneseq }
 0x86b   : > { %vm5861_vm6 = vcmp.lt.s32.totalorder %v11899_v51, 256 }
 0x86c   : > { %6295 = vmatpush1.bf16.msra.mxu0 %v8310_v9  ;;  %6336 = vmatpush1.bf16.msra.mxu1 %v8313_v6 }
 0x86d   : > { %6296 = vmatprep.subr.bf16.mxu0 %v8318_v20  ;;  %6337 = vmatprep.subr.bf16.mxu1 %v8321_v54 }
 0x870   : > { %6297 = vmatpush1.bf16.msra.mxu0 %v8316_v44  ;;  %6338 = vmatpush1.bf16.msra.mxu1 %v8319_v40 }
 0x871   : > { %6298 = vmatprep.subr.bf16.mxu0 %v8324_v23  ;;  %6339 = vmatprep.subr.bf16.mxu1 %v8327_v5  ;;  %v8378_v23 = vld [vmem:[%s11601_s11] sm:$0xff]  }
 0x872   : > { %v8379_v5 = vld [vmem:[%s11601_s11 + $0x80] sm:$0xff]  }
 0x874   : > { %6299 = vmatpush1.bf16.msra.mxu0 %v8322_v61  ;;  %6340 = vmatpush1.bf16.msra.mxu1 %v8325_v59  ;;  %v8380_v61 = vld [vmem:[%s11601_s11 + $0x48] sm:$0xff]  }
 0x875   : > { %6300 = vmatprep.subr.bf16.mxu0 %v8330_v14  ;;  %6341 = vmatprep.subr.bf16.mxu1 %v8333_v8  ;;  %v8381_v59 = vld [vmem:[%s11601_s11 + $0xc8] sm:$0xff]  }
 0x876   : > { %v8382_v14 = vld [vmem:[%s11601_s11 + $0x8] sm:$0xff]  }
 0x877   : > { %v8383_v8 = vld [vmem:[%s11601_s11 + $0x88] sm:$0xff]  }
 0x878   : > { %6301 = vmatpush1.bf16.msra.mxu0 %v8328_v19  ;;  %6342 = vmatpush1.bf16.msra.mxu1 %v8331_v29  ;;  %v8384_v19 = vld [vmem:[%s11601_s11 + $0x50] sm:$0xff]  }
 0x879   : > { %6302 = vmatprep.subr.bf16.mxu0 %v8336_v25  ;;  %6343 = vmatprep.subr.bf16.mxu1 %v8339_v26  ;;  %v8385_v29 = vld [vmem:[%s11601_s11 + $0xd0] sm:$0xff]  }
 0x87a   : > { %v8386_v25 = vld [vmem:[%s11601_s11 + $0x10] sm:$0xff]  }
 0x87b   : > { %v8387_v26 = vld [vmem:[%s11601_s11 + $0x90] sm:$0xff]  }
 0x87c   : > { %6303 = vmatpush1.bf16.msra.mxu0 %v8334_v43  ;;  %6344 = vmatpush1.bf16.msra.mxu1 %v8337_v27  ;;  %v8388_v43 = vld [vmem:[%s11601_s11 + $0x58] sm:$0xff]  }
 0x87d   : > { %6304 = vmatprep.subr.bf16.mxu0 %v8342_v30  ;;  %6345 = vmatprep.subr.bf16.mxu1 %v8345_v10  ;;  %v8389_v27 = vld [vmem:[%s11601_s11 + $0xd8] sm:$0xff]  }
 0x87e   : > { %v8390_v30 = vld [vmem:[%s11601_s11 + $0x18] sm:$0xff]  }
 0x87f   : > { %v8391_v10 = vld [vmem:[%s11601_s11 + $0x98] sm:$0xff]  }
 0x880   : > { %6305 = vmatpush1.bf16.msra.mxu0 %v8340_v63  ;;  %6346 = vmatpush1.bf16.msra.mxu1 %v8343_v17  ;;  %v8392_v63 = vld [vmem:[%s11601_s11 + $0x60] sm:$0xff]  }
 0x881   : > { %6306 = vmatprep.subr.bf16.mxu0 %v8348_v15  ;;  %6347 = vmatprep.subr.bf16.mxu1 %v8351_v13  ;;  %v8393_v17 = vld [vmem:[%s11601_s11 + $0xe0] sm:$0xff]  }
 0x882   : > { %v8394_v15 = vld [vmem:[%s11601_s11 + $0x20] sm:$0xff]  }
 0x883   : > { %v8395_v13 = vld [vmem:[%s11601_s11 + $0xa0] sm:$0xff]  }
 0x884   : > { %6307 = vmatpush1.bf16.msra.mxu0 %v8346_v38  ;;  %6348 = vmatpush1.bf16.msra.mxu1 %v8349_v4  ;;  %v8396_v38 = vld [vmem:[%s11601_s11 + $0x68] sm:$0xff]  }
 0x885   : > { %6308 = vmatprep.subr.bf16.mxu0 %v8354_v45  ;;  %6349 = vmatprep.subr.bf16.mxu1 %v8357_v34  ;;  %v8397_v4 = vld [vmem:[%s11601_s11 + $0xe8] sm:$0xff]  }
 0x886   : > { %v8398_v45 = vld [vmem:[%s11601_s11 + $0x28] sm:$0xff]  }
 0x887   : > { %v8399_v34 = vld [vmem:[%s11601_s11 + $0xa8] sm:$0xff]  }
 0x888   : > { %6309 = vmatpush1.bf16.msra.mxu0 %v8352_v36  ;;  %6350 = vmatpush1.bf16.msra.mxu1 %v8355_v42  ;;  %v8400_v36 = vld [vmem:[%s11601_s11 + $0x70] sm:$0xff]  }
 0x889   : > { %6310 = vmatprep.subr.bf16.mxu0 %v8360_v50  ;;  %6351 = vmatprep.subr.bf16.mxu1 %v8363_v46  ;;  %v8401_v42 = vld [vmem:[%s11601_s11 + $0xf0] sm:$0xff]  }
 0x88a   : > { %v8402_v50 = vld [vmem:[%s11601_s11 + $0x30] sm:$0xff]  }
 0x88b   : > { %v8403_v46 = vld [vmem:[%s11601_s11 + $0xb0] sm:$0xff]  }
 0x88c   : > { %6311 = vmatpush1.bf16.msra.mxu0 %v8358_v60  ;;  %6352 = vmatpush1.bf16.msra.mxu1 %v8361_v3  ;;  %v8404_v60 = vld [vmem:[%s11601_s11 + $0x78] sm:$0xff]  }
 0x88d   : > { %6312 = vmatprep.subr.bf16.mxu0 %v8366_v55  ;;  %6353 = vmatprep.subr.bf16.mxu1 %v8369_v37  ;;  %v8405_v3 = vld [vmem:[%s11601_s11 + $0xf8] sm:$0xff]  }
 0x88e   : > { %v8406_v55 = vld [vmem:[%s11601_s11 + $0x38] sm:$0xff]  }
 0x88f   : > { %v8407_v37 = vld [vmem:[%s11601_s11 + $0xb8] sm:$0xff]  }
 0x890   : > { %6313 = vmatpush1.bf16.msra.mxu0 %v8364_v39  ;;  %6354 = vmatpush1.bf16.msra.mxu1 %v8367_v48  ;;  %v6274_v39 = vsub.s32 2, %v11896_v21  ;;  %v5942_v48 = vld [vmem:[%s11600_s10] sm:$0xf] }
 0x891   : > { %6314 = vmatprep.subr.bf16.mxu0 %v8372_v0  ;;  %6355 = vmatprep.subr.bf16.mxu1 %v8375_v33  ;;  %v6278_v0 = vsub.s32 3, %v11896_v21  ;;  %v6267_v33 = vrot.slane %v5942_v48, %v11223_v12 }
 0x894   : > { %6315 = vmatpush1.bf16.msra.mxu0 %v8370_v62  ;;  %6356 = vmatpush1.bf16.msra.mxu1 %v8373_v41  ;;  %v6275_v62 = vrot.slane %v5942_v48, %v6274_v39  ;;  %v6271_v41 = vrot.slane %v5942_v48, %v11229_v52 }
 0x895   : > { %7483 = vmatprep.subr.bf16.mxu0 %v8376_v1  ;;  %7505 = vmatprep.subr.bf16.mxu1 %v8377_v2  ;;  %v6279_v1 = vrot.slane %v5942_v48, %v6278_v0 }
 0x92a   : > { %v5788_v57 = vpop.f32.mrb[36].mxu0  ;;  %v5832_v31 = vpop.f32.mrb[36].mxu1 }
 0x92b   : > { %v5839_v58 = vmax.f32 %v5788_v57, %v5832_v31  ;;  %v5790_v47 = vpop.f32.mrb[37].mxu0  ;;  %v5834_v16 = vpop.f32.mrb[37].mxu1 }
 0x92c   : > { %v5840_v28 = vmax.f32 %v5790_v47, %v5834_v16  ;;  %v5792_v22 = vpop.f32.mrb[38].mxu0  ;;  %v5836_v32 = vpop.f32.mrb[38].mxu1 }
 0x92d   : > { %v5793_v7 = vpop.f32.mrb[39].mxu0  ;;  %v5837_v18 = vpop.f32.mrb[39].mxu1 }
 0x92e   : > { %v5843_v24 = vcombine.low %v5839_v58, %v5840_v28 }
 0x930   : > { %v5850_v11 = vrot.slane %v5843_v24, %v5849_v49 }
 0x932   : > { %v5857_v9 = vrot.slane %v5850_v11, %v5849_v49 }
 0x934   : > { %5863 = vst.msk [vmem:[#allocation5] sm:$0x3] %vm5861_vm6, %v5857_v9 }
 0x93b   : > { %v5864_v6 = vld [vmem:[#allocation5] sm:$0x3] }
 0x93c   : > { %v5869_v20 = vrot.slane %v5864_v6, %v11223_v12  ;;  %v5873_v54 = vrot.slane %v5864_v6, %v11229_v52  ;;  %v6438_v6 = vld [vmem:[%s11602_s12] sm:$0x1] }
 0x93e   : > { %v5876_v44 = vpack.c.bf16 %v5869_v20, %v5869_v20  ;;  %v5877_v40 = vpack.c.bf16 %v5873_v54, %v5873_v54 }
 0x940   : > { %6316 = vmatprep.mubr.bf16.mxu0 %v5877_v40  ;;  %6357 = vmatprep.mubr.bf16.mxu1 %v5877_v40 }
 0x941   : > { %6317 = vmatmul.mubr.bf16.vlgmr.msra.gmra.mrb[40].mxu0 %v5876_v44  ;;  %6358 = vmatmul.mubr.bf16.vlgmr.msra.gmra.mrb[40].mxu1 %v5876_v44 }
 0x942   : > { %7484 = vmatpush3.bf16.msra.mxu0 %v8378_v23  ;;  %7506 = vmatpush3.bf16.msra.mxu1 %v8379_v5 }
 0x943   : > { %7485 = vmatprep.subr.bf16.mxu0 %v8380_v61  ;;  %7507 = vmatprep.subr.bf16.mxu1 %v8381_v59 }
 0x946   : > { %7486 = vmatpush3.bf16.msra.mxu0 %v8382_v14  ;;  %7508 = vmatpush3.bf16.msra.mxu1 %v8383_v8 }
 0x947   : > { %7487 = vmatprep.subr.bf16.mxu0 %v8384_v19  ;;  %7509 = vmatprep.subr.bf16.mxu1 %v8385_v29 }
 0x94a   : > { %7488 = vmatpush3.bf16.msra.mxu0 %v8386_v25  ;;  %7510 = vmatpush3.bf16.msra.mxu1 %v8387_v26 }
 0x94b   : > { %7489 = vmatprep.subr.bf16.mxu0 %v8388_v43  ;;  %7511 = vmatprep.subr.bf16.mxu1 %v8389_v27 }
 0x94e   : > { %7490 = vmatpush3.bf16.msra.mxu0 %v8390_v30  ;;  %7512 = vmatpush3.bf16.msra.mxu1 %v8391_v10 }
 0x94f   : > { %7491 = vmatprep.subr.bf16.mxu0 %v8392_v63  ;;  %7513 = vmatprep.subr.bf16.mxu1 %v8393_v17 }
 0x952   : > { %7492 = vmatpush3.bf16.msra.mxu0 %v8394_v15  ;;  %7514 = vmatpush3.bf16.msra.mxu1 %v8395_v13 }
 0x953   : > { %7493 = vmatprep.subr.bf16.mxu0 %v8396_v38  ;;  %7515 = vmatprep.subr.bf16.mxu1 %v8397_v4 }
 0x956   : > { %7494 = vmatpush3.bf16.msra.mxu0 %v8398_v45  ;;  %7516 = vmatpush3.bf16.msra.mxu1 %v8399_v34 }
 0x957   : > { %7495 = vmatprep.subr.bf16.mxu0 %v8400_v36  ;;  %7517 = vmatprep.subr.bf16.mxu1 %v8401_v42 }
 0x95a   : > { %7496 = vmatpush3.bf16.msra.mxu0 %v8402_v50  ;;  %7518 = vmatpush3.bf16.msra.mxu1 %v8403_v46 }
 0x95b   : > { %7497 = vmatprep.subr.bf16.mxu0 %v8404_v60  ;;  %7519 = vmatprep.subr.bf16.mxu1 %v8405_v3 }
 0x95e   : > { %7498 = vmatpush3.bf16.msra.mxu0 %v8406_v55  ;;  %7520 = vmatpush3.bf16.msra.mxu1 %v8407_v37 }
 0xa14   : > { %v6318_v2 = vpop.f32.mrb[40].mxu0  ;;  %v6359_v56 = vpop.f32.mrb[40].mxu1 }
 0xa15   : > { %v6319_v35 = vadd.f32 %v6318_v2, %v6267_v33  ;;  %v6360_v53 = vadd.f32 %v6359_v56, %v6275_v62  ;;  %v6320_v57 = vpop.f32.mrb[41].mxu0  ;;  %v6361_v31 = vpop.f32.mrb[41].mxu1 }
 0xa16   : > { %v6321_v58 = vadd.f32 %v6320_v57, %v6271_v41  ;;  %v6362_v47 = vadd.f32 %v6361_v31, %v6279_v1  ;;  %v6322_v16 = vpop.f32.mrb[42].mxu0  ;;  %v6363_v28 = vpop.f32.mrb[42].mxu1 }
 0xa17   : > { %v6366_v49 = vmax.f32 %v6319_v35, 0.0  ;;  %v6368_v22 = vmax.f32 %v6360_v53, 0.0  ;;  %v6323_v32 = vpop.f32.mrb[43].mxu0  ;;  %v6364_v21 = vpop.f32.mrb[43].mxu1 }
 0xa18   : > { %v6367_v7 = vmax.f32 %v6321_v58, 0.0  ;;  %v6369_v12 = vmax.f32 %v6362_v47, 0.0 }
 0xa19   : > { %v6370_v52 = vpack.c.bf16 %v6366_v49, %v6366_v49  ;;  %v6372_v11 = vpack.c.bf16 %v6368_v22, %v6368_v22 }
 0xa1a   : > { %v6371_v18 = vpack.c.bf16 %v6367_v7, %v6367_v7  ;;  %v6373_v24 = vpack.c.bf16 %v6369_v12, %v6369_v12 }
 0xa1c   : > { %6663 = vmatprep.mubr.bf16.mxu0 %v6371_v18  ;;  %6703 = vmatprep.mubr.bf16.mxu1 %v6373_v24 }
 0xa1d   : > { %6664 = vmatmul.mubr.bf16.vlgmr.msra.gmra.mrb[44].mxu0 %v6370_v52  ;;  %6704 = vmatmul.mubr.bf16.vlgmr.msra.gmra.mrb[44].mxu1 %v6372_v11 }
 0xaf0   : > { %v7499_v51 = vpop.f32.mrb[44].mxu0  ;;  %v7521_v9 = vpop.f32.mrb[44].mxu1 }
 0xaf1   : > { %v7500_v20 = vpop.f32.mrb[45].mxu0  ;;  %v7522_v54 = vpop.f32.mrb[45].mxu1 }
 0xaf2   : > { %v7501_v44 = vadd.f32 %v7500_v20, %v7499_v51  ;;  %v7523_v40 = vadd.f32 %v7522_v54, %v7521_v9  ;;  %v7502_v23 = vpop.f32.mrb[46].mxu0  ;;  %v7524_v5 = vpop.f32.mrb[46].mxu1 }
 0xaf3   : > { %v7503_v61 = vpop.f32.mrb[47].mxu0  ;;  %v7525_v59 = vpop.f32.mrb[47].mxu1 }
 0xaf4   : > { %v6666_v14 = vadd.f32 %v7501_v44, %v6438_v6 }
 0xaf6   : > { %v6706_v8 = vadd.f32 %v7523_v40, %v6666_v14 }
 0xaf8   : > { %v6712_v19 = vsel %vm6711_vm7, %v6706_v8, -inf }
 0xaf9   : > { %6713 = vmax.xlane.f32.xlu0 %v6712_v19 }
 0xb86   : > { %v6714_v29 = vpop.xlane.xlu0 %6713 }
 0xb87   : > { %v6715_v25 = vsub.f32 %v6706_v8, %v6714_v29 }
 0xb89   : > { %v6716_v26 = vmul.f32 1.442695, %v6715_v25 }
 0xb8b   : > { %8408 = vpow2.f32 %v6716_v26 }
 0xb95   : > { %v8409_v43 = vpop.eup %8408 }
 0xb96   : > { %v6718_v27 = vsel %vm6711_vm7, %v8409_v43, 0.0 }
 0xb97   : > { %6719 = vadd.xlane.f32.xlu0 %v6718_v27 }
 0xc24   : > { %v6720_v30 = vpop.xlane.xlu0 %6719 }
 0xc25   : > { %8410 = vrcp.f32 %v6720_v30 }
 0xc2f   : > { %v8411_v10 = vpop.eup %8410 }
 0xc30   : > { %v6722_v63 = vmul.f32 %v8411_v10, %v8409_v43 }
 0xc32   : > { %6723 = vst.msk [vmem:[%s8704_s21] sm:$0x1] %vm6711_vm7, %v6722_v63 }
 0xc33   : > { %8462 = shalt.err (!%p8459_p8)
}
 0xc34   : > { %s8463_s21 = scalar_lea.hbm %s11544_s23, 16  ;;  %s8467_s1 = scalar_lea.hbm %s11603_s13, 32 }
 0xc35   : > { %p8464_p9 = scmp.ne.s32.totalorder %s11544_s23, %s8463_s21  ;;  %p8468_p12 = scmp.lt.u32.totalorder %s11544_s23, %s11603_s13 }
 0xc36   : > { %p8469_p13 = scmp.lt.u32.totalorder %s8467_s1, %s8463_s21  ;;  %p8471_p1 = scmp.lt.u32.totalorder %s8463_s21, %s11544_s23 }
 0xc37   : > { %p8465_p10 = pnand %p8464_p9, %p8655_p5 }
 0xc38   : > { %p8470_p0 = por %p8469_p13, %p8468_p12 }
 0xc39   : > { %p8466_p11 = pneg %p8465_p10 }
 0xc3a   : > { %p8472_p2 = por %p8471_p1, %p8470_p0 }
 0xc3c   : > { %p8473_p3 = pnand %p8472_p2, %p8466_p11 }
 0xc3e   : > { %8476 = shalt.err (!%p8473_p3)
}
 0xc3f   : > { %7936 = dma.vmem_to_hbm [thread:$0]  (%p8655_p5), %s11546_s16, 16, %s11544_s23, %s6725_s15  }
 0xc40 PF: > { %p7942_p4 = scmp.ge.s32.totalorder %s8523_s28, 2  ;;  %s6749_s0 = sand.u32 1, %s8511_s25  }
 0xc41   : > { %s6750_s30 = scalar_lea.sflag [#allocation7], %s6749_s0 }
 0xc42   : > { %p7939_p7 = pnand %p7942_p4, %p8659_p6 }
 0xc44   : > { %8506 = dma.done.wait (!%p7939_p7), %s6750_s30, 16  }
 0xc45   : > { %8508 = vsyncadd (!%p7939_p7), %s6750_s30, 4294967280  ;;  %p23_p8 = scmp.ge.s32.totalorder %s8642_s14, 4   ;;  %s11901_s25 = smov %s8515_s26 }
 0xc46   : > { %s11902_s26 = smov %s8519_s27  ;;  %s11903_s27 = smov %s8653_s17 }
 0xc47   : > { %s11904_s28 = smov %s8642_s14  ;;  %25 = sbr.rel (!%p23_p8) target bundleno = 7 (0x7), region = 179 }
 0xc4e   :  { %6754 = vsyncpa [#allocation7], 1 }
 0xc4f   :  { %6756 = vsyncpa [#allocation7 + $0x1], 1 }

</bundles_post_ra>
